<compile_context>
chip_gen: v7x
topology: tpu7x:2x2x1
jax: 0.10.0
libtpu: 0.0.40
codegen_flags: <defaults>
</compile_context>

<pallas_src>
import jax
import jax.numpy as jnp
from jax import lax
from jax.experimental import pallas as pl
from jax.experimental.pallas import tpu as pltpu


# ------------------------------------------------------------------ kernel --

def _stacked_attention_kernel(x_ref, w12_ref, wvqk_ref, wt_ref, sb_ref, o_ref):
    """Full StackedAttention forward for BB batch elements.

    x_ref:    (BB, C, N)        input block in PyTorch NCW layout (f32)
    w12_ref:  (2, C, C)         conv1/conv2 weights (Cin, Cout), dot dtype
    wvqk_ref: (4, C, C + C/4)   per-layer packed [v_conv | q/k_conv] weights
    wt_ref:   (4, C, C)         per-layer trans_conv weights
    sb_ref:   (20, C)           packed scale/bias rows (f32), see sb() indices
    o_ref:    (BB, N, 4C)       concatenated SA outputs, tokens-major
    """
    BB, C, N = x_ref.shape
    dot_dtype = w12_ref.dtype          # bf16 for MXU (or f32 if requested)

    def sb(row):                       # (1, C) f32 scale/bias row
        return sb_ref[row:row + 1, :]

    # conv1 (1x1) fused with the NCW->NWC layout change: contract the channel
    # dim of each (C, N) block against the (Cin, Cout) weight, then stack the
    # BB results into one (BB*N, C) token slab.
    x_blk = x_ref[...].astype(dot_dtype)                            # (BB, C, N)
    parts = [
        lax.dot_general(x_blk[bi], w12_ref[0], (((0,), (0,)), ((), ())),
                        preferred_element_type=jnp.float32)         # (N, C)
        for bi in range(BB)
    ]
    x = jnp.concatenate(parts, axis=0)                              # (BB*N, C)
    x = jnp.maximum(x * sb(0) + sb(2), 0.0)                         # bn1 + relu

    # conv2 -> bn2 -> relu on the whole token slab.
    x = jnp.dot(x.astype(dot_dtype), w12_ref[1],
                preferred_element_type=jnp.float32)
    x = jnp.maximum(x * sb(1) + sb(3), 0.0)                         # (BB*N, C)

    outs = []
    for l in range(4):
        # Merged v / (q==k) projection: one (BB*N, C) @ (C, C + C/4) matmul.
        pv = jnp.dot(x.astype(dot_dtype), wvqk_ref[l],
                     preferred_element_type=jnp.float32)            # (BB*N, C+C/4)
        xv = pv[:, :C] + sb(4 + l)                                  # v_conv (+bias)
        qk = pv[:, C:]                                              # shared q/k proj

        xr_parts = []
        for bi in range(BB):
            qk_b = qk[bi * N:(bi + 1) * N].astype(dot_dtype)        # (N, C/4)
            # energy = qk @ qk^T is exactly symmetric (shared q/k weight, no
            # bias).  If the model ever uses distinct q/k weights, the
            # transposed-softmax shortcut below becomes invalid.
            energy = lax.dot_general(qk_b, qk_b, (((1,), (1,)), ((), ())),
                                     preferred_element_type=jnp.float32)  # (N, N)

            # Build attention ALREADY TRANSPOSED: softmax over keys of attn
            # == normalizing exp(energy) over axis 0 here (by symmetry).
            e = jnp.exp(energy - jnp.max(energy, axis=0, keepdims=True))
            attn_t = e * pl.reciprocal(jnp.sum(e, axis=0, keepdims=True))
            # PyTorch: attn = attn / (1e-9 + attn.sum(dim=1, keepdims=True))
            # -> per-row normalization of attn^T.
            attn_t = attn_t * pl.reciprocal(
                1e-9 + jnp.sum(attn_t, axis=1, keepdims=True))      # (N, N)

            # x_r = x_v @ attention (NCW) == attn^T @ xv (tokens-major).
            xr_parts.append(jnp.dot(
                attn_t.astype(dot_dtype),
                xv[bi * N:(bi + 1) * N].astype(dot_dtype),
                preferred_element_type=jnp.float32))                # (N, C)
        x_r = jnp.concatenate(xr_parts, axis=0)                     # (BB*N, C)

        # trans_conv(x - x_r) -> BN -> ReLU, then residual add.
        t = jnp.dot((x - x_r).astype(dot_dtype), wt_ref[l],
                    preferred_element_type=jnp.float32) + sb(8 + l)
        x = x + jnp.maximum(t * sb(12 + l) + sb(16 + l), 0.0)       # (BB*N, C)
        outs.append(x)

    # Single lane-dense (N, 4C) = 128-lane store per element (replaces four
    # 32-lane partial stores per layer).
    o = jnp.concatenate(outs, axis=-1)                              # (BB*N, 4C)
    for bi in range(BB):
        o_ref[bi] = o[bi * N:(bi + 1) * N].astype(o_ref.dtype)


# ----------------------------------------------------------------- wrapper --

def _pick_block_b(B, max_bb=8):
    """Largest BB in [1, 8] dividing B while keeping >= 2 grid steps (v7x)."""
    best = 1
    for bb in range(1, min(B, max_bb) + 1):
        if B % bb != 0:
            continue
        if B // bb >= 2 or B == 1:
            best = bb
    return best


def stacked_attention(x_ncw, p, *, block_b=None, dot_dtype=jnp.bfloat16,
                      out_ncw=False):
    """x_ncw: (B, C, N) like PyTorch Conv1d input.

    Returns tokens-major (B, N, 4C) by default (out_ncw=True gives the
    PyTorch (B, 4C, N) layout via one extra transpose pass).
    """
    B, C, N = x_ncw.shape
    if block_b is None:
        block_b = _pick_block_b(B)
    assert B % block_b == 0

    # Pack weights for the MXU (bf16 by default) and the six small scale/bias
    # vectors into a single (20, C) array:
    #   rows 0-1  bn1/bn2 scale     rows 2-3   bn1/bn2 bias
    #   rows 4-7  v_conv bias       rows 8-11  trans_conv bias
    #   rows 12-15 after_norm scale rows 16-19 after_norm bias
    w12 = p["w12"].astype(dot_dtype)                                        # (2, C, C)
    wvqk = jnp.concatenate([p["wv"], p["wqk"]], axis=-1).astype(dot_dtype)  # (4, C, C+C/4)
    wt = p["wt"].astype(dot_dtype)                                          # (4, C, C)
    sb = jnp.concatenate(
        [p["bn12_s"][:, 0, :], p["bn12_b"][:, 0, :],
         p["bv"][:, 0, :], p["bt"][:, 0, :],
         p["sa_s"][:, 0, :], p["sa_b"][:, 0, :]], axis=0).astype(jnp.float32)  # (20, C)

    out_nwc = pl.pallas_call(
        _stacked_attention_kernel,
        out_shape=jax.ShapeDtypeStruct((B, N, 4 * C), x_ncw.dtype),
        grid=(B // block_b,),
        in_specs=[
            pl.BlockSpec((block_b, C, N), lambda b: (b, 0, 0)),       # x (NCW block)
            pl.BlockSpec((2, C, C), lambda b: (0, 0, 0)),             # conv1/2 weights
            pl.BlockSpec((4, C, C + C // 4), lambda b: (0, 0, 0)),    # [wv | wqk]
            pl.BlockSpec((4, C, C), lambda b: (0, 0, 0)),             # trans_conv weights
            pl.BlockSpec((20, C), lambda b: (0, 0)),                  # packed scale/bias
        ],
        out_specs=pl.BlockSpec((block_b, N, 4 * C), lambda b: (b, 0, 0)),
        compiler_params=pltpu.CompilerParams(
            dimension_semantics=("parallel",)),
    )(x_ncw, w12, wvqk, wt, sb)

    if out_ncw:
        # PyTorch layout (cat was on dim=1).  Prefer consuming tokens-major
        # output directly to skip this full HBM read/write pass.
        return jnp.transpose(out_nwc, (0, 2, 1))
    return out_nwc


# ----------------------------------------------------- params / reference --

def init_params(key, C):
    keys = jax.random.split(key, 64)
    it = iter(keys)

    def w(shape, s=0.1):
        return s * jax.random.normal(next(it), shape, jnp.float32)

    def bn():
        gamma = 1.0 + 0.1 * jax.random.normal(next(it), (C,), jnp.float32)
        beta = 0.1 * jax.random.normal(next(it), (C,), jnp.float32)
        rm = 0.1 * jax.random.normal(next(it), (C,), jnp.float32)
        rv = 1.0 + 0.5 * jax.random.uniform(next(it), (C,), jnp.float32)
        scale = gamma / jnp.sqrt(rv + 1e-5)
        bias = beta - rm * scale
        return scale[None, :], bias[None, :]                     # (1, C)

    bn1_s, bn1_b = bn()
    w1_t = w((C, C))
    bn2_s, bn2_b = bn()
    w2_t = w((C, C))

    wqk, wv, bv, wt, bt, sa_s, sa_b = [], [], [], [], [], [], []
    for _ in range(4):
        wqk.append(w((C, C // 4)))       # shared q/k weight (transposed)
        wv.append(w((C, C)))
        bv.append(w((1, C)))
        wt.append(w((C, C)))
        bt.append(w((1, C)))
        s, b = bn()
        sa_s.append(s)
        sa_b.append(b)

    return {
        "w12": jnp.stack([w1_t, w2_t]),              # (2, C, C)
        "bn12_s": jnp.stack([bn1_s, bn2_s]),         # (2, 1, C)
        "bn12_b": jnp.stack([bn1_b, bn2_b]),         # (2, 1, C)
        "wqk": jnp.stack(wqk),                       # (4, C, C/4)
        "wv": jnp.stack(wv),                         # (4, C, C)
        "bv": jnp.stack(bv),                         # (4, 1, C)
        "wt": jnp.stack(wt),                         # (4, C, C)
        "bt": jnp.stack(bt),                         # (4, 1, C)
        "sa_s": jnp.stack(sa_s),                     # (4, 1, C)
        "sa_b": jnp.stack(sa_b),                     # (4, 1, C)
    }


def stacked_attention_ref(x_ncw, p, dot_dtype=jnp.float32):
    """Pure-JAX reference matching the PyTorch module (inference-mode BN).

    dot_dtype lets the reference quantize matmul inputs exactly like the
    kernel's MXU path (accumulation stays f32)."""
    dd = dot_dtype

    def mm(a, b):
        return jnp.matmul(a.astype(dd), b.astype(dd),
                          preferred_element_type=jnp.float32)

    x = jnp.transpose(x_ncw, (0, 2, 1))                          # (B, N, C)
    for i in range(2):
        x = jnp.maximum(mm(x, p["w12"][i]) * p["bn12_s"][i] + p["bn12_b"][i], 0.0)
    outs = []
    for l in range(4):
        qk = mm(x, p["wqk"][l])                                  # (B, N, C/4)
        energy = jnp.einsum("bic,bjc->bij", qk.astype(dd), qk.astype(dd),
                            preferred_element_type=jnp.float32)  # (B, N, N)
        attn = jax.nn.softmax(energy, axis=-1)
        attn = attn / (1e-9 + attn.sum(axis=1, keepdims=True))
        xv = mm(x, p["wv"][l]) + p["bv"][l]
        x_r = jnp.einsum("bmj,bmc->bjc", attn.astype(dd), xv.astype(dd),
                         preferred_element_type=jnp.float32)
        t = mm(x - x_r, p["wt"][l]) + p["bt"][l]
        x = x + jnp.maximum(t * p["sa_s"][l] + p["sa_b"][l], 0.0)
        outs.append(x)
    return jnp.transpose(jnp.concatenate(outs, axis=-1), (0, 2, 1))


# --------------------------------------------------------------------- main --

if __name__ == "__main__":
    B, C, N = 4, 32, 64                        # B=4 -> block_b=2, 2 grid steps
    key = jax.random.PRNGKey(0)
    k_x, k_p = jax.random.split(key)
    x = jax.random.normal(k_x, (B, C, N), jnp.float32)   # PyTorch NCW input
    params = init_params(k_p, C)

    # 1) Exactness check: f32 matmul inputs vs the pure-f32 reference.
    out_f32 = stacked_attention(x, params, dot_dtype=jnp.float32)
    out_f32 = jax.block_until_ready(out_f32)
    assert out_f32.shape == (B, N, 4 * C), out_f32.shape
    ref_f32 = jnp.transpose(stacked_attention_ref(x, params), (0, 2, 1))
    err = float(jnp.max(jnp.abs(out_f32 - ref_f32)))
    if err > 3e-3:
        raise AssertionError(f"f32 kernel/reference mismatch, max abs err = {err}")

    # 2) Performance configuration: bf16 MXU inputs (default), checked against
    #    a reference that quantizes its matmul inputs the same way.
    out = stacked_attention(x, params)                    # bf16 dots, NWC out
    out = jax.block_until_ready(out)
    assert out.shape == (B, N, 4 * C), out.shape
    ref_bf16 = jnp.transpose(
        stacked_attention_ref(x, params, dot_dtype=jnp.bfloat16), (0, 2, 1))
    err_bf16 = float(jnp.max(jnp.abs(out - ref_bf16)))
    if err_bf16 > 2e-2:
        raise AssertionError(
            f"bf16 kernel/matched-reference mismatch, max abs err = {err_bf16}")

    print("KERNEL_OK")
</pallas_src>

<mosaic_0001>
module attributes {stable_mosaic.version = 11 : i64} {
  func.func @_stacked_attention_kernel(%arg0: i32, %arg1: memref<2x32x64xf32, #tpu.memory_space<vmem>>, %arg2: memref<2x32x32xf32, #tpu.memory_space<vmem>>, %arg3: memref<4x32x40xf32, #tpu.memory_space<vmem>>, %arg4: memref<4x32x32xf32, #tpu.memory_space<vmem>>, %arg5: memref<20x32xf32, #tpu.memory_space<vmem>>, %arg6: memref<2x64x128xf32, #tpu.memory_space<vmem>>) attributes {dimension_semantics = [#tpu.dimension_semantics<parallel>], iteration_bounds = array<i64: 2>, scalar_prefetch = 0 : i64, scratch_operands = 0 : i64, tpu.core_type = #tpu.core_type<tc>, window_params = [{transform_indices = @transform_0, window_bounds = array<i64: 2, 32, 64>}, {pipeline_mode = #tpu.pipeline_mode<synchronous>, transform_indices = @transform_1, window_bounds = array<i64: 2, 32, 32>}, {pipeline_mode = #tpu.pipeline_mode<synchronous>, transform_indices = @transform_2, window_bounds = array<i64: 4, 32, 40>}, {pipeline_mode = #tpu.pipeline_mode<synchronous>, transform_indices = @transform_3, window_bounds = array<i64: 4, 32, 32>}, {pipeline_mode = #tpu.pipeline_mode<synchronous>, transform_indices = @transform_4, window_bounds = array<i64: 20, 32>}, {transform_indices = @transform_5, window_bounds = array<i64: 2, 64, 128>}]} {
    %c0 = arith.constant 0 : index
    %c0_0 = arith.constant 0 : index
    %c0_1 = arith.constant 0 : index
    %0 = vector.load %arg1[%c0, %c0_0, %c0_1] : memref<2x32x64xf32, #tpu.memory_space<vmem>>, vector<2x32x64xf32>
    %1 = vector.extract_strided_slice %0 {offsets = [0, 0, 0], sizes = [1, 32, 64], strides = [1, 1, 1]} : vector<2x32x64xf32> to vector<1x32x64xf32>
    %2 = vector.shape_cast %1 : vector<1x32x64xf32> to vector<32x64xf32>
    %c0_2 = arith.constant 0 : index
    %c0_3 = arith.constant 0 : index
    %c0_4 = arith.constant 0 : index
    %3 = vector.load %arg2[%c0_2, %c0_3, %c0_4] : memref<2x32x32xf32, #tpu.memory_space<vmem>>, vector<1x32x32xf32>
    %4 = vector.shape_cast %3 : vector<1x32x32xf32> to vector<32x32xf32>
    %cst = arith.constant dense<0.000000e+00> : vector<64x32xf32>
    %5 = tpu.matmul %2, %4, %cst {dimension_numbers = #tpu.dot_dimension_numbers<[0], [0], [1], [1], [0, 1, 1, 1], [], []>} : vector<32x64xf32>, vector<32x32xf32>, vector<64x32xf32> -> vector<64x32xf32>
    %6 = vector.extract_strided_slice %0 {offsets = [1, 0, 0], sizes = [1, 32, 64], strides = [1, 1, 1]} : vector<2x32x64xf32> to vector<1x32x64xf32>
    %7 = vector.shape_cast %6 : vector<1x32x64xf32> to vector<32x64xf32>
    %c0_5 = arith.constant 0 : index
    %c0_6 = arith.constant 0 : index
    %c0_7 = arith.constant 0 : index
    %8 = vector.load %arg2[%c0_5, %c0_6, %c0_7] : memref<2x32x32xf32, #tpu.memory_space<vmem>>, vector<1x32x32xf32>
    %9 = vector.shape_cast %8 : vector<1x32x32xf32> to vector<32x32xf32>
    %cst_8 = arith.constant dense<0.000000e+00> : vector<64x32xf32>
    %10 = tpu.matmul %7, %9, %cst_8 {dimension_numbers = #tpu.dot_dimension_numbers<[0], [0], [1], [1], [0, 1, 1, 1], [], []>} : vector<32x64xf32>, vector<32x32xf32>, vector<64x32xf32> -> vector<64x32xf32>
    %11 = tpu.concatenate %5, %10 in 0 : vector<64x32xf32>, vector<64x32xf32> -> vector<128x32xf32>
    %c0_9 = arith.constant 0 : index
    %c0_10 = arith.constant 0 : index
    %12 = vector.load %arg5[%c0_9, %c0_10] : memref<20x32xf32, #tpu.memory_space<vmem>>, vector<1x32xf32>
    %13 = vector.broadcast %12 : vector<1x32xf32> to vector<128x32xf32>
    %14 = arith.mulf %11, %13 : vector<128x32xf32>
    %c2 = arith.constant 2 : index
    %c0_11 = arith.constant 0 : index
    %15 = vector.load %arg5[%c2, %c0_11] : memref<20x32xf32, #tpu.memory_space<vmem>>, vector<1x32xf32>
    %16 = vector.broadcast %15 : vector<1x32xf32> to vector<128x32xf32>
    %17 = arith.addf %14, %16 : vector<128x32xf32>
    %cst_12 = arith.constant 0.000000e+00 : f32
    %18 = vector.broadcast %cst_12 : f32 to vector<128x32xf32>
    %19 = arith.maximumf %17, %18 : vector<128x32xf32>
    %c1 = arith.constant 1 : index
    %c0_13 = arith.constant 0 : index
    %c0_14 = arith.constant 0 : index
    %20 = vector.load %arg2[%c1, %c0_13, %c0_14] : memref<2x32x32xf32, #tpu.memory_space<vmem>>, vector<1x32x32xf32>
    %21 = vector.shape_cast %20 : vector<1x32x32xf32> to vector<32x32xf32>
    %cst_15 = arith.constant dense<0.000000e+00> : vector<128x32xf32>
    %22 = tpu.matmul %19, %21, %cst_15 {dimension_numbers = #tpu.dot_dimension_numbers<[1], [0], [0], [1], [0, 0, 1, 1], [], []>} : vector<128x32xf32>, vector<32x32xf32>, vector<128x32xf32> -> vector<128x32xf32>
    %c1_16 = arith.constant 1 : index
    %c0_17 = arith.constant 0 : index
    %23 = vector.load %arg5[%c1_16, %c0_17] : memref<20x32xf32, #tpu.memory_space<vmem>>, vector<1x32xf32>
    %24 = vector.broadcast %23 : vector<1x32xf32> to vector<128x32xf32>
    %25 = arith.mulf %22, %24 : vector<128x32xf32>
    %c3 = arith.constant 3 : index
    %c0_18 = arith.constant 0 : index
    %26 = vector.load %arg5[%c3, %c0_18] : memref<20x32xf32, #tpu.memory_space<vmem>>, vector<1x32xf32>
    %27 = vector.broadcast %26 : vector<1x32xf32> to vector<128x32xf32>
    %28 = arith.addf %25, %27 : vector<128x32xf32>
    %cst_19 = arith.constant 0.000000e+00 : f32
    %29 = vector.broadcast %cst_19 : f32 to vector<128x32xf32>
    %30 = arith.maximumf %28, %29 : vector<128x32xf32>
    %c0_20 = arith.constant 0 : index
    %c0_21 = arith.constant 0 : index
    %c0_22 = arith.constant 0 : index
    %31 = vector.load %arg3[%c0_20, %c0_21, %c0_22] : memref<4x32x40xf32, #tpu.memory_space<vmem>>, vector<1x32x40xf32>
    %32 = vector.shape_cast %31 : vector<1x32x40xf32> to vector<32x40xf32>
    %cst_23 = arith.constant dense<0.000000e+00> : vector<128x40xf32>
    %33 = tpu.matmul %30, %32, %cst_23 {dimension_numbers = #tpu.dot_dimension_numbers<[1], [0], [0], [1], [0, 0, 1, 1], [], []>} : vector<128x32xf32>, vector<32x40xf32>, vector<128x40xf32> -> vector<128x40xf32>
    %34 = vector.extract_strided_slice %33 {offsets = [0, 0], sizes = [128, 32], strides = [1, 1]} : vector<128x40xf32> to vector<128x32xf32>
    %c4 = arith.constant 4 : index
    %c0_24 = arith.constant 0 : index
    %35 = vector.load %arg5[%c4, %c0_24] : memref<20x32xf32, #tpu.memory_space<vmem>>, vector<1x32xf32>
    %36 = vector.broadcast %35 : vector<1x32xf32> to vector<128x32xf32>
    %37 = arith.addf %34, %36 : vector<128x32xf32>
    %38 = vector.extract_strided_slice %33 {offsets = [0, 32], sizes = [128, 8], strides = [1, 1]} : vector<128x40xf32> to vector<128x8xf32>
    %39 = vector.extract_strided_slice %38 {offsets = [0, 0], sizes = [64, 8], strides = [1, 1]} : vector<128x8xf32> to vector<64x8xf32>
    %cst_25 = arith.constant dense<0.000000e+00> : vector<64x64xf32>
    %40 = tpu.matmul %39, %39, %cst_25 {dimension_numbers = #tpu.dot_dimension_numbers<[1], [1], [0], [0], [0, 0, 1, 0], [], []>} : vector<64x8xf32>, vector<64x8xf32>, vector<64x64xf32> -> vector<64x64xf32>
    %cst_26 = arith.constant dense<0xFF800000> : vector<64xf32>
    %41 = vector.multi_reduction <maximumf>, %40, %cst_26 [0] : vector<64x64xf32> to vector<64xf32>
    %42 = vector.shape_cast %41 : vector<64xf32> to vector<1x64xf32>
    %43 = vector.broadcast %42 : vector<1x64xf32> to vector<64x64xf32>
    %44 = arith.subf %40, %43 : vector<64x64xf32>
    %45 = math.exp %44 : vector<64x64xf32>
    %cst_27 = arith.constant dense<0.000000e+00> : vector<64xf32>
    %46 = vector.multi_reduction <add>, %45, %cst_27 [0] : vector<64x64xf32> to vector<64xf32>
    %47 = vector.shape_cast %46 : vector<64xf32> to vector<1x64xf32>
    %48 = tpu.reciprocal %47 : vector<1x64xf32> -> vector<1x64xf32>
    %49 = vector.broadcast %48 : vector<1x64xf32> to vector<64x64xf32>
    %50 = arith.mulf %45, %49 : vector<64x64xf32>
    %cst_28 = arith.constant dense<0.000000e+00> : vector<64xf32>
    %51 = vector.multi_reduction <add>, %50, %cst_28 [1] : vector<64x64xf32> to vector<64xf32>
    %52 = vector.shape_cast %51 : vector<64xf32> to vector<64x1xf32>
    %cst_29 = arith.constant 9.99999971E-10 : f32
    %53 = vector.broadcast %cst_29 : f32 to vector<64x1xf32>
    %54 = arith.addf %53, %52 : vector<64x1xf32>
    %55 = tpu.reciprocal %54 : vector<64x1xf32> -> vector<64x1xf32>
    %56 = vector.broadcast %55 : vector<64x1xf32> to vector<64x64xf32>
    %57 = arith.mulf %50, %56 : vector<64x64xf32>
    %58 = vector.extract_strided_slice %37 {offsets = [0, 0], sizes = [64, 32], strides = [1, 1]} : vector<128x32xf32> to vector<64x32xf32>
    %cst_30 = arith.constant dense<0.000000e+00> : vector<64x32xf32>
    %59 = tpu.matmul %57, %58, %cst_30 {dimension_numbers = #tpu.dot_dimension_numbers<[1], [0], [0], [1], [0, 0, 1, 1], [], []>} : vector<64x64xf32>, vector<64x32xf32>, vector<64x32xf32> -> vector<64x32xf32>
    %60 = vector.extract_strided_slice %38 {offsets = [64, 0], sizes = [64, 8], strides = [1, 1]} : vector<128x8xf32> to vector<64x8xf32>
    %cst_31 = arith.constant dense<0.000000e+00> : vector<64x64xf32>
    %61 = tpu.matmul %60, %60, %cst_31 {dimension_numbers = #tpu.dot_dimension_numbers<[1], [1], [0], [0], [0, 0, 1, 0], [], []>} : vector<64x8xf32>, vector<64x8xf32>, vector<64x64xf32> -> vector<64x64xf32>
    %cst_32 = arith.constant dense<0xFF800000> : vector<64xf32>
    %62 = vector.multi_reduction <maximumf>, %61, %cst_32 [0] : vector<64x64xf32> to vector<64xf32>
    %63 = vector.shape_cast %62 : vector<64xf32> to vector<1x64xf32>
    %64 = vector.broadcast %63 : vector<1x64xf32> to vector<64x64xf32>
    %65 = arith.subf %61, %64 : vector<64x64xf32>
    %66 = math.exp %65 : vector<64x64xf32>
    %cst_33 = arith.constant dense<0.000000e+00> : vector<64xf32>
    %67 = vector.multi_reduction <add>, %66, %cst_33 [0] : vector<64x64xf32> to vector<64xf32>
    %68 = vector.shape_cast %67 : vector<64xf32> to vector<1x64xf32>
    %69 = tpu.reciprocal %68 : vector<1x64xf32> -> vector<1x64xf32>
    %70 = vector.broadcast %69 : vector<1x64xf32> to vector<64x64xf32>
    %71 = arith.mulf %66, %70 : vector<64x64xf32>
    %cst_34 = arith.constant dense<0.000000e+00> : vector<64xf32>
    %72 = vector.multi_reduction <add>, %71, %cst_34 [1] : vector<64x64xf32> to vector<64xf32>
    %73 = vector.shape_cast %72 : vector<64xf32> to vector<64x1xf32>
    %cst_35 = arith.constant 9.99999971E-10 : f32
    %74 = vector.broadcast %cst_35 : f32 to vector<64x1xf32>
    %75 = arith.addf %74, %73 : vector<64x1xf32>
    %76 = tpu.reciprocal %75 : vector<64x1xf32> -> vector<64x1xf32>
    %77 = vector.broadcast %76 : vector<64x1xf32> to vector<64x64xf32>
    %78 = arith.mulf %71, %77 : vector<64x64xf32>
    %79 = vector.extract_strided_slice %37 {offsets = [64, 0], sizes = [64, 32], strides = [1, 1]} : vector<128x32xf32> to vector<64x32xf32>
    %cst_36 = arith.constant dense<0.000000e+00> : vector<64x32xf32>
    %80 = tpu.matmul %78, %79, %cst_36 {dimension_numbers = #tpu.dot_dimension_numbers<[1], [0], [0], [1], [0, 0, 1, 1], [], []>} : vector<64x64xf32>, vector<64x32xf32>, vector<64x32xf32> -> vector<64x32xf32>
    %81 = tpu.concatenate %59, %80 in 0 : vector<64x32xf32>, vector<64x32xf32> -> vector<128x32xf32>
    %82 = arith.subf %30, %81 : vector<128x32xf32>
    %c0_37 = arith.constant 0 : index
    %c0_38 = arith.constant 0 : index
    %c0_39 = arith.constant 0 : index
    %83 = vector.load %arg4[%c0_37, %c0_38, %c0_39] : memref<4x32x32xf32, #tpu.memory_space<vmem>>, vector<1x32x32xf32>
    %84 = vector.shape_cast %83 : vector<1x32x32xf32> to vector<32x32xf32>
    %cst_40 = arith.constant dense<0.000000e+00> : vector<128x32xf32>
    %85 = tpu.matmul %82, %84, %cst_40 {dimension_numbers = #tpu.dot_dimension_numbers<[1], [0], [0], [1], [0, 0, 1, 1], [], []>} : vector<128x32xf32>, vector<32x32xf32>, vector<128x32xf32> -> vector<128x32xf32>
    %c8 = arith.constant 8 : index
    %c0_41 = arith.constant 0 : index
    %86 = vector.load %arg5[%c8, %c0_41] : memref<20x32xf32, #tpu.memory_space<vmem>>, vector<1x32xf32>
    %87 = vector.broadcast %86 : vector<1x32xf32> to vector<128x32xf32>
    %88 = arith.addf %85, %87 : vector<128x32xf32>
    %c12 = arith.constant 12 : index
    %c0_42 = arith.constant 0 : index
    %89 = vector.load %arg5[%c12, %c0_42] : memref<20x32xf32, #tpu.memory_space<vmem>>, vector<1x32xf32>
    %90 = vector.broadcast %89 : vector<1x32xf32> to vector<128x32xf32>
    %91 = arith.mulf %88, %90 : vector<128x32xf32>
    %c16 = arith.constant 16 : index
    %c0_43 = arith.constant 0 : index
    %92 = vector.load %arg5[%c16, %c0_43] : memref<20x32xf32, #tpu.memory_space<vmem>>, vector<1x32xf32>
    %93 = vector.broadcast %92 : vector<1x32xf32> to vector<128x32xf32>
    %94 = arith.addf %91, %93 : vector<128x32xf32>
    %cst_44 = arith.constant 0.000000e+00 : f32
    %95 = vector.broadcast %cst_44 : f32 to vector<128x32xf32>
    %96 = arith.maximumf %94, %95 : vector<128x32xf32>
    %97 = arith.addf %30, %96 : vector<128x32xf32>
    %c1_45 = arith.constant 1 : index
    %c0_46 = arith.constant 0 : index
    %c0_47 = arith.constant 0 : index
    %98 = vector.load %arg3[%c1_45, %c0_46, %c0_47] : memref<4x32x40xf32, #tpu.memory_space<vmem>>, vector<1x32x40xf32>
    %99 = vector.shape_cast %98 : vector<1x32x40xf32> to vector<32x40xf32>
    %cst_48 = arith.constant dense<0.000000e+00> : vector<128x40xf32>
    %100 = tpu.matmul %97, %99, %cst_48 {dimension_numbers = #tpu.dot_dimension_numbers<[1], [0], [0], [1], [0, 0, 1, 1], [], []>} : vector<128x32xf32>, vector<32x40xf32>, vector<128x40xf32> -> vector<128x40xf32>
    %101 = vector.extract_strided_slice %100 {offsets = [0, 0], sizes = [128, 32], strides = [1, 1]} : vector<128x40xf32> to vector<128x32xf32>
    %c5 = arith.constant 5 : index
    %c0_49 = arith.constant 0 : index
    %102 = vector.load %arg5[%c5, %c0_49] : memref<20x32xf32, #tpu.memory_space<vmem>>, vector<1x32xf32>
    %103 = vector.broadcast %102 : vector<1x32xf32> to vector<128x32xf32>
    %104 = arith.addf %101, %103 : vector<128x32xf32>
    %105 = vector.extract_strided_slice %100 {offsets = [0, 32], sizes = [128, 8], strides = [1, 1]} : vector<128x40xf32> to vector<128x8xf32>
    %106 = vector.extract_strided_slice %105 {offsets = [0, 0], sizes = [64, 8], strides = [1, 1]} : vector<128x8xf32> to vector<64x8xf32>
    %cst_50 = arith.constant dense<0.000000e+00> : vector<64x64xf32>
    %107 = tpu.matmul %106, %106, %cst_50 {dimension_numbers = #tpu.dot_dimension_numbers<[1], [1], [0], [0], [0, 0, 1, 0], [], []>} : vector<64x8xf32>, vector<64x8xf32>, vector<64x64xf32> -> vector<64x64xf32>
    %cst_51 = arith.constant dense<0xFF800000> : vector<64xf32>
    %108 = vector.multi_reduction <maximumf>, %107, %cst_51 [0] : vector<64x64xf32> to vector<64xf32>
    %109 = vector.shape_cast %108 : vector<64xf32> to vector<1x64xf32>
    %110 = vector.broadcast %109 : vector<1x64xf32> to vector<64x64xf32>
    %111 = arith.subf %107, %110 : vector<64x64xf32>
    %112 = math.exp %111 : vector<64x64xf32>
    %cst_52 = arith.constant dense<0.000000e+00> : vector<64xf32>
    %113 = vector.multi_reduction <add>, %112, %cst_52 [0] : vector<64x64xf32> to vector<64xf32>
    %114 = vector.shape_cast %113 : vector<64xf32> to vector<1x64xf32>
    %115 = tpu.reciprocal %114 : vector<1x64xf32> -> vector<1x64xf32>
    %116 = vector.broadcast %115 : vector<1x64xf32> to vector<64x64xf32>
    %117 = arith.mulf %112, %116 : vector<64x64xf32>
    %cst_53 = arith.constant dense<0.000000e+00> : vector<64xf32>
    %118 = vector.multi_reduction <add>, %117, %cst_53 [1] : vector<64x64xf32> to vector<64xf32>
    %119 = vector.shape_cast %118 : vector<64xf32> to vector<64x1xf32>
    %cst_54 = arith.constant 9.99999971E-10 : f32
    %120 = vector.broadcast %cst_54 : f32 to vector<64x1xf32>
    %121 = arith.addf %120, %119 : vector<64x1xf32>
    %122 = tpu.reciprocal %121 : vector<64x1xf32> -> vector<64x1xf32>
    %123 = vector.broadcast %122 : vector<64x1xf32> to vector<64x64xf32>
    %124 = arith.mulf %117, %123 : vector<64x64xf32>
    %125 = vector.extract_strided_slice %104 {offsets = [0, 0], sizes = [64, 32], strides = [1, 1]} : vector<128x32xf32> to vector<64x32xf32>
    %cst_55 = arith.constant dense<0.000000e+00> : vector<64x32xf32>
    %126 = tpu.matmul %124, %125, %cst_55 {dimension_numbers = #tpu.dot_dimension_numbers<[1], [0], [0], [1], [0, 0, 1, 1], [], []>} : vector<64x64xf32>, vector<64x32xf32>, vector<64x32xf32> -> vector<64x32xf32>
    %127 = vector.extract_strided_slice %105 {offsets = [64, 0], sizes = [64, 8], strides = [1, 1]} : vector<128x8xf32> to vector<64x8xf32>
    %cst_56 = arith.constant dense<0.000000e+00> : vector<64x64xf32>
    %128 = tpu.matmul %127, %127, %cst_56 {dimension_numbers = #tpu.dot_dimension_numbers<[1], [1], [0], [0], [0, 0, 1, 0], [], []>} : vector<64x8xf32>, vector<64x8xf32>, vector<64x64xf32> -> vector<64x64xf32>
    %cst_57 = arith.constant dense<0xFF800000> : vector<64xf32>
    %129 = vector.multi_reduction <maximumf>, %128, %cst_57 [0] : vector<64x64xf32> to vector<64xf32>
    %130 = vector.shape_cast %129 : vector<64xf32> to vector<1x64xf32>
    %131 = vector.broadcast %130 : vector<1x64xf32> to vector<64x64xf32>
    %132 = arith.subf %128, %131 : vector<64x64xf32>
    %133 = math.exp %132 : vector<64x64xf32>
    %cst_58 = arith.constant dense<0.000000e+00> : vector<64xf32>
    %134 = vector.multi_reduction <add>, %133, %cst_58 [0] : vector<64x64xf32> to vector<64xf32>
    %135 = vector.shape_cast %134 : vector<64xf32> to vector<1x64xf32>
    %136 = tpu.reciprocal %135 : vector<1x64xf32> -> vector<1x64xf32>
    %137 = vector.broadcast %136 : vector<1x64xf32> to vector<64x64xf32>
    %138 = arith.mulf %133, %137 : vector<64x64xf32>
    %cst_59 = arith.constant dense<0.000000e+00> : vector<64xf32>
    %139 = vector.multi_reduction <add>, %138, %cst_59 [1] : vector<64x64xf32> to vector<64xf32>
    %140 = vector.shape_cast %139 : vector<64xf32> to vector<64x1xf32>
    %cst_60 = arith.constant 9.99999971E-10 : f32
    %141 = vector.broadcast %cst_60 : f32 to vector<64x1xf32>
    %142 = arith.addf %141, %140 : vector<64x1xf32>
    %143 = tpu.reciprocal %142 : vector<64x1xf32> -> vector<64x1xf32>
    %144 = vector.broadcast %143 : vector<64x1xf32> to vector<64x64xf32>
    %145 = arith.mulf %138, %144 : vector<64x64xf32>
    %146 = vector.extract_strided_slice %104 {offsets = [64, 0], sizes = [64, 32], strides = [1, 1]} : vector<128x32xf32> to vector<64x32xf32>
    %cst_61 = arith.constant dense<0.000000e+00> : vector<64x32xf32>
    %147 = tpu.matmul %145, %146, %cst_61 {dimension_numbers = #tpu.dot_dimension_numbers<[1], [0], [0], [1], [0, 0, 1, 1], [], []>} : vector<64x64xf32>, vector<64x32xf32>, vector<64x32xf32> -> vector<64x32xf32>
    %148 = tpu.concatenate %126, %147 in 0 : vector<64x32xf32>, vector<64x32xf32> -> vector<128x32xf32>
    %149 = arith.subf %97, %148 : vector<128x32xf32>
    %c1_62 = arith.constant 1 : index
    %c0_63 = arith.constant 0 : index
    %c0_64 = arith.constant 0 : index
    %150 = vector.load %arg4[%c1_62, %c0_63, %c0_64] : memref<4x32x32xf32, #tpu.memory_space<vmem>>, vector<1x32x32xf32>
    %151 = vector.shape_cast %150 : vector<1x32x32xf32> to vector<32x32xf32>
    %cst_65 = arith.constant dense<0.000000e+00> : vector<128x32xf32>
    %152 = tpu.matmul %149, %151, %cst_65 {dimension_numbers = #tpu.dot_dimension_numbers<[1], [0], [0], [1], [0, 0, 1, 1], [], []>} : vector<128x32xf32>, vector<32x32xf32>, vector<128x32xf32> -> vector<128x32xf32>
    %c9 = arith.constant 9 : index
    %c0_66 = arith.constant 0 : index
    %153 = vector.load %arg5[%c9, %c0_66] : memref<20x32xf32, #tpu.memory_space<vmem>>, vector<1x32xf32>
    %154 = vector.broadcast %153 : vector<1x32xf32> to vector<128x32xf32>
    %155 = arith.addf %152, %154 : vector<128x32xf32>
    %c13 = arith.constant 13 : index
    %c0_67 = arith.constant 0 : index
    %156 = vector.load %arg5[%c13, %c0_67] : memref<20x32xf32, #tpu.memory_space<vmem>>, vector<1x32xf32>
    %157 = vector.broadcast %156 : vector<1x32xf32> to vector<128x32xf32>
    %158 = arith.mulf %155, %157 : vector<128x32xf32>
    %c17 = arith.constant 17 : index
    %c0_68 = arith.constant 0 : index
    %159 = vector.load %arg5[%c17, %c0_68] : memref<20x32xf32, #tpu.memory_space<vmem>>, vector<1x32xf32>
    %160 = vector.broadcast %159 : vector<1x32xf32> to vector<128x32xf32>
    %161 = arith.addf %158, %160 : vector<128x32xf32>
    %cst_69 = arith.constant 0.000000e+00 : f32
    %162 = vector.broadcast %cst_69 : f32 to vector<128x32xf32>
    %163 = arith.maximumf %161, %162 : vector<128x32xf32>
    %164 = arith.addf %97, %163 : vector<128x32xf32>
    %c2_70 = arith.constant 2 : index
    %c0_71 = arith.constant 0 : index
    %c0_72 = arith.constant 0 : index
    %165 = vector.load %arg3[%c2_70, %c0_71, %c0_72] : memref<4x32x40xf32, #tpu.memory_space<vmem>>, vector<1x32x40xf32>
    %166 = vector.shape_cast %165 : vector<1x32x40xf32> to vector<32x40xf32>
    %cst_73 = arith.constant dense<0.000000e+00> : vector<128x40xf32>
    %167 = tpu.matmul %164, %166, %cst_73 {dimension_numbers = #tpu.dot_dimension_numbers<[1], [0], [0], [1], [0, 0, 1, 1], [], []>} : vector<128x32xf32>, vector<32x40xf32>, vector<128x40xf32> -> vector<128x40xf32>
    %168 = vector.extract_strided_slice %167 {offsets = [0, 0], sizes = [128, 32], strides = [1, 1]} : vector<128x40xf32> to vector<128x32xf32>
    %c6 = arith.constant 6 : index
    %c0_74 = arith.constant 0 : index
    %169 = vector.load %arg5[%c6, %c0_74] : memref<20x32xf32, #tpu.memory_space<vmem>>, vector<1x32xf32>
    %170 = vector.broadcast %169 : vector<1x32xf32> to vector<128x32xf32>
    %171 = arith.addf %168, %170 : vector<128x32xf32>
    %172 = vector.extract_strided_slice %167 {offsets = [0, 32], sizes = [128, 8], strides = [1, 1]} : vector<128x40xf32> to vector<128x8xf32>
    %173 = vector.extract_strided_slice %172 {offsets = [0, 0], sizes = [64, 8], strides = [1, 1]} : vector<128x8xf32> to vector<64x8xf32>
    %cst_75 = arith.constant dense<0.000000e+00> : vector<64x64xf32>
    %174 = tpu.matmul %173, %173, %cst_75 {dimension_numbers = #tpu.dot_dimension_numbers<[1], [1], [0], [0], [0, 0, 1, 0], [], []>} : vector<64x8xf32>, vector<64x8xf32>, vector<64x64xf32> -> vector<64x64xf32>
    %cst_76 = arith.constant dense<0xFF800000> : vector<64xf32>
    %175 = vector.multi_reduction <maximumf>, %174, %cst_76 [0] : vector<64x64xf32> to vector<64xf32>
    %176 = vector.shape_cast %175 : vector<64xf32> to vector<1x64xf32>
    %177 = vector.broadcast %176 : vector<1x64xf32> to vector<64x64xf32>
    %178 = arith.subf %174, %177 : vector<64x64xf32>
    %179 = math.exp %178 : vector<64x64xf32>
    %cst_77 = arith.constant dense<0.000000e+00> : vector<64xf32>
    %180 = vector.multi_reduction <add>, %179, %cst_77 [0] : vector<64x64xf32> to vector<64xf32>
    %181 = vector.shape_cast %180 : vector<64xf32> to vector<1x64xf32>
    %182 = tpu.reciprocal %181 : vector<1x64xf32> -> vector<1x64xf32>
    %183 = vector.broadcast %182 : vector<1x64xf32> to vector<64x64xf32>
    %184 = arith.mulf %179, %183 : vector<64x64xf32>
    %cst_78 = arith.constant dense<0.000000e+00> : vector<64xf32>
    %185 = vector.multi_reduction <add>, %184, %cst_78 [1] : vector<64x64xf32> to vector<64xf32>
    %186 = vector.shape_cast %185 : vector<64xf32> to vector<64x1xf32>
    %cst_79 = arith.constant 9.99999971E-10 : f32
    %187 = vector.broadcast %cst_79 : f32 to vector<64x1xf32>
    %188 = arith.addf %187, %186 : vector<64x1xf32>
    %189 = tpu.reciprocal %188 : vector<64x1xf32> -> vector<64x1xf32>
    %190 = vector.broadcast %189 : vector<64x1xf32> to vector<64x64xf32>
    %191 = arith.mulf %184, %190 : vector<64x64xf32>
    %192 = vector.extract_strided_slice %171 {offsets = [0, 0], sizes = [64, 32], strides = [1, 1]} : vector<128x32xf32> to vector<64x32xf32>
    %cst_80 = arith.constant dense<0.000000e+00> : vector<64x32xf32>
    %193 = tpu.matmul %191, %192, %cst_80 {dimension_numbers = #tpu.dot_dimension_numbers<[1], [0], [0], [1], [0, 0, 1, 1], [], []>} : vector<64x64xf32>, vector<64x32xf32>, vector<64x32xf32> -> vector<64x32xf32>
    %194 = vector.extract_strided_slice %172 {offsets = [64, 0], sizes = [64, 8], strides = [1, 1]} : vector<128x8xf32> to vector<64x8xf32>
    %cst_81 = arith.constant dense<0.000000e+00> : vector<64x64xf32>
    %195 = tpu.matmul %194, %194, %cst_81 {dimension_numbers = #tpu.dot_dimension_numbers<[1], [1], [0], [0], [0, 0, 1, 0], [], []>} : vector<64x8xf32>, vector<64x8xf32>, vector<64x64xf32> -> vector<64x64xf32>
    %cst_82 = arith.constant dense<0xFF800000> : vector<64xf32>
    %196 = vector.multi_reduction <maximumf>, %195, %cst_82 [0] : vector<64x64xf32> to vector<64xf32>
    %197 = vector.shape_cast %196 : vector<64xf32> to vector<1x64xf32>
    %198 = vector.broadcast %197 : vector<1x64xf32> to vector<64x64xf32>
    %199 = arith.subf %195, %198 : vector<64x64xf32>
    %200 = math.exp %199 : vector<64x64xf32>
    %cst_83 = arith.constant dense<0.000000e+00> : vector<64xf32>
    %201 = vector.multi_reduction <add>, %200, %cst_83 [0] : vector<64x64xf32> to vector<64xf32>
    %202 = vector.shape_cast %201 : vector<64xf32> to vector<1x64xf32>
    %203 = tpu.reciprocal %202 : vector<1x64xf32> -> vector<1x64xf32>
    %204 = vector.broadcast %203 : vector<1x64xf32> to vector<64x64xf32>
    %205 = arith.mulf %200, %204 : vector<64x64xf32>
    %cst_84 = arith.constant dense<0.000000e+00> : vector<64xf32>
    %206 = vector.multi_reduction <add>, %205, %cst_84 [1] : vector<64x64xf32> to vector<64xf32>
    %207 = vector.shape_cast %206 : vector<64xf32> to vector<64x1xf32>
    %cst_85 = arith.constant 9.99999971E-10 : f32
    %208 = vector.broadcast %cst_85 : f32 to vector<64x1xf32>
    %209 = arith.addf %208, %207 : vector<64x1xf32>
    %210 = tpu.reciprocal %209 : vector<64x1xf32> -> vector<64x1xf32>
    %211 = vector.broadcast %210 : vector<64x1xf32> to vector<64x64xf32>
    %212 = arith.mulf %205, %211 : vector<64x64xf32>
    %213 = vector.extract_strided_slice %171 {offsets = [64, 0], sizes = [64, 32], strides = [1, 1]} : vector<128x32xf32> to vector<64x32xf32>
    %cst_86 = arith.constant dense<0.000000e+00> : vector<64x32xf32>
    %214 = tpu.matmul %212, %213, %cst_86 {dimension_numbers = #tpu.dot_dimension_numbers<[1], [0], [0], [1], [0, 0, 1, 1], [], []>} : vector<64x64xf32>, vector<64x32xf32>, vector<64x32xf32> -> vector<64x32xf32>
    %215 = tpu.concatenate %193, %214 in 0 : vector<64x32xf32>, vector<64x32xf32> -> vector<128x32xf32>
    %216 = arith.subf %164, %215 : vector<128x32xf32>
    %c2_87 = arith.constant 2 : index
    %c0_88 = arith.constant 0 : index
    %c0_89 = arith.constant 0 : index
    %217 = vector.load %arg4[%c2_87, %c0_88, %c0_89] : memref<4x32x32xf32, #tpu.memory_space<vmem>>, vector<1x32x32xf32>
    %218 = vector.shape_cast %217 : vector<1x32x32xf32> to vector<32x32xf32>
    %cst_90 = arith.constant dense<0.000000e+00> : vector<128x32xf32>
    %219 = tpu.matmul %216, %218, %cst_90 {dimension_numbers = #tpu.dot_dimension_numbers<[1], [0], [0], [1], [0, 0, 1, 1], [], []>} : vector<128x32xf32>, vector<32x32xf32>, vector<128x32xf32> -> vector<128x32xf32>
    %c10 = arith.constant 10 : index
    %c0_91 = arith.constant 0 : index
    %220 = vector.load %arg5[%c10, %c0_91] : memref<20x32xf32, #tpu.memory_space<vmem>>, vector<1x32xf32>
    %221 = vector.broadcast %220 : vector<1x32xf32> to vector<128x32xf32>
    %222 = arith.addf %219, %221 : vector<128x32xf32>
    %c14 = arith.constant 14 : index
    %c0_92 = arith.constant 0 : index
    %223 = vector.load %arg5[%c14, %c0_92] : memref<20x32xf32, #tpu.memory_space<vmem>>, vector<1x32xf32>
    %224 = vector.broadcast %223 : vector<1x32xf32> to vector<128x32xf32>
    %225 = arith.mulf %222, %224 : vector<128x32xf32>
    %c18 = arith.constant 18 : index
    %c0_93 = arith.constant 0 : index
    %226 = vector.load %arg5[%c18, %c0_93] : memref<20x32xf32, #tpu.memory_space<vmem>>, vector<1x32xf32>
    %227 = vector.broadcast %226 : vector<1x32xf32> to vector<128x32xf32>
    %228 = arith.addf %225, %227 : vector<128x32xf32>
    %cst_94 = arith.constant 0.000000e+00 : f32
    %229 = vector.broadcast %cst_94 : f32 to vector<128x32xf32>
    %230 = arith.maximumf %228, %229 : vector<128x32xf32>
    %231 = arith.addf %164, %230 : vector<128x32xf32>
    %c3_95 = arith.constant 3 : index
    %c0_96 = arith.constant 0 : index
    %c0_97 = arith.constant 0 : index
    %232 = vector.load %arg3[%c3_95, %c0_96, %c0_97] : memref<4x32x40xf32, #tpu.memory_space<vmem>>, vector<1x32x40xf32>
    %233 = vector.shape_cast %232 : vector<1x32x40xf32> to vector<32x40xf32>
    %cst_98 = arith.constant dense<0.000000e+00> : vector<128x40xf32>
    %234 = tpu.matmul %231, %233, %cst_98 {dimension_numbers = #tpu.dot_dimension_numbers<[1], [0], [0], [1], [0, 0, 1, 1], [], []>} : vector<128x32xf32>, vector<32x40xf32>, vector<128x40xf32> -> vector<128x40xf32>
    %235 = vector.extract_strided_slice %234 {offsets = [0, 0], sizes = [128, 32], strides = [1, 1]} : vector<128x40xf32> to vector<128x32xf32>
    %c7 = arith.constant 7 : index
    %c0_99 = arith.constant 0 : index
    %236 = vector.load %arg5[%c7, %c0_99] : memref<20x32xf32, #tpu.memory_space<vmem>>, vector<1x32xf32>
    %237 = vector.broadcast %236 : vector<1x32xf32> to vector<128x32xf32>
    %238 = arith.addf %235, %237 : vector<128x32xf32>
    %239 = vector.extract_strided_slice %234 {offsets = [0, 32], sizes = [128, 8], strides = [1, 1]} : vector<128x40xf32> to vector<128x8xf32>
    %240 = vector.extract_strided_slice %239 {offsets = [0, 0], sizes = [64, 8], strides = [1, 1]} : vector<128x8xf32> to vector<64x8xf32>
    %cst_100 = arith.constant dense<0.000000e+00> : vector<64x64xf32>
    %241 = tpu.matmul %240, %240, %cst_100 {dimension_numbers = #tpu.dot_dimension_numbers<[1], [1], [0], [0], [0, 0, 1, 0], [], []>} : vector<64x8xf32>, vector<64x8xf32>, vector<64x64xf32> -> vector<64x64xf32>
    %cst_101 = arith.constant dense<0xFF800000> : vector<64xf32>
    %242 = vector.multi_reduction <maximumf>, %241, %cst_101 [0] : vector<64x64xf32> to vector<64xf32>
    %243 = vector.shape_cast %242 : vector<64xf32> to vector<1x64xf32>
    %244 = vector.broadcast %243 : vector<1x64xf32> to vector<64x64xf32>
    %245 = arith.subf %241, %244 : vector<64x64xf32>
    %246 = math.exp %245 : vector<64x64xf32>
    %cst_102 = arith.constant dense<0.000000e+00> : vector<64xf32>
    %247 = vector.multi_reduction <add>, %246, %cst_102 [0] : vector<64x64xf32> to vector<64xf32>
    %248 = vector.shape_cast %247 : vector<64xf32> to vector<1x64xf32>
    %249 = tpu.reciprocal %248 : vector<1x64xf32> -> vector<1x64xf32>
    %250 = vector.broadcast %249 : vector<1x64xf32> to vector<64x64xf32>
    %251 = arith.mulf %246, %250 : vector<64x64xf32>
    %cst_103 = arith.constant dense<0.000000e+00> : vector<64xf32>
    %252 = vector.multi_reduction <add>, %251, %cst_103 [1] : vector<64x64xf32> to vector<64xf32>
    %253 = vector.shape_cast %252 : vector<64xf32> to vector<64x1xf32>
    %cst_104 = arith.constant 9.99999971E-10 : f32
    %254 = vector.broadcast %cst_104 : f32 to vector<64x1xf32>
    %255 = arith.addf %254, %253 : vector<64x1xf32>
    %256 = tpu.reciprocal %255 : vector<64x1xf32> -> vector<64x1xf32>
    %257 = vector.broadcast %256 : vector<64x1xf32> to vector<64x64xf32>
    %258 = arith.mulf %251, %257 : vector<64x64xf32>
    %259 = vector.extract_strided_slice %238 {offsets = [0, 0], sizes = [64, 32], strides = [1, 1]} : vector<128x32xf32> to vector<64x32xf32>
    %cst_105 = arith.constant dense<0.000000e+00> : vector<64x32xf32>
    %260 = tpu.matmul %258, %259, %cst_105 {dimension_numbers = #tpu.dot_dimension_numbers<[1], [0], [0], [1], [0, 0, 1, 1], [], []>} : vector<64x64xf32>, vector<64x32xf32>, vector<64x32xf32> -> vector<64x32xf32>
    %261 = vector.extract_strided_slice %239 {offsets = [64, 0], sizes = [64, 8], strides = [1, 1]} : vector<128x8xf32> to vector<64x8xf32>
    %cst_106 = arith.constant dense<0.000000e+00> : vector<64x64xf32>
    %262 = tpu.matmul %261, %261, %cst_106 {dimension_numbers = #tpu.dot_dimension_numbers<[1], [1], [0], [0], [0, 0, 1, 0], [], []>} : vector<64x8xf32>, vector<64x8xf32>, vector<64x64xf32> -> vector<64x64xf32>
    %cst_107 = arith.constant dense<0xFF800000> : vector<64xf32>
    %263 = vector.multi_reduction <maximumf>, %262, %cst_107 [0] : vector<64x64xf32> to vector<64xf32>
    %264 = vector.shape_cast %263 : vector<64xf32> to vector<1x64xf32>
    %265 = vector.broadcast %264 : vector<1x64xf32> to vector<64x64xf32>
    %266 = arith.subf %262, %265 : vector<64x64xf32>
    %267 = math.exp %266 : vector<64x64xf32>
    %cst_108 = arith.constant dense<0.000000e+00> : vector<64xf32>
    %268 = vector.multi_reduction <add>, %267, %cst_108 [0] : vector<64x64xf32> to vector<64xf32>
    %269 = vector.shape_cast %268 : vector<64xf32> to vector<1x64xf32>
    %270 = tpu.reciprocal %269 : vector<1x64xf32> -> vector<1x64xf32>
    %271 = vector.broadcast %270 : vector<1x64xf32> to vector<64x64xf32>
    %272 = arith.mulf %267, %271 : vector<64x64xf32>
    %cst_109 = arith.constant dense<0.000000e+00> : vector<64xf32>
    %273 = vector.multi_reduction <add>, %272, %cst_109 [1] : vector<64x64xf32> to vector<64xf32>
    %274 = vector.shape_cast %273 : vector<64xf32> to vector<64x1xf32>
    %cst_110 = arith.constant 9.99999971E-10 : f32
    %275 = vector.broadcast %cst_110 : f32 to vector<64x1xf32>
    %276 = arith.addf %275, %274 : vector<64x1xf32>
    %277 = tpu.reciprocal %276 : vector<64x1xf32> -> vector<64x1xf32>
    %278 = vector.broadcast %277 : vector<64x1xf32> to vector<64x64xf32>
    %279 = arith.mulf %272, %278 : vector<64x64xf32>
    %280 = vector.extract_strided_slice %238 {offsets = [64, 0], sizes = [64, 32], strides = [1, 1]} : vector<128x32xf32> to vector<64x32xf32>
    %cst_111 = arith.constant dense<0.000000e+00> : vector<64x32xf32>
    %281 = tpu.matmul %279, %280, %cst_111 {dimension_numbers = #tpu.dot_dimension_numbers<[1], [0], [0], [1], [0, 0, 1, 1], [], []>} : vector<64x64xf32>, vector<64x32xf32>, vector<64x32xf32> -> vector<64x32xf32>
    %282 = tpu.concatenate %260, %281 in 0 : vector<64x32xf32>, vector<64x32xf32> -> vector<128x32xf32>
    %283 = arith.subf %231, %282 : vector<128x32xf32>
    %c3_112 = arith.constant 3 : index
    %c0_113 = arith.constant 0 : index
    %c0_114 = arith.constant 0 : index
    %284 = vector.load %arg4[%c3_112, %c0_113, %c0_114] : memref<4x32x32xf32, #tpu.memory_space<vmem>>, vector<1x32x32xf32>
    %285 = vector.shape_cast %284 : vector<1x32x32xf32> to vector<32x32xf32>
    %cst_115 = arith.constant dense<0.000000e+00> : vector<128x32xf32>
    %286 = tpu.matmul %283, %285, %cst_115 {dimension_numbers = #tpu.dot_dimension_numbers<[1], [0], [0], [1], [0, 0, 1, 1], [], []>} : vector<128x32xf32>, vector<32x32xf32>, vector<128x32xf32> -> vector<128x32xf32>
    %c11 = arith.constant 11 : index
    %c0_116 = arith.constant 0 : index
    %287 = vector.load %arg5[%c11, %c0_116] : memref<20x32xf32, #tpu.memory_space<vmem>>, vector<1x32xf32>
    %288 = vector.broadcast %287 : vector<1x32xf32> to vector<128x32xf32>
    %289 = arith.addf %286, %288 : vector<128x32xf32>
    %c15 = arith.constant 15 : index
    %c0_117 = arith.constant 0 : index
    %290 = vector.load %arg5[%c15, %c0_117] : memref<20x32xf32, #tpu.memory_space<vmem>>, vector<1x32xf32>
    %291 = vector.broadcast %290 : vector<1x32xf32> to vector<128x32xf32>
    %292 = arith.mulf %289, %291 : vector<128x32xf32>
    %c19 = arith.constant 19 : index
    %c0_118 = arith.constant 0 : index
    %293 = vector.load %arg5[%c19, %c0_118] : memref<20x32xf32, #tpu.memory_space<vmem>>, vector<1x32xf32>
    %294 = vector.broadcast %293 : vector<1x32xf32> to vector<128x32xf32>
    %295 = arith.addf %292, %294 : vector<128x32xf32>
    %cst_119 = arith.constant 0.000000e+00 : f32
    %296 = vector.broadcast %cst_119 : f32 to vector<128x32xf32>
    %297 = arith.maximumf %295, %296 : vector<128x32xf32>
    %298 = arith.addf %231, %297 : vector<128x32xf32>
    %299 = tpu.concatenate %97, %164, %231, %298 in 1 : vector<128x32xf32>, vector<128x32xf32>, vector<128x32xf32>, vector<128x32xf32> -> vector<128x128xf32>
    %300 = vector.extract_strided_slice %299 {offsets = [0, 0], sizes = [64, 128], strides = [1, 1]} : vector<128x128xf32> to vector<64x128xf32>
    %c0_120 = arith.constant 0 : index
    %c0_121 = arith.constant 0 : index
    %c0_122 = arith.constant 0 : index
    %301 = vector.load %arg6[%c0_120, %c0_121, %c0_122] : memref<2x64x128xf32, #tpu.memory_space<vmem>>, vector<1x64x128xf32>
    %302 = vector.shape_cast %301 : vector<1x64x128xf32> to vector<64x128xf32>
    %303 = vector.shape_cast %300 : vector<64x128xf32> to vector<1x64x128xf32>
    tpu.vector_store %arg6[%c0_120, %c0_121, %c0_122], %303 {strides = array<i32>} : memref<2x64x128xf32, #tpu.memory_space<vmem>>, vector<1x64x128xf32>,
    %304 = vector.extract_strided_slice %299 {offsets = [64, 0], sizes = [64, 128], strides = [1, 1]} : vector<128x128xf32> to vector<64x128xf32>
    %c1_123 = arith.constant 1 : index
    %c0_124 = arith.constant 0 : index
    %c0_125 = arith.constant 0 : index
    %305 = vector.load %arg6[%c1_123, %c0_124, %c0_125] : memref<2x64x128xf32, #tpu.memory_space<vmem>>, vector<1x64x128xf32>
    %306 = vector.shape_cast %305 : vector<1x64x128xf32> to vector<64x128xf32>
    %307 = vector.shape_cast %304 : vector<64x128xf32> to vector<1x64x128xf32>
    tpu.vector_store %arg6[%c1_123, %c0_124, %c0_125], %307 {strides = array<i32>} : memref<2x64x128xf32, #tpu.memory_space<vmem>>, vector<1x64x128xf32>,
    return
  }
  func.func @transform_0(%arg0: i32) -> (i32, i32, i32) {
    %c0_i32 = arith.constant 0 : i32
    %c0_i32_0 = arith.constant 0 : i32
    %c0_i32_1 = arith.constant 0 : i32
    return %arg0, %c0_i32, %c0_i32_0 : i32, i32, i32
  }
  func.func @transform_1(%arg0: i32) -> (i32, i32, i32) {
    %c0_i32 = arith.constant 0 : i32
    %c0_i32_0 = arith.constant 0 : i32
    %c0_i32_1 = arith.constant 0 : i32
    %c0_i32_2 = arith.constant 0 : i32
    return %c0_i32, %c0_i32_0, %c0_i32_1 : i32, i32, i32
  }
  func.func @transform_2(%arg0: i32) -> (i32, i32, i32) {
    %c0_i32 = arith.constant 0 : i32
    %c0_i32_0 = arith.constant 0 : i32
    %c0_i32_1 = arith.constant 0 : i32
    %c0_i32_2 = arith.constant 0 : i32
    return %c0_i32, %c0_i32_0, %c0_i32_1 : i32, i32, i32
  }
  func.func @transform_3(%arg0: i32) -> (i32, i32, i32) {
    %c0_i32 = arith.constant 0 : i32
    %c0_i32_0 = arith.constant 0 : i32
    %c0_i32_1 = arith.constant 0 : i32
    %c0_i32_2 = arith.constant 0 : i32
    return %c0_i32, %c0_i32_0, %c0_i32_1 : i32, i32, i32
  }
  func.func @transform_4(%arg0: i32) -> (i32, i32) {
    %c0_i32 = arith.constant 0 : i32
    %c0_i32_0 = arith.constant 0 : i32
    %c0_i32_1 = arith.constant 0 : i32
    return %c0_i32, %c0_i32_0 : i32, i32
  }
  func.func @transform_5(%arg0: i32) -> (i32, i32, i32) {
    %c0_i32 = arith.constant 0 : i32
    %c0_i32_0 = arith.constant 0 : i32
    %c0_i32_1 = arith.constant 0 : i32
    return %arg0, %c0_i32, %c0_i32_0 : i32, i32, i32
  }
}

</mosaic_0001>

<bundles_post_ra>
// kernel: tpu_custom_call.1
= control target key start
LH: loop header
LB: loop body
LE: loop exit
PB: predicated region body
PF: predicated region fallthrough
CT: control target
= control target key end

     0   :  { %10 = vsyncpa [#allocation3], 0  ;;  %s11610_s0 = inlined_call_operand.hbm [shape: f32[4,32,64], index: 0, kind: input, shape index: {}]   ;;  %s11611_s1 = inlined_call_operand.hbm [shape: f32[2,32,32], index: 1, kind: input, shape index: {}]   ;;  %s11612_s2 = inlined_call_operand.hbm [shape: f32[4,32,40], index: 2, kind: input, shape index: {}]   ;;  %s11613_s3 = inlined_call_operand.hbm [shape: f32[4,32,32], index: 3, kind: input, shape index: {}]   ;;  %s11614_s4 = inlined_call_operand.hbm [shape: f32[20,32], index: 4, kind: input, shape index: {}]   ;;  %s11615_s5 = inlined_call_operand.hbm [shape: f32[4,64,128], index: 5, kind: output, shape index: {}]  }
   0x1   :  { %12 = vsyncpa [#allocation3 + $0x1], 0 }
   0x2   :  { %13 = vsyncpa [#allocation6], 0 }
   0x3   :  { %14 = vsyncpa [#allocation9], 0 }
   0x4   :  { %15 = vsyncpa [#allocation4], 0 }
   0x5   :  { %17 = vsyncpa [#allocation4 + $0x1], 0  ;;  %s9209_s18 = smov 0   ;;  %s9211_s19 = smov 0  }
   0x6   :  { %s9213_s20 = smov 0   ;;  %s9215_s21 = smov 0  }
   0x7 LB: > { %s9230_s22 = sadd.s32 4294967295, %s9164_s21   ;;  %s6529_s23 = sadd.s32 4294967294, %s9164_s21   ;;  %s9164_s21 = sphi %s9215_s21, %s11704_s21   ;;  %s9160_s20 = sphi %s9213_s20, %s11703_s20   ;;  %s9156_s19 = sphi %s9211_s19, %s11702_s19   ;;  %s9152_s18 = sphi %s9209_s18, %s11701_s18  }
   0x8   : > { %p43_p0 = scmp.ne.s32.totalorder %s9156_s19, %s9152_s18  ;;  %p11616_p1 = scmp.eq.s32.totalorder %s9230_s22, 0 }
   0x9   : > { %p157_p3 = scmp.eq.s32.totalorder %s6529_s23, 1  ;;  %p6530_p5 = scmp.ge.s32.totalorder %s9164_s21, 1 }
   0xa   : > { %p9239_p4 = por %p11616_p1, %p43_p0  ;;  %p164_p7 = scmp.lt.s32.totalorder %s9164_s21, 3 }
   0xb   : > { %p9244_p6 = por %p157_p3, %p43_p0  ;;  %s9166_s27 = smov [#allocation5]  }
   0xc   : > { %s11641_s24 = scalar_select %p9239_p4, 1, 0 }
   0xd   : > { %s11642_s25 = scalar_select %p9244_p6, 1, 0 }
   0xe   : > { %p9249_p8 = pnand %p6530_p5, %p164_p7  ;;  %s176_s28 = sshll.u32 %s9166_s27, 4  ;;  %s9253_s28 = int_to_ptr.vmem [resolvable:$true] %s176_s28 }
   0xf   : > { %s9167_s30 = smov [#allocation8]   ;;  %s9168_s7 = smov [#allocation7]  }
  0x10   : > { %s11643_s26 = scalar_select %p9249_p8, 1, 0 }
  0x11   : > { %p8601_p9 = pneg %p9249_p8  ;;  %s202_s6 = sshll.u32 %s9167_s30, 4  ;;  %s9264_s6 = int_to_ptr.vmem [resolvable:$true] %s202_s6 }
  0x12   : > { %s9266_s8 = sshll.u32 %s9168_s7, 4  ;;  %s8948_s11 = scalar_lea.hbm %s11611_s1, 1024  ;;  %s190_s8 = int_to_ptr.vmem [resolvable:$true] %s9266_s8 }
  0x13   : > { %p9260_p11 = pnand %p8601_p9, %p11616_p1  ;;  %p8949_p12 = scmp.ne.s32.totalorder %s11611_s1, %s8948_s11 }
  0x14   : > { %p8955_p5 = scmp.lt.u32.totalorder %s8948_s11, %s11611_s1 }
  0x15   : > { %p9276_p13 = pneg %p9260_p11 }
  0x17   : > { %p8951_p0 = pnand %p9276_p13, %p8949_p12 }
  0x19   : > { %p8952_p3 = pneg %p8951_p0 }
  0x1b   : > { %p8957_p7 = pnand %p8955_p5, %p8952_p3 }
  0x1d   : > { %8960 = shalt.err (!%p8957_p7)
}
  0x1e   : > { %s8961_s17 = scalar_lea.vmem %s9253_s28, 1024  ;;  %p8969_p2 = scmp.lt.s32.totalorder %s9253_s28, %s9253_s28 }
  0x1f   : > { %p8962_p9 = scmp.ne.s32.totalorder %s9253_s28, %s8961_s17  ;;  %p8970_p6 = scmp.lt.s32.totalorder %s8961_s17, %s8961_s17 }
  0x21   : > { %p8964_p10 = pnand %p8962_p9, %p9276_p13  ;;  %p8971_p12 = por %p8970_p6, %p8969_p2 }
  0x23   : > { %p8965_p1 = pneg %p8964_p10 }
  0x25   : > { %p8972_p0 = pnand %p8971_p12, %p8965_p1 }
  0x27   : > { %8975 = shalt.err (!%p8972_p0)
}
  0x28   : > { %s9169_s23 = smov 128   ;;  %s9170_s27 = smov 8  }
  0x29   : > { %8604 = dma.hbm_to_vmem [thread:$0]  (!%p9260_p11), %s11611_s1, 1024, %s9253_s28, [#allocation6], %s9169_s23, %s9169_s23, %s9170_s27  }
  0x2a   : > { %s8976_s11 = scalar_lea.hbm %s11613_s3, 2048 }
  0x2b   : > { %p8977_p1 = scmp.ne.s32.totalorder %s11613_s3, %s8976_s11  ;;  %p8983_p10 = scmp.lt.u32.totalorder %s8976_s11, %s11613_s3 }
  0x2d   : > { %p8979_p2 = pnand %p8977_p1, %p9276_p13 }
  0x2f   : > { %p8980_p6 = pneg %p8979_p2 }
  0x31   : > { %p8985_p3 = pnand %p8983_p10, %p8980_p6 }
  0x33   : > { %8988 = shalt.err (!%p8985_p3)
}
  0x34   : > { %s8989_s28 = scalar_lea.vmem %s9264_s6, 2048  ;;  %p8997_p12 = scmp.lt.s32.totalorder %s9264_s6, %s9264_s6 }
  0x35   : > { %p8990_p5 = scmp.ne.s32.totalorder %s9264_s6, %s8989_s28  ;;  %p8998_p0 = scmp.lt.s32.totalorder %s8989_s28, %s8989_s28 }
  0x37   : > { %p8992_p7 = pnand %p8990_p5, %p9276_p13  ;;  %p8999_p1 = por %p8998_p0, %p8997_p12 }
  0x39   : > { %p8993_p9 = pneg %p8992_p7 }
  0x3b   : > { %p9000_p2 = pnand %p8999_p1, %p8993_p9 }
  0x3d   : > { %9003 = shalt.err (!%p9000_p2)
}
  0x3e   : > { %8610 = dma.hbm_to_vmem [thread:$0]  (!%p9260_p11), %s11613_s3, 2048, %s9264_s6, [#allocation9], %s9169_s23, %s9169_s23, %s9170_s27  }
  0x3f   : > { %s9004_s10 = scalar_lea.hbm %s11612_s2, 2048 }
  0x40   : > { %p9005_p6 = scmp.ne.s32.totalorder %s11612_s2, %s9004_s10  ;;  %p9011_p5 = scmp.lt.u32.totalorder %s9004_s10, %s11612_s2 }
  0x42   : > { %p9007_p10 = pnand %p9005_p6, %p9276_p13 }
  0x44   : > { %p9008_p3 = pneg %p9007_p10 }
  0x46   : > { %p9013_p7 = pnand %p9011_p5, %p9008_p3 }
  0x48   : > { %9016 = shalt.err (!%p9013_p7)
}
  0x49   : > { %s9017_s16 = scalar_lea.vmem %s190_s8, 2048  ;;  %p9025_p1 = scmp.lt.s32.totalorder %s190_s8, %s190_s8 }
  0x4a   : > { %p9018_p9 = scmp.ne.s32.totalorder %s190_s8, %s9017_s16  ;;  %p9026_p2 = scmp.lt.s32.totalorder %s9017_s16, %s9017_s16 }
  0x4c   : > { %p9020_p12 = pnand %p9018_p9, %p9276_p13  ;;  %p9027_p4 = por %p9026_p2, %p9025_p1 }
  0x4e   : > { %p9021_p0 = pneg %p9020_p12 }
  0x50   : > { %p9028_p8 = pnand %p9027_p4, %p9021_p0 }
  0x52   : > { %9031 = shalt.err (!%p9028_p8)
}
  0x53   : > { %8607 = dma.hbm_to_vmem [thread:$0]  (!%p9260_p11), %s11612_s2, 2048, %s190_s8, [#allocation6], %s9169_s23, %s9169_s23, %s9170_s27  }
  0x54   : > { %s9171_s17 = smov [#allocation10]   ;;  %s9032_s10 = scalar_lea.hbm %s11614_s4, 384 }
  0x55   : > { %s215_s30 = sshll.u32 %s9171_s17, 4  ;;  %p9033_p4 = scmp.ne.s32.totalorder %s11614_s4, %s9032_s10  ;;  %s216_s30 = int_to_ptr.vmem [resolvable:$true] %s215_s30 }
  0x56   : > { %p9039_p10 = scmp.lt.u32.totalorder %s9032_s10, %s11614_s4 }
  0x57   : > { %p9035_p8 = pnand %p9033_p4, %p9276_p13 }
  0x59   : > { %p9036_p6 = pneg %p9035_p8 }
  0x5b   : > { %p9041_p3 = pnand %p9039_p10, %p9036_p6 }
  0x5d   : > { %9044 = shalt.err (!%p9041_p3)
}
  0x5e   : > { %s9045_s8 = scalar_lea.vmem %s216_s30, 384  ;;  %p9053_p12 = scmp.lt.s32.totalorder %s216_s30, %s216_s30 }
  0x5f   : > { %p9046_p5 = scmp.ne.s32.totalorder %s216_s30, %s9045_s8  ;;  %p9054_p0 = scmp.lt.s32.totalorder %s9045_s8, %s9045_s8 }
  0x61   : > { %p9048_p7 = pnand %p9046_p5, %p9276_p13  ;;  %p9055_p1 = por %p9054_p0, %p9053_p12 }
  0x63   : > { %p9049_p9 = pneg %p9048_p7 }
  0x65   : > { %p9056_p2 = pnand %p9055_p1, %p9049_p9 }
  0x67   : > { %9059 = shalt.err (!%p9056_p2)
}
  0x68   : > { %8613 = dma.hbm_to_vmem [thread:$0]  (!%p9260_p11), %s11614_s4, 384, %s216_s30, [#allocation9], %s9169_s23, %s9169_s23, %s9170_s27  }
  0x69   : > { %s9370_s14 = sadd.s32 1, %s9164_s21   ;;  %s30_s29 = sadd.s32 1, %s9160_s20 }
  0x6a   : > { %s27_s28 = ssub.s32 %s9164_s21, %s9370_s14  ;;  %p37_p13 = scmp.ne.s32.totalorder %s9160_s20, %s9156_s19 }
  0x6b   : > { %p28_p4 = scmp.eq.s32.totalorder %s27_s28, 0  ;;  %p38_p8 = scmp.eq.s32.totalorder %s9164_s21, 0 }
  0x6c   : > { %p11646_p6 = scmp.eq.s32.totalorder %s9230_s22, 1  ;;  %p8626_p3 = scmp.lt.s32.totalorder %s9164_s21, 2 }
  0x6d   : > { %s9386_s7 = scalar_select %p28_p4, %s9160_s20, %s30_s29  }
  0x6e   : > { %p9380_p10 = por %p11646_p6, %p37_p13  ;;  %p39_p5 = por %p38_p8, %p37_p13 }
  0x6f   : > { %s229_s9 = sand.u32 1, %s9160_s20   ;;  %s6934_s30 = sshll.u32 %s9164_s21, 10 }
  0x70   : > { %s6536_s10 = sshll.u32 %s229_s9, 6  ;;  %s9393_s13 = scalar_lea.hbm %s11610_s0, %s6934_s30 }
  0x71   : > { %s233_s15 = scalar_lea.vmem [#allocation2], %s6536_s10  ;;  %p9397_p11 = pnand %p8626_p3, %p39_p5 }
  0x72   : > { %s241_s8 = sshll.u32 %s233_s15, 4  ;;  %s9401_s6 = scalar_lea.sflag [#allocation3], %s229_s9  ;;  %s9395_s8 = int_to_ptr.vmem [resolvable:$true] %s241_s8 }
  0x73   : > { %s9060_s29 = scalar_lea.hbm %s9393_s13, 1024  ;;  %p9062_p9 = pneg %p9397_p11 }
  0x74   : > { %p9061_p7 = scmp.ne.s32.totalorder %s9393_s13, %s9060_s29  ;;  %s9065_s30 = scalar_lea.hbm %s11610_s0, 2048 }
  0x75   : > { %p9066_p1 = scmp.lt.u32.totalorder %s9393_s13, %s11610_s0  ;;  %p9067_p2 = scmp.lt.u32.totalorder %s9065_s30, %s9060_s29 }
  0x76   : > { %p9063_p12 = pnand %p9062_p9, %p9061_p7  ;;  %p9069_p4 = scmp.lt.u32.totalorder %s9060_s29, %s9393_s13 }
  0x77   : > { %p9068_p13 = por %p9067_p2, %p9066_p1 }
  0x78   : > { %p9064_p0 = pneg %p9063_p12 }
  0x79   : > { %p9070_p8 = por %p9069_p4, %p9068_p13 }
  0x7b   : > { %p9071_p6 = pnand %p9070_p8, %p9064_p0 }
  0x7d   : > { %9074 = shalt.err (!%p9071_p6)
}
  0x7e   : > { %s9075_s9 = scalar_lea.vmem %s9395_s8, 1024  ;;  %s9172_s15 = smov [#allocation2]  }
  0x7f   : > { %p9076_p3 = scmp.ne.s32.totalorder %s9395_s8, %s9075_s9  ;;  %s9080_s28 = sshll.u32 %s9172_s15, 4  ;;  %s9081_s28 = int_to_ptr.vmem [resolvable:$false] %s9080_s28 }
  0x80   : > { %s9082_s10 = scalar_lea.vmem %s9081_s28, 2048  ;;  %p9083_p12 = scmp.lt.s32.totalorder %s9395_s8, %s9081_s28 }
  0x81   : > { %p9078_p5 = pnand %p9076_p3, %p9062_p9  ;;  %p9084_p1 = scmp.lt.s32.totalorder %s9082_s10, %s9075_s9 }
  0x83   : > { %p9079_p7 = pneg %p9078_p5  ;;  %p9085_p2 = por %p9084_p1, %p9083_p12 }
  0x85   : > { %p9086_p13 = pnand %p9085_p2, %p9079_p7 }
  0x87   : > { %9089 = shalt.err (!%p9086_p13)
}
  0x88   : > { %8617 = dma.hbm_to_vmem [thread:$0]  (!%p9397_p11), %s9393_s13, 1024, %s9395_s8, %s9401_s6, %s9169_s23, %s9169_s23, %s9170_s27  }
  0x89   : > { %p11649_p9 = scmp.ne.s32.totalorder %s11643_s26, 0 }
  0x8b   : > { %253 = sbr.rel (%p11649_p9) target bundleno = 5961 (0x1749), region = 40 }
  0x92   : > { %s9435_s29 = sand.u32 1, %s9156_s19   ;;  %p11650_p0 = scmp.ne.s32.totalorder %s11641_s24, 0 }
  0x93   : > { %s6541_s30 = sshll.u32 %s9435_s29, 6  ;;  %s256_s11 = scalar_lea.sflag [#allocation3], %s9435_s29 }
  0x94   : > { %s259_s12 = scalar_lea.vmem [#allocation2], %s6541_s30 }
  0x95   : > { %9135 = dma.done.wait (%p11650_p0), %s256_s11, 1024  }
  0x96   : > { %9137 = vsyncadd (%p11650_p0), %s256_s11, 4294966272  ;;  %p11651_p4 = scmp.eq.s32.totalorder %s9230_s22, 0 }
  0x98   : > { %9139 = dma.done.wait (%p11651_p4), [#allocation6], 3072   ;;  %p11652_p11 = pmov %p11651_p4 }
  0x99   : > { %p11653_p8 = pmov %p11651_p4 }
  0x9a   : > { %9141 = vsyncadd (%p11652_p11), [#allocation6], 4294964224 }
  0x9b   : > { %9143 = dma.done.wait (%p11653_p8), [#allocation9], 2432   ;;  %p11654_p6 = pmov %p11651_p4 }
  0x9c   : > { %v304_v0 = vld [vmem:[%s259_s12] sm:$0xff]  ;;  %v305_v2 = vld [vmem:[%s259_s12 + $0x8] sm:$0xff]  ;;  %v314_v6 = vld [vmem:[#allocation5 + $0x10] sm:$0xff]  ;;  %vm348_vm0 = vcmask 261120   ;;  %s9173_s24 = smov 96   ;;  %vm1195_vm1 = vcmask 64512  }
  0x9d   : > { %9145 = vsyncadd (%p11654_p6), [#allocation9], 4294964864  ;;  %316 = vxpose.xlu0.b32.start [1/4] (short) (narrow) %v304_v0, 64  ;;  %v308_v1 = vld [vmem:[%s259_s12 + $0x20] sm:$0xff]  ;;  %v309_v3 = vld [vmem:[%s259_s12 + $0x28] sm:$0xff]  ;;  %vm1317_vm3 = vcmask 523264  }
  0x9e   : > { %478 = vxpose.xlu1.b32.start [1/4] (short) (narrow) %v308_v1, 64  ;;  %v312_v4 = vld [vmem:[#allocation5] sm:$0xff]  ;;  %v313_v5 = vld [vmem:[#allocation5 + $0x8] sm:$0xff]  ;;  %v315_v7 = vld [vmem:[#allocation5 + $0x18] sm:$0xff]  ;;  %s9174_s26 = smov 32   ;;  %s9175_s23 = smov 64  }
  0x9f   : > { %v8173_v8 = vpack.c.bf16 %v313_v5, %v312_v4  ;;  %v8177_v9 = vpack.c.bf16 %v315_v7, %v314_v6  ;;  %v306_v10 = vld [vmem:[%s259_s12 + $0x10] sm:$0xff]  ;;  %v307_v12 = vld [vmem:[%s259_s12 + $0x18] sm:$0xff]  ;;  %v698_v30 = vld [vmem:[#allocation5 + $0x20] sm:$0xff]  ;;  %s6546_s27 = sshll.u32 %s9435_s29, 7  ;;  %vm6369_vm4 = vcmask 785408   ;;  %s6936_s8 = sshll.u32 %s9230_s22, 11 }
  0xa0   : > { %v310_v11 = vld [vmem:[%s259_s12 + $0x30] sm:$0xff]  ;;  %v311_v13 = vld [vmem:[%s259_s12 + $0x38] sm:$0xff]  ;;  %v699_v31 = vld [vmem:[#allocation5 + $0x28] sm:$0xff]  ;;  %s11465_s13 = scalar_lea.vmem [#allocation11], %s6546_s27  ;;  %s11558_s9 = scalar_lea.hbm %s11615_s5, %s6936_s8 }
  0xa1   : > { %317 = vxpose.xlu0.b32.cont [2/4] (short) (narrow) %v305_v2, 64  ;;  %8174 = vmatprep.subr.bf16.mxu1 %v8173_v8  ;;  %v8189_v32 = vpack.c.bf16 %v699_v31, %v698_v30  ;;  %v700_v33 = vld [vmem:[#allocation5 + $0x30] sm:$0xff]  ;;  %v701_v34 = vld [vmem:[#allocation5 + $0x38] sm:$0xff]  ;;  %v953_v36 = vld [vmem:[#allocation7] sm:$0xff]  ;;  %s6418_s16 = sshll.u32 %s11465_s13, 4  ;;  %s6404_s15 = scalar_lea.sflag [#allocation4], %s9435_s29  ;;  %s11560_s16 = int_to_ptr.vmem [resolvable:$true] %s6418_s16 }
  0xa2   : > { %479 = vxpose.xlu1.b32.cont [2/4] (short) (narrow) %v309_v3, 64  ;;  %8176 = vmatpush3.bf16.msra.mxu1 %v8173_v8  ;;  %v8193_v35 = vpack.c.bf16 %v701_v34, %v700_v33  ;;  %v954_v37 = vld [vmem:[#allocation7 + $0x8] sm:$0xff]  ;;  %v9467_v39 = vld [vmem:[#allocation10] ss:$0 sm:$0xff]  ;;  %v9469_v41 = vld [vmem:[#allocation10 + $0x2] ss:$0 sm:$0xff] }
  0xa3   : > { %8178 = vmatprep.subr.bf16.mxu1 %v8177_v9  ;;  %8190 = vmatprep.subr.bf16.mxu0 %v8189_v32  ;;  %v8197_v38 = vpack.c.bf16 %v954_v37, %v953_v36  ;;  %vm9664_vm2 = vmpackc.low %vm1195_vm1, %vm1195_vm1  ;;  %s9090_s28 = scalar_lea.vmem %s11560_s16, 2048  ;;  %s9176_s10 = smov [#allocation11]  }
  0xa4   : > { %8192 = vmatpush3.bf16.msra.mxu0 %v8189_v32  ;;  %p9091_p3 = scmp.ne.s32.totalorder %s11560_s16, %s9090_s28  ;;  %s9094_s30 = sshll.u32 %s9176_s10, 4  ;;  %s9095_s30 = int_to_ptr.vmem [resolvable:$false] %s9094_s30 }
  0xa5   : > { %318 = vxpose.xlu0.b32.cont [3/4] (short) (narrow) %v306_v10, 64  ;;  %8194 = vmatprep.subr.bf16.mxu0 %v8193_v35  ;;  %s9096_s11 = scalar_lea.vmem %s9095_s30, 4096  ;;  %p9097_p12 = scmp.lt.s32.totalorder %s11560_s16, %s9095_s30 }
  0xa6   : > { %480 = vxpose.xlu1.b32.cont [3/4] (short) (narrow) %v310_v11, 64  ;;  %8180 = vmatpush3.bf16.msra.mxu1 %v8177_v9  ;;  %p9092_p5 = pnand %p9091_p3, %p9380_p10  ;;  %p9098_p1 = scmp.lt.s32.totalorder %s9096_s11, %s9090_s28 }
  0xa7   : > { %8182 = vmatprep.subr.bf16.mxu1 %v8173_v8 }
  0xa8   : > { %8196 = vmatpush3.bf16.msra.mxu0 %v8193_v35  ;;  %p9093_p7 = pneg %p9092_p5  ;;  %p9099_p2 = por %p9098_p1, %p9097_p12 }
  0xa9   : > { %319 = vxpose.xlu0.b32.end [4/4] (short) (narrow) %v307_v12, 64 }
  0xaa   : > { %481 = vxpose.xlu1.b32.end [4/4] (short) (narrow) %v311_v13, 64  ;;  %p9100_p13 = pnand %p9099_p2, %p9093_p7 }
 0x11d   : > { %v332_v14 = vpop.trf.xlu0 }
 0x11e   : > { %7405 = vmatprep.mubr.msk.f32.mxu1 %vm348_vm0, %v332_v14  ;;  %v494_v15 = vpop.trf.xlu1 }
 0x121   : > { %v333_v16 = vpop.trf.xlu0 }
 0x122   : > { %7406 = vmatmul.mubr.msk.f32.vlgmr.msra.gmra.mrb[0].mxu1 %vm348_vm0, %v333_v16  ;;  %v495_v17 = vpop.trf.xlu1 }
 0x123   : > { %8184 = vmatpush3.bf16.msra.mxu1 %v8173_v8 }
 0x124   : > { %8186 = vmatprep.subr.bf16.mxu1 %v8177_v9 }
 0x125   : > { %v334_v18 = vpop.trf.xlu0 }
 0x126   : > { %7408 = vmatprep.mubr.msk.f32.mxu1 %vm348_vm0, %v334_v18  ;;  %v496_v20 = vpop.trf.xlu1 }
 0x127   : > { %8188 = vmatpush3.bf16.msra.mxu1 %v8177_v9 }
 0x128   : > { %8198 = vmatprep.subr.bf16.mxu1 %v8197_v38 }
 0x129   : > { %v335_v19 = vpop.trf.xlu0 }
 0x12a   : > { %7409 = vmatmul.mubr.msk.f32.gmra.mrb[2].mxu1 %vm348_vm0, %v335_v19  ;;  %v497_v22 = vpop.trf.xlu1 }
 0x12d   : > { %v336_v21 = vpop.trf.xlu0 }
 0x12e   : > { %7411 = vmatprep.mubr.msk.f32.mxu1 %vm348_vm0, %v336_v21  ;;  %v498_v25 = vpop.trf.xlu1 }
 0x131   : > { %v337_v23 = vpop.trf.xlu0 }
 0x132   : > { %7412 = vmatmul.mubr.msk.f32.gmra.mrb[4].mxu1 %vm348_vm0, %v337_v23  ;;  %v499_v27 = vpop.trf.xlu1 }
 0x135   : > { %v338_v24 = vpop.trf.xlu0 }
 0x136   : > { %7414 = vmatprep.mubr.msk.f32.mxu1 %vm348_vm0, %v338_v24  ;;  %v500_v28 = vpop.trf.xlu1 }
 0x139   : > { %v339_v26 = vpop.trf.xlu0 }
 0x13a   : > { %7415 = vmatmul.mubr.msk.f32.gmra.mrb[6].mxu1 %vm348_vm0, %v339_v26  ;;  %v501_v29 = vpop.trf.xlu1 }
 0x13b   : > { %7425 = vmatprep.mubr.msk.f32.mxu1 %vm348_vm0, %v494_v15 }
 0x13e   : > { %7426 = vmatmul.mubr.msk.f32.vlgmr.msra.gmra.mrb[8].mxu1 %vm348_vm0, %v495_v17 }
 0x13f   : > { %7428 = vmatprep.mubr.msk.f32.mxu1 %vm348_vm0, %v496_v20  ;;  %8200 = vmatpush3.bf16.msra.mxu1 %v8197_v38 }
 0x142   : > { %7429 = vmatmul.mubr.msk.f32.gmra.mrb[10].mxu1 %vm348_vm0, %v497_v22 }
 0x143   : > { %7431 = vmatprep.mubr.msk.f32.mxu1 %vm348_vm0, %v498_v25 }
 0x146   : > { %7432 = vmatmul.mubr.msk.f32.gmra.mrb[12].mxu1 %vm348_vm0, %v499_v27 }
 0x147   : > { %7434 = vmatprep.mubr.msk.f32.mxu1 %vm348_vm0, %v500_v28 }
 0x14a   : > { %7435 = vmatmul.mubr.msk.f32.gmra.mrb[14].mxu1 %vm348_vm0, %v501_v29 }
 0x1f5   : > { %v7407_v40 = vpop.f32.mrb[0].mxu1 }
 0x1f6   : > { %v645_v42 = vmul.f32 %v7407_v40, %v9467_v39  ;;  %v439_v43 = vpop.f32.mrb[1].mxu1 }
 0x1f7   : > { %v644_v44 = vmul.f32 %v9467_v39, %v439_v43  ;;  %v955_v43 = vld [vmem:[#allocation7 + $0x10] sm:$0xff] }
 0x1f8   : > { %v666_v45 = vadd.f32 %v9469_v41, %v645_v42 }
 0x1f9   : > { %v665_v46 = vadd.f32 %v9469_v41, %v644_v44  ;;  %v956_v44 = vld [vmem:[#allocation7 + $0x18] sm:$0xff] }
 0x1fa   : > { %v682_v48 = vmax.f32 %v666_v45, 0.0  ;;  %v8201_v45 = vpack.c.bf16 %v956_v44, %v955_v43 }
 0x1fb   : > { %v681_v47 = vmax.f32 %v665_v46, 0.0 }
 0x1fc   : > { %8202 = vmatprep.subr.bf16.mxu1 %v8201_v45 }
 0x1fd   : > { %v7410_v49 = vpop.f32.mrb[2].mxu1  ;;  %7445 = vmatprep.mubr.msk.f32.mxu0 %vm348_vm0, %v681_v47  ;;  %8204 = vmatpush3.bf16.msra.mxu1 %v8201_v45  ;;  %v9521_v47 = vld [vmem:[#allocation10 + $0x3] ss:$0 sm:$0xff] }
 0x1fe   : > { %v647_v50 = vmul.f32 %v7410_v49, %v9467_v39  ;;  %v449_v51 = vpop.f32.mrb[3].mxu1  ;;  %7446 = vmatmul.mubr.msk.f32.vlgmr.msra.gmra.mrb[0].mxu0 %vm348_vm0, %v682_v48 }
 0x1ff   : > { %v646_v52 = vmul.f32 %v9467_v39, %v449_v51 }
 0x200   : > { %v668_v53 = vadd.f32 %v9469_v41, %v647_v50 }
 0x201   : > { %v667_v54 = vadd.f32 %v9469_v41, %v646_v52 }
 0x202   : > { %v684_v56 = vmax.f32 %v668_v53, 0.0 }
 0x203   : > { %v683_v55 = vmax.f32 %v667_v54, 0.0 }
 0x205   : > { %v7413_v57 = vpop.f32.mrb[4].mxu1  ;;  %7448 = vmatprep.mubr.msk.f32.mxu0 %vm348_vm0, %v683_v55 }
 0x206   : > { %v649_v58 = vmul.f32 %v7413_v57, %v9467_v39  ;;  %v459_v59 = vpop.f32.mrb[5].mxu1  ;;  %7449 = vmatmul.mubr.msk.f32.gmra.mrb[2].mxu0 %vm348_vm0, %v684_v56 }
 0x207   : > { %v648_v60 = vmul.f32 %v9467_v39, %v459_v59 }
 0x208   : > { %v670_v61 = vadd.f32 %v9469_v41, %v649_v58 }
 0x209   : > { %v669_v62 = vadd.f32 %v9469_v41, %v648_v60 }
 0x20a   : > { %v686_v63 = vmax.f32 %v670_v61, 0.0 }
 0x20b   : > { %v685_v0 = vmax.f32 %v669_v62, 0.0 }
 0x20d   : > { %v7416_v1 = vpop.f32.mrb[6].mxu1  ;;  %7451 = vmatprep.mubr.msk.f32.mxu0 %vm348_vm0, %v685_v0 }
 0x20e   : > { %v651_v2 = vmul.f32 %v7416_v1, %v9467_v39  ;;  %v469_v3 = vpop.f32.mrb[7].mxu1  ;;  %7452 = vmatmul.mubr.msk.f32.gmra.mrb[4].mxu0 %vm348_vm0, %v686_v63 }
 0x20f   : > { %v650_v4 = vmul.f32 %v9467_v39, %v469_v3 }
 0x210   : > { %v672_v5 = vadd.f32 %v9469_v41, %v651_v2 }
 0x211   : > { %v671_v6 = vadd.f32 %v9469_v41, %v650_v4  ;;  %v7427_v7 = vpop.f32.mrb[8].mxu1 }
 0x212   : > { %v688_v8 = vmax.f32 %v672_v5, 0.0  ;;  %v653_v9 = vmul.f32 %v7427_v7, %v9467_v39  ;;  %v600_v10 = vpop.f32.mrb[9].mxu1 }
 0x213   : > { %v687_v11 = vmax.f32 %v671_v6, 0.0  ;;  %v652_v12 = vmul.f32 %v9467_v39, %v600_v10 }
 0x214   : > { %v674_v13 = vadd.f32 %v9469_v41, %v653_v9 }
 0x215   : > { %7454 = vmatprep.mubr.msk.f32.mxu0 %vm348_vm0, %v687_v11  ;;  %v673_v14 = vadd.f32 %v9469_v41, %v652_v12  ;;  %v7430_v15 = vpop.f32.mrb[10].mxu1 }
 0x216   : > { %v690_v16 = vmax.f32 %v674_v13, 0.0  ;;  %7455 = vmatmul.mubr.msk.f32.gmra.mrb[6].mxu0 %vm348_vm0, %v688_v8  ;;  %v655_v17 = vmul.f32 %v7430_v15, %v9467_v39  ;;  %v610_v18 = vpop.f32.mrb[11].mxu1 }
 0x217   : > { %v689_v19 = vmax.f32 %v673_v14, 0.0  ;;  %v654_v20 = vmul.f32 %v9467_v39, %v610_v18 }
 0x218   : > { %v676_v21 = vadd.f32 %v9469_v41, %v655_v17 }
 0x219   : > { %7457 = vmatprep.mubr.msk.f32.mxu0 %vm348_vm0, %v689_v19  ;;  %v675_v22 = vadd.f32 %v9469_v41, %v654_v20  ;;  %v7433_v23 = vpop.f32.mrb[12].mxu1 }
 0x21a   : > { %v692_v24 = vmax.f32 %v676_v21, 0.0  ;;  %7458 = vmatmul.mubr.msk.f32.gmra.mrb[8].mxu0 %vm348_vm0, %v690_v16  ;;  %v657_v25 = vmul.f32 %v7433_v23, %v9467_v39  ;;  %v620_v26 = vpop.f32.mrb[13].mxu1 }
 0x21b   : > { %v691_v27 = vmax.f32 %v675_v22, 0.0  ;;  %v656_v28 = vmul.f32 %v9467_v39, %v620_v26 }
 0x21c   : > { %v678_v29 = vadd.f32 %v9469_v41, %v657_v25 }
 0x21d   : > { %7460 = vmatprep.mubr.msk.f32.mxu0 %vm348_vm0, %v691_v27  ;;  %v677_v30 = vadd.f32 %v9469_v41, %v656_v28  ;;  %v7436_v31 = vpop.f32.mrb[14].mxu1 }
 0x21e   : > { %v694_v32 = vmax.f32 %v678_v29, 0.0  ;;  %7461 = vmatmul.mubr.msk.f32.gmra.mrb[10].mxu0 %vm348_vm0, %v692_v24  ;;  %v659_v33 = vmul.f32 %v7436_v31, %v9467_v39  ;;  %v630_v34 = vpop.f32.mrb[15].mxu1 }
 0x21f   : > { %v693_v35 = vmax.f32 %v677_v30, 0.0  ;;  %v658_v36 = vmul.f32 %v9467_v39, %v630_v34  ;;  %v9519_v39 = vld [vmem:[#allocation10 + $0x1] ss:$0 sm:$0xff] }
 0x220   : > { %v680_v37 = vadd.f32 %v9469_v41, %v659_v33 }
 0x221   : > { %7463 = vmatprep.mubr.msk.f32.mxu0 %vm348_vm0, %v693_v35  ;;  %v679_v38 = vadd.f32 %v9469_v41, %v658_v36 }
 0x222   : > { %v696_v40 = vmax.f32 %v680_v37, 0.0  ;;  %7464 = vmatmul.mubr.msk.f32.gmra.mrb[12].mxu0 %vm348_vm0, %v694_v32 }
 0x223   : > { %v695_v42 = vmax.f32 %v679_v38, 0.0 }
 0x225   : > { %7466 = vmatprep.mubr.msk.f32.mxu0 %vm348_vm0, %v695_v42 }
 0x226   : > { %7467 = vmatmul.mubr.msk.f32.gmra.mrb[14].mxu0 %vm348_vm0, %v696_v40 }
 0x2d1   : > { %v7447_v46 = vpop.f32.mrb[0].mxu0 }
 0x2d2   : > { %v901_v41 = vmul.f32 %v7447_v46, %v9519_v39  ;;  %v816_v48 = vpop.f32.mrb[1].mxu0 }
 0x2d3   : > { %v900_v49 = vmul.f32 %v9519_v39, %v816_v48 }
 0x2d4   : > { %v922_v50 = vadd.f32 %v9521_v47, %v901_v41 }
 0x2d5   : > { %v921_v51 = vadd.f32 %v9521_v47, %v900_v49 }
 0x2d6   : > { %v9529_v53 = vmax.f32 %v922_v50, 0.0 }
 0x2d7   : > { %v9527_v52 = vmax.f32 %v921_v51, 0.0 }
 0x2d9   : > { %v7450_v54 = vpop.f32.mrb[2].mxu0  ;;  %7477 = vmatprep.mubr.msk.f32.mxu1 %vm348_vm0, %v9527_v52 }
 0x2da   : > { %v903_v55 = vmul.f32 %v7450_v54, %v9519_v39  ;;  %v826_v56 = vpop.f32.mrb[3].mxu0  ;;  %7478 = vmatmul.mubr.msk.f32.vlgmr.msra.gmra.mrb[16].mxu1 %vm348_vm0, %v9529_v53 }
 0x2db   : > { %v902_v57 = vmul.f32 %v9519_v39, %v826_v56 }
 0x2dc   : > { %v924_v58 = vadd.f32 %v9521_v47, %v903_v55 }
 0x2dd   : > { %v923_v59 = vadd.f32 %v9521_v47, %v902_v57 }
 0x2de   : > { %v9541_v61 = vmax.f32 %v924_v58, 0.0 }
 0x2df   : > { %v9539_v60 = vmax.f32 %v923_v59, 0.0 }
 0x2e1   : > { %v7453_v62 = vpop.f32.mrb[4].mxu0  ;;  %7480 = vmatprep.mubr.msk.f32.mxu1 %vm348_vm0, %v9539_v60 }
 0x2e2   : > { %v905_v63 = vmul.f32 %v7453_v62, %v9519_v39  ;;  %v836_v0 = vpop.f32.mrb[5].mxu0  ;;  %7481 = vmatmul.mubr.msk.f32.gmra.mrb[18].mxu1 %vm348_vm0, %v9541_v61 }
 0x2e3   : > { %v904_v1 = vmul.f32 %v9519_v39, %v836_v0 }
 0x2e4   : > { %v926_v2 = vadd.f32 %v9521_v47, %v905_v63 }
 0x2e5   : > { %v925_v3 = vadd.f32 %v9521_v47, %v904_v1 }
 0x2e6   : > { %v9551_v4 = vmax.f32 %v926_v2, 0.0 }
 0x2e7   : > { %v9553_v5 = vmax.f32 %v925_v3, 0.0 }
 0x2e9   : > { %v7456_v6 = vpop.f32.mrb[6].mxu0  ;;  %7483 = vmatprep.mubr.msk.f32.mxu1 %vm348_vm0, %v9553_v5 }
 0x2ea   : > { %v907_v7 = vmul.f32 %v7456_v6, %v9519_v39  ;;  %v846_v8 = vpop.f32.mrb[7].mxu0  ;;  %7484 = vmatmul.mubr.msk.f32.gmra.mrb[20].mxu1 %vm348_vm0, %v9551_v4 }
 0x2eb   : > { %v906_v9 = vmul.f32 %v9519_v39, %v846_v8 }
 0x2ec   : > { %v928_v10 = vadd.f32 %v9521_v47, %v907_v7 }
 0x2ed   : > { %v927_v11 = vadd.f32 %v9521_v47, %v906_v9  ;;  %v7459_v12 = vpop.f32.mrb[8].mxu0 }
 0x2ee   : > { %v9563_v13 = vmax.f32 %v928_v10, 0.0  ;;  %v909_v14 = vmul.f32 %v7459_v12, %v9519_v39  ;;  %v856_v15 = vpop.f32.mrb[9].mxu0 }
 0x2ef   : > { %v9566_v16 = vmax.f32 %v927_v11, 0.0  ;;  %v908_v17 = vmul.f32 %v9519_v39, %v856_v15 }
 0x2f0   : > { %v930_v18 = vadd.f32 %v9521_v47, %v909_v14 }
 0x2f1   : > { %7486 = vmatprep.mubr.msk.f32.mxu1 %vm348_vm0, %v9566_v16  ;;  %v929_v19 = vadd.f32 %v9521_v47, %v908_v17  ;;  %v7462_v20 = vpop.f32.mrb[10].mxu0 }
 0x2f2   : > { %v9573_v21 = vmax.f32 %v930_v18, 0.0  ;;  %7487 = vmatmul.mubr.msk.f32.gmra.mrb[22].mxu1 %vm348_vm0, %v9563_v13  ;;  %v911_v22 = vmul.f32 %v7462_v20, %v9519_v39  ;;  %v866_v23 = vpop.f32.mrb[11].mxu0 }
 0x2f3   : > { %v9578_v24 = vmax.f32 %v929_v19, 0.0  ;;  %v910_v25 = vmul.f32 %v9519_v39, %v866_v23 }
 0x2f4   : > { %v932_v26 = vadd.f32 %v9521_v47, %v911_v22 }
 0x2f5   : > { %7489 = vmatprep.mubr.msk.f32.mxu1 %vm348_vm0, %v9578_v24  ;;  %v931_v27 = vadd.f32 %v9521_v47, %v910_v25  ;;  %v7465_v28 = vpop.f32.mrb[12].mxu0 }
 0x2f6   : > { %v9585_v29 = vmax.f32 %v932_v26, 0.0  ;;  %7490 = vmatmul.mubr.msk.f32.gmra.mrb[24].mxu1 %vm348_vm0, %v9573_v21  ;;  %v913_v30 = vmul.f32 %v7465_v28, %v9519_v39  ;;  %v876_v31 = vpop.f32.mrb[13].mxu0 }
 0x2f7   : > { %v9590_v32 = vmax.f32 %v931_v27, 0.0  ;;  %v912_v33 = vmul.f32 %v9519_v39, %v876_v31 }
 0x2f8   : > { %v934_v34 = vadd.f32 %v9521_v47, %v913_v30 }
 0x2f9   : > { %7492 = vmatprep.mubr.msk.f32.mxu1 %vm348_vm0, %v9590_v32  ;;  %v933_v35 = vadd.f32 %v9521_v47, %v912_v33  ;;  %v7468_v36 = vpop.f32.mrb[14].mxu0 }
 0x2fa   : > { %v9597_v37 = vmax.f32 %v934_v34, 0.0  ;;  %7493 = vmatmul.mubr.msk.f32.gmra.mrb[26].mxu1 %vm348_vm0, %v9585_v29  ;;  %v915_v38 = vmul.f32 %v7468_v36, %v9519_v39  ;;  %v886_v40 = vpop.f32.mrb[15].mxu0 }
 0x2fb   : > { %v9602_v42 = vmax.f32 %v933_v35, 0.0  ;;  %v914_v43 = vmul.f32 %v9519_v39, %v886_v40  ;;  %v9619_v39 = vld [vmem:[#allocation10 + $0x4] ss:$0 sm:$0xff] }
 0x2fc   : > { %v936_v44 = vadd.f32 %v9521_v47, %v915_v38 }
 0x2fd   : > { %7495 = vmatprep.mubr.msk.f32.mxu1 %vm348_vm0, %v9602_v42  ;;  %v935_v45 = vadd.f32 %v9521_v47, %v914_v43 }
 0x2fe   : > { %v9609_v46 = vmax.f32 %v936_v44, 0.0  ;;  %7496 = vmatmul.mubr.msk.f32.gmra.mrb[28].mxu1 %vm348_vm0, %v9597_v37 }
 0x2ff   : > { %v9613_v41 = vmax.f32 %v935_v45, 0.0 }
 0x301   : > { %7498 = vmatprep.mubr.msk.f32.mxu1 %vm348_vm0, %v9613_v41 }
 0x302   : > { %7499 = vmatmul.mubr.msk.f32.gmra.mrb[30].mxu1 %vm348_vm0, %v9609_v46 }
 0x3ad   : > { %v7479_v48 = vpop.f32.mrb[16].mxu1 }
 0x3ae   : > { %v1156_v49 = vadd.f32 %v7479_v48, %v9619_v39  ;;  %1181 = vrot.lane.b32.xlu1 %v7479_v48, %s9173_s24  ;;  %v1071_v47 = vpop.f32.mrb[17].mxu1 }
 0x3af   : > { %v1155_v50 = vadd.f32 %v9619_v39, %v1071_v47  ;;  %1179 = vrot.lane.b32.xlu0 %v1071_v47, %s9173_s24 }
 0x3b1   : > { %v8229_v51 = vpack.c.bf16 %v1156_v49, %v1155_v50 }
 0x3b3   : > { %8230 = vmatprep.subr.bf16.mxu1 %v8229_v51 }
 0x3b4   : > { %8232 = vmatpush3.bf16.msra.mxu1 %v8229_v51 }
 0x3b5   : > { %v7482_v54 = vpop.f32.mrb[18].mxu1 }
 0x3b6   : > { %v1158_v55 = vadd.f32 %v7482_v54, %v9619_v39  ;;  %v1081_v56 = vpop.f32.mrb[19].mxu1 }
 0x3b7   : > { %v1157_v57 = vadd.f32 %v9619_v39, %v1081_v56  ;;  %1183 = vrot.lane.b32.xlu1 %v1081_v56, %s9173_s24 }
 0x3b9   : > { %v8233_v58 = vpack.c.bf16 %v1158_v55, %v1157_v57 }
 0x3bb   : > { %1185 = vrot.lane.b32.xlu1 %v7482_v54, %s9173_s24  ;;  %8234 = vmatprep.subr.bf16.mxu1 %v8233_v58 }
 0x3bc   : > { %8236 = vmatpush3.bf16.msra.mxu1 %v8233_v58 }
 0x3bd   : > { %v7485_v59 = vpop.f32.mrb[20].mxu1 }
 0x3be   : > { %v1160_v62 = vadd.f32 %v7485_v59, %v9619_v39  ;;  %1189 = vrot.lane.b32.xlu0 %v7485_v59, %s9173_s24  ;;  %v1091_v63 = vpop.f32.mrb[21].mxu1 }
 0x3bf   : > { %v1159_v0 = vadd.f32 %v9619_v39, %v1091_v63  ;;  %1187 = vrot.lane.b32.xlu1 %v1091_v63, %s9173_s24 }
 0x3c1   : > { %v8237_v1 = vpack.c.bf16 %v1160_v62, %v1159_v0 }
 0x3c3   : > { %8238 = vmatprep.subr.bf16.mxu1 %v8237_v1 }
 0x3c4   : > { %8240 = vmatpush3.bf16.msra.mxu1 %v8237_v1 }
 0x3c5   : > { %v7488_v2 = vpop.f32.mrb[22].mxu1 }
 0x3c6   : > { %v1162_v3 = vadd.f32 %v7488_v2, %v9619_v39  ;;  %1193 = vrot.lane.b32.xlu0 %v7488_v2, %s9173_s24  ;;  %v1101_v6 = vpop.f32.mrb[23].mxu1 }
 0x3c7   : > { %v1161_v7 = vadd.f32 %v9619_v39, %v1101_v6  ;;  %1191 = vrot.lane.b32.xlu1 %v1101_v6, %s9173_s24 }
 0x3c9   : > { %v8241_v8 = vpack.c.bf16 %v1162_v3, %v1161_v7  ;;  %v7491_v9 = vpop.f32.mrb[24].mxu1 }
 0x3ca   : > { %v1164_v10 = vadd.f32 %v7491_v9, %v9619_v39  ;;  %v1111_v11 = vpop.f32.mrb[25].mxu1  ;;  %1580 = vrot.lane.b32.xlu0 %v7491_v9, %s9173_s24 }
 0x3cb   : > { %8242 = vmatprep.subr.bf16.mxu1 %v8241_v8  ;;  %v1163_v12 = vadd.f32 %v9619_v39, %v1111_v11  ;;  %1578 = vrot.lane.b32.xlu1 %v1111_v11, %s9173_s24 }
 0x3cc   : > { %8244 = vmatpush3.bf16.msra.mxu1 %v8241_v8 }
 0x3cd   : > { %v9641_v14 = vpack.c.bf16 %v1164_v10, %v1163_v12  ;;  %v7494_v15 = vpop.f32.mrb[26].mxu1 }
 0x3ce   : > { %v1166_v17 = vadd.f32 %v7494_v15, %v9619_v39  ;;  %v1121_v18 = vpop.f32.mrb[27].mxu1  ;;  %1584 = vrot.lane.b32.xlu0 %v7494_v15, %s9173_s24 }
 0x3cf   : > { %8270 = vmatprep.subr.bf16.mxu1 %v9641_v14  ;;  %v1165_v19 = vadd.f32 %v9619_v39, %v1121_v18  ;;  %1582 = vrot.lane.b32.xlu1 %v1121_v18, %s9173_s24 }
 0x3d1   : > { %v9648_v20 = vpack.c.bf16 %v1166_v17, %v1165_v19  ;;  %v7497_v22 = vpop.f32.mrb[28].mxu1 }
 0x3d2   : > { %v1168_v23 = vadd.f32 %v7497_v22, %v9619_v39  ;;  %v1131_v25 = vpop.f32.mrb[29].mxu1  ;;  %1588 = vrot.lane.b32.xlu0 %v7497_v22, %s9173_s24 }
 0x3d3   : > { %v1167_v26 = vadd.f32 %v9619_v39, %v1131_v25  ;;  %1586 = vrot.lane.b32.xlu1 %v1131_v25, %s9173_s24 }
 0x3d5   : > { %v9654_v27 = vpack.c.bf16 %v1168_v23, %v1167_v26  ;;  %v7500_v28 = vpop.f32.mrb[30].mxu1 }
 0x3d6   : > { %v1170_v30 = vadd.f32 %v7500_v28, %v9619_v39  ;;  %v1141_v31 = vpop.f32.mrb[31].mxu1  ;;  %1592 = vrot.lane.b32.xlu0 %v7500_v28, %s9173_s24 }
 0x3d7   : > { %v1169_v33 = vadd.f32 %v9619_v39, %v1141_v31  ;;  %1590 = vrot.lane.b32.xlu1 %v1141_v31, %s9173_s24 }
 0x3d9   : > { %v9660_v34 = vpack.c.bf16 %v1170_v30, %v1169_v33 }
 0x420   : > { %v1182_v35 = vpop.permute.xlu1 %1181 }
 0x421   : > { %v1180_v36 = vpop.permute.xlu0 %1179 }
 0x422   : > { %v8205_v40 = vpack.c.bf16 %v1182_v35, %v1180_v36  ;;  %7517 = vmatprep.mubr.msk.f32.mxu0 %vm1195_vm1, %v1180_v36 }
 0x424   : > { %8207 = vmatprep.subr.msk.bf16.mxu0 %vm9664_vm2, %v8205_v40 }
 0x425   : > { %8210 = vmatpush3.bf16.xpose.msk.msra.mxu0 %vm9664_vm2, %v8205_v40 }
 0x429   : > { %v1184_v43 = vpop.permute.xlu1 %1183 }
 0x42d   : > { %v1186_v44 = vpop.permute.xlu1 %1185 }
 0x42e   : > { %v8211_v45 = vpack.c.bf16 %v1186_v44, %v1184_v43 }
 0x430   : > { %8213 = vmatprep.subr.msk.bf16.mxu0 %vm9664_vm2, %v8211_v45  ;;  %v1190_v39 = vpop.permute.xlu0 %1189 }
 0x431   : > { %8216 = vmatpush3.bf16.xpose.msk.msra.mxu0 %vm9664_vm2, %v8211_v45  ;;  %v1188_v48 = vpop.permute.xlu1 %1187 }
 0x432   : > { %v8217_v49 = vpack.c.bf16 %v1190_v39, %v1188_v48 }
 0x434   : > { %8219 = vmatprep.subr.msk.bf16.mxu0 %vm9664_vm2, %v8217_v49 }
 0x438   : > { %v1194_v47 = vpop.permute.xlu0 %1193 }
 0x439   : > { %8222 = vmatpush3.bf16.xpose.msk.msra.mxu0 %vm9664_vm2, %v8217_v49  ;;  %v1192_v50 = vpop.permute.xlu1 %1191 }
 0x43a   : > { %v8223_v51 = vpack.c.bf16 %v1194_v47, %v1192_v50 }
 0x43c   : > { %8225 = vmatprep.subr.msk.bf16.mxu0 %vm9664_vm2, %v8223_v51  ;;  %v1581_v54 = vpop.permute.xlu0 %1580 }
 0x43d   : > { %v1579_v55 = vpop.permute.xlu1 %1578 }
 0x43e   : > { %v8245_v56 = vpack.c.bf16 %v1581_v54, %v1579_v55 }
 0x440   : > { %v1585_v57 = vpop.permute.xlu0 %1584 }
 0x441   : > { %8228 = vmatpush3.bf16.xpose.msk.msra.mxu0 %vm9664_vm2, %v8223_v51  ;;  %v1583_v58 = vpop.permute.xlu1 %1582 }
 0x442   : > { %8247 = vmatprep.subr.msk.bf16.mxu0 %vm9664_vm2, %v8245_v56  ;;  %v8251_v59 = vpack.c.bf16 %v1585_v57, %v1583_v58 }
 0x444   : > { %v1589_v62 = vpop.permute.xlu0 %1588 }
 0x445   : > { %v1587_v63 = vpop.permute.xlu1 %1586 }
 0x446   : > { %v8257_v0 = vpack.c.bf16 %v1589_v62, %v1587_v63 }
 0x448   : > { %7518 = vmatmul.mubr.msk.f32.vlgmr.msra.gmra.mrb[16].mxu0 %vm1195_vm1, %v1182_v35  ;;  %v1593_v1 = vpop.permute.xlu0 %1592 }
 0x449   : > { %7520 = vmatprep.mubr.msk.f32.mxu0 %vm1195_vm1, %v1184_v43  ;;  %8250 = vmatpush3.bf16.xpose.msk.msra.mxu0 %vm9664_vm2, %v8245_v56  ;;  %v1591_v2 = vpop.permute.xlu1 %1590 }
 0x44a   : > { %8253 = vmatprep.subr.msk.bf16.mxu0 %vm9664_vm2, %v8251_v59  ;;  %v8263_v3 = vpack.c.bf16 %v1593_v1, %v1591_v2 }
 0x44c   : > { %7521 = vmatmul.mubr.msk.f32.gmra.mrb[18].mxu0 %vm1195_vm1, %v1186_v44 }
 0x44d   : > { %7523 = vmatprep.mubr.msk.f32.mxu0 %vm1195_vm1, %v1188_v48 }
 0x450   : > { %7524 = vmatmul.mubr.msk.f32.gmra.mrb[20].mxu0 %vm1195_vm1, %v1190_v39 }
 0x451   : > { %7526 = vmatprep.mubr.msk.f32.mxu0 %vm1195_vm1, %v1192_v50  ;;  %8256 = vmatpush3.bf16.xpose.msk.msra.mxu0 %vm9664_vm2, %v8251_v59 }
 0x452   : > { %8259 = vmatprep.subr.msk.bf16.mxu0 %vm9664_vm2, %v8257_v0 }
 0x454   : > { %7527 = vmatmul.mubr.msk.f32.gmra.mrb[22].mxu0 %vm1195_vm1, %v1194_v47 }
 0x455   : > { %7573 = vmatprep.mubr.msk.f32.mxu0 %vm1195_vm1, %v1579_v55 }
 0x459   : > { %8262 = vmatpush3.bf16.xpose.msk.msra.mxu0 %vm9664_vm2, %v8257_v0 }
 0x45a   : > { %8265 = vmatprep.subr.msk.bf16.mxu0 %vm9664_vm2, %v8263_v3 }
 0x461   : > { %8268 = vmatpush3.bf16.xpose.msk.msra.mxu0 %vm9664_vm2, %v8263_v3 }
 0x468   : > { %7574 = vmatmul.mubr.msk.f32.vlgmr.msra.gmra.mrb[24].mxu0 %vm1195_vm1, %v1581_v54 }
 0x469   : > { %7576 = vmatprep.mubr.msk.f32.mxu0 %vm1195_vm1, %v1583_v58 }
 0x46c   : > { %7577 = vmatmul.mubr.msk.f32.gmra.mrb[26].mxu0 %vm1195_vm1, %v1585_v57 }
 0x46d   : > { %7579 = vmatprep.mubr.msk.f32.mxu0 %vm1195_vm1, %v1587_v63 }
 0x470   : > { %7580 = vmatmul.mubr.msk.f32.gmra.mrb[28].mxu0 %vm1195_vm1, %v1589_v62 }
 0x471   : > { %7582 = vmatprep.mubr.msk.f32.mxu0 %vm1195_vm1, %v1591_v2 }
 0x474   : > { %7583 = vmatmul.mubr.msk.f32.gmra.mrb[30].mxu0 %vm1195_vm1, %v1593_v1 }
 0x51b   : > { %v7519_v6 = vpop.f32.mrb[16].mxu0 }
 0x51c   : > { %v1278_v7 = vpop.f32.mrb[17].mxu0  ;;  %v1319_v11 = vsel %vm1317_vm3, %v7519_v6, -inf }
 0x51d   : > { %v1318_v17 = vsel %vm1317_vm3, %v1278_v7, -inf }
 0x51f   : > { %v7522_v8 = vpop.f32.mrb[18].mxu0 }
 0x520   : > { %v1288_v9 = vpop.f32.mrb[19].mxu0  ;;  %v1321_v25 = vsel %vm1317_vm3, %v7522_v8, -inf }
 0x521   : > { %v1320_v31 = vsel %vm1317_vm3, %v1288_v9, -inf }
 0x523   : > { %v7525_v10 = vpop.f32.mrb[20].mxu0 }
 0x524   : > { %v1324_v12 = vsel %vm1317_vm3, %v7525_v10, -inf  ;;  %v1298_v15 = vpop.f32.mrb[21].mxu0 }
 0x525   : > { %v1325_v18 = vmax.f32 %v1319_v11, %v1324_v12  ;;  %v1322_v19 = vsel %vm1317_vm3, %v1298_v15, -inf }
 0x526   : > { %v1323_v22 = vmax.f32 %v1318_v17, %v1322_v19 }
 0x527   : > { %v7528_v23 = vpop.f32.mrb[22].mxu0 }
 0x528   : > { %v1330_v26 = vmax.f32 %v1323_v22, %v1325_v18  ;;  %v1328_v28 = vsel %vm1317_vm3, %v7528_v23, -inf  ;;  %v1308_v30 = vpop.f32.mrb[23].mxu0 }
 0x529   : > { %v1329_v33 = vmax.f32 %v1321_v25, %v1328_v28  ;;  %v1326_v35 = vsel %vm1317_vm3, %v1308_v30, -inf }
 0x52a   : > { %v1327_v36 = vmax.f32 %v1320_v31, %v1326_v35 }
 0x52c   : > { %v1331_v40 = vmax.f32 %v1327_v36, %v1329_v33 }
 0x52e   : > { %v1332_v43 = vmax.f32 %v1330_v26, %v1331_v40 }
 0x530   : > { %v1333_v44 = vrot.slane %v1332_v43, 4 }
 0x532   : > { %v1334_v45 = vmax.f32 %v1332_v43, %v1333_v44 }
 0x534   : > { %v1335_v39 = vrot.slane %v1334_v45, 2 }
 0x536   : > { %v1336_v48 = vmax.f32 %v1334_v45, %v1335_v39 }
 0x538   : > { %v1337_v49 = vrot.slane %v1336_v48, 1 }
 0x53a   : > { %v1338_v47 = vmax.f32 %v1336_v48, %v1337_v49 }
 0x53b   : > { %v9724_v50 = vpop.f32.mrb[24].mxu0 }
 0x53c   : > { %v1344_v51 = vsub.f32 %v7525_v10, %v1338_v47  ;;  %v1345_v54 = vsub.f32 %v1308_v30, %v1338_v47  ;;  %v1346_v55 = vsub.f32 %v7528_v23, %v1338_v47  ;;  %v9726_v56 = vpop.f32.mrb[25].mxu0  ;;  %v1339_v57 = vsub.f32 %v1278_v7, %v1338_v47 }
 0x53d   : > { %v1340_v58 = vsub.f32 %v7519_v6, %v1338_v47  ;;  %v1341_v59 = vsub.f32 %v1288_v9, %v1338_v47  ;;  %v1342_v62 = vsub.f32 %v7522_v8, %v1338_v47  ;;  %v1343_v0 = vsub.f32 %v1298_v15, %v1338_v47 }
 0x53e   : > { %v1347_v1 = vmul.f32 1.442695, %v1339_v57  ;;  %v1716_v7 = vsel %vm1317_vm3, %v9724_v50, -inf  ;;  %v1715_v6 = vsel %vm1317_vm3, %v9726_v56, -inf  ;;  %v1357_v15 = vmul.f32 1.442695, %v1344_v51 }
 0x53f   : > { %v9728_v63 = vpop.f32.mrb[26].mxu0  ;;  %v1349_v2 = vmul.f32 1.442695, %v1340_v58  ;;  %v1351_v11 = vmul.f32 1.442695, %v1341_v59 }
 0x540   : > { %v9730_v3 = vpop.f32.mrb[27].mxu0  ;;  %v1353_v12 = vmul.f32 1.442695, %v1342_v62  ;;  %8676 = vpow2.f32 %v1347_v1  ;;  %v1355_v10 = vmul.f32 1.442695, %v1343_v0  ;;  %v1718_v28 = vsel %vm1317_vm3, %v9728_v63, -inf }
 0x541   : > { %8678 = vpow2.f32 %v1349_v2  ;;  %v1359_v23 = vmul.f32 1.442695, %v1345_v54  ;;  %v1361_v26 = vmul.f32 1.442695, %v1346_v55  ;;  %v1717_v35 = vsel %vm1317_vm3, %v9730_v3, -inf }
 0x542   : > { %8680 = vpow2.f32 %v1351_v11 }
 0x543   : > { %v9732_v17 = vpop.f32.mrb[28].mxu0  ;;  %8682 = vpow2.f32 %v1353_v12 }
 0x544   : > { %v1721_v8 = vsel %vm1317_vm3, %v9732_v17, -inf  ;;  %v9740_v9 = vpop.f32.mrb[29].mxu0  ;;  %8684 = vpow2.f32 %v1355_v10 }
 0x545   : > { %v1722_v18 = vmax.f32 %v1716_v7, %v1721_v8  ;;  %v1719_v19 = vsel %vm1317_vm3, %v9740_v9, -inf  ;;  %8686 = vpow2.f32 %v1357_v15 }
 0x546   : > { %v1720_v22 = vmax.f32 %v1715_v6, %v1719_v19  ;;  %8688 = vpow2.f32 %v1359_v23 }
 0x547   : > { %v9744_v25 = vpop.f32.mrb[30].mxu0  ;;  %8690 = vpow2.f32 %v1361_v26 }
 0x548   : > { %v1727_v30 = vmax.f32 %v1720_v22, %v1722_v18  ;;  %v1725_v31 = vsel %vm1317_vm3, %v9744_v25, -inf  ;;  %v9750_v33 = vpop.f32.mrb[31].mxu0 }
 0x549   : > { %v1726_v36 = vmax.f32 %v1718_v28, %v1725_v31  ;;  %v1723_v40 = vsel %vm1317_vm3, %v9750_v33, -inf }
 0x54a   : > { %v1724_v43 = vmax.f32 %v1717_v35, %v1723_v40  ;;  %v9756_v44 = vpop.eup %8676 }
 0x54b   : > { %v9758_v39 = vpop.eup %8678  ;;  %v1363_v48 = vsel %vm1317_vm3, %v9756_v44, 0.0 }
 0x54c   : > { %v1728_v45 = vmax.f32 %v1724_v43, %v1726_v36  ;;  %v9762_v49 = vpop.eup %8680  ;;  %v1364_v51 = vsel %vm1317_vm3, %v9758_v39, 0.0 }
 0x54d   : > { %v9766_v54 = vpop.eup %8682  ;;  %v1365_v55 = vadd.f32 %v1364_v51, %v1363_v48  ;;  %v1366_v58 = vsel %vm1317_vm3, %v9762_v49, 0.0 }
 0x54e   : > { %v1729_v47 = vmax.f32 %v1727_v30, %v1728_v45  ;;  %v9770_v59 = vpop.eup %8684  ;;  %v1368_v1 = vsel %vm1317_vm3, %v9766_v54, 0.0 }
 0x54f   : > { %v1367_v62 = vadd.f32 %v1366_v58, %v1365_v55  ;;  %v9774_v2 = vpop.eup %8686  ;;  %v1370_v10 = vsel %vm1317_vm3, %v9770_v59, 0.0 }
 0x550   : > { %v1730_v57 = vrot.slane %v1729_v47, 4  ;;  %v8689_v7 = vpop.eup %8688  ;;  %v1372_v15 = vsel %vm1317_vm3, %v9774_v2, 0.0 }
 0x551   : > { %v1369_v11 = vadd.f32 %v1368_v1, %v1367_v62  ;;  %v8691_v18 = vpop.eup %8690  ;;  %v1374_v22 = vsel %vm1317_vm3, %v8689_v7, 0.0 }
 0x552   : > { %v1731_v0 = vmax.f32 %v1729_v47, %v1730_v57  ;;  %v1376_v30 = vsel %vm1317_vm3, %v8691_v18, 0.0 }
 0x553   : > { %v1371_v6 = vadd.f32 %v1370_v10, %v1369_v11 }
 0x554   : > { %v1732_v12 = vrot.slane %v1731_v0, 2 }
 0x555   : > { %v1373_v19 = vadd.f32 %v1372_v15, %v1371_v6 }
 0x556   : > { %v1733_v8 = vmax.f32 %v1731_v0, %v1732_v12 }
 0x557   : > { %v1375_v26 = vadd.f32 %v1374_v22, %v1373_v19 }
 0x558   : > { %v1734_v23 = vrot.slane %v1733_v8, 1 }
 0x559   : > { %v1377_v31 = vadd.f32 %v1376_v30, %v1375_v26 }
 0x55a   : > { %v1735_v28 = vmax.f32 %v1733_v8, %v1734_v23 }
 0x55b   : > { %v1378_v45 = vrot.slane %v1377_v31, 4 }
 0x55c   : > { %v1741_v35 = vsub.f32 %v9732_v17, %v1735_v28  ;;  %v1742_v36 = vsub.f32 %v9750_v33, %v1735_v28  ;;  %v1743_v40 = vsub.f32 %v9744_v25, %v1735_v28  ;;  %v1736_v43 = vsub.f32 %v9726_v56, %v1735_v28 }
 0x55d   : > { %v1737_v48 = vsub.f32 %v9724_v50, %v1735_v28  ;;  %v1738_v47 = vsub.f32 %v9730_v3, %v1735_v28  ;;  %v1739_v51 = vsub.f32 %v9728_v63, %v1735_v28  ;;  %v1740_v55 = vsub.f32 %v9740_v9, %v1735_v28 }
 0x55e   : > { %v1379_v57 = vadd.f32 %v1378_v45, %v1377_v31  ;;  %v1744_v58 = vmul.f32 1.442695, %v1736_v43  ;;  %v1754_v11 = vmul.f32 1.442695, %v1741_v35  ;;  %v1756_v3 = vmul.f32 1.442695, %v1742_v36 }
 0x55f   : > { %v1746_v62 = vmul.f32 1.442695, %v1737_v48  ;;  %v1748_v0 = vmul.f32 1.442695, %v1738_v47  ;;  %v1750_v1 = vmul.f32 1.442695, %v1739_v51 }
 0x560   : > { %v1380_v17 = vrot.slane %v1379_v57, 2  ;;  %8692 = vpow2.f32 %v1744_v58  ;;  %v1752_v25 = vmul.f32 1.442695, %v1740_v55  ;;  %v1758_v9 = vmul.f32 1.442695, %v1743_v40 }
 0x561   : > { %8694 = vpow2.f32 %v1746_v62 }
 0x562   : > { %v1381_v33 = vadd.f32 %v1380_v17, %v1379_v57  ;;  %8696 = vpow2.f32 %v1748_v0 }
 0x563   : > { %8698 = vpow2.f32 %v1750_v1 }
 0x564   : > { %v1382_v56 = vrot.slane %v1381_v33, 1 }
 0x566   : > { %v1383_v50 = vadd.f32 %v1382_v56, %v1381_v33 }
 0x568   : > { %8700 = vrcp.f32 %v1383_v50 }
 0x569   : > { %8702 = vpow2.f32 %v1752_v25 }
 0x56a   : > { %v8693_v63 = vpop.eup %8692  ;;  %8704 = vpow2.f32 %v1754_v11 }
 0x56b   : > { %v8695_v12 = vpop.eup %8694  ;;  %v1760_v10 = vsel %vm1317_vm3, %v8693_v63, 0.0  ;;  %8706 = vpow2.f32 %v1756_v3 }
 0x56c   : > { %v8697_v6 = vpop.eup %8696  ;;  %v1761_v8 = vsel %vm1317_vm3, %v8695_v12, 0.0  ;;  %8708 = vpow2.f32 %v1758_v9 }
 0x56d   : > { %v8699_v15 = vpop.eup %8698  ;;  %v1762_v19 = vadd.f32 %v1761_v8, %v1760_v10  ;;  %v1763_v22 = vsel %vm1317_vm3, %v8697_v6, 0.0 }
 0x56e   : > { %v1765_v26 = vsel %vm1317_vm3, %v8699_v15, 0.0 }
 0x56f   : > { %v1764_v23 = vadd.f32 %v1763_v22, %v1762_v19 }
 0x571   : > { %v1766_v30 = vadd.f32 %v1765_v26, %v1764_v23 }
 0x572   : > { %v8701_v28 = vpop.eup %8700 }
 0x573   : > { %v8703_v31 = vpop.eup %8702  ;;  %v9795_v35 = vmul.f32 %v8701_v28, %v9758_v39  ;;  %v9798_v36 = vmul.f32 %v8701_v28, %v9756_v44  ;;  %v9801_v40 = vmul.f32 %v8701_v28, %v9762_v49  ;;  %v9804_v43 = vmul.f32 %v8701_v28, %v9766_v54 }
 0x574   : > { %v9807_v45 = vmul.f32 %v8701_v28, %v9770_v59  ;;  %v9810_v48 = vmul.f32 %v8701_v28, %v9774_v2  ;;  %v9812_v47 = vmul.f32 %v8701_v28, %v8689_v7  ;;  %v9814_v51 = vmul.f32 %v8701_v28, %v8691_v18  ;;  %v8705_v39 = vpop.eup %8704 }
 0x575   : > { %v1396_v44 = vsel %vm1317_vm3, %v9795_v35, 0.0  ;;  %v1393_v49 = vsel %vm1317_vm3, %v9798_v36, 0.0  ;;  %v1767_v54 = vsel %vm1317_vm3, %v8703_v31, 0.0  ;;  %v8707_v59 = vpop.eup %8706  ;;  %v1769_v2 = vsel %vm1317_vm3, %v8705_v39, 0.0 }
 0x576   : > { %1397 = vadd.xlane.f32.xlu0 %v1396_v44  ;;  %1394 = vadd.xlane.f32.xlu1 %v1393_v49  ;;  %v1768_v55 = vadd.f32 %v1767_v54, %v1766_v30  ;;  %v8709_v57 = vpop.eup %8708  ;;  %v1399_v7 = vsel %vm1317_vm3, %v9801_v40, 0.0  ;;  %v1402_v18 = vsel %vm1317_vm3, %v9804_v43, 0.0  ;;  %v1771_v62 = vsel %vm1317_vm3, %v8707_v59, 0.0 }
 0x577   : > { %v1773_v17 = vsel %vm1317_vm3, %v8709_v57, 0.0  ;;  %v1405_v1 = vsel %vm1317_vm3, %v9807_v45, 0.0  ;;  %v1408_v33 = vsel %vm1317_vm3, %v9810_v48, 0.0  ;;  %v1411_v50 = vsel %vm1317_vm3, %v9812_v47, 0.0 }
 0x578   : > { %v1770_v58 = vadd.f32 %v1769_v2, %v1768_v55  ;;  %v1414_v11 = vsel %vm1317_vm3, %v9814_v51, 0.0 }
 0x57a   : > { %1400 = vadd.xlane.f32.xlu0 %v1399_v7  ;;  %1403 = vadd.xlane.f32.xlu1 %v1402_v18  ;;  %v1772_v0 = vadd.f32 %v1771_v62, %v1770_v58 }
 0x57c   : > { %v1774_v56 = vadd.f32 %v1773_v17, %v1772_v0 }
 0x57e   : > { %1406 = vadd.xlane.f32.xlu0 %v1405_v1  ;;  %1409 = vadd.xlane.f32.xlu1 %v1408_v33  ;;  %v1775_v25 = vrot.slane %v1774_v56, 4 }
 0x580   : > { %v1776_v3 = vadd.f32 %v1775_v25, %v1774_v56 }
 0x582   : > { %1412 = vadd.xlane.f32.xlu0 %v1411_v50  ;;  %1415 = vadd.xlane.f32.xlu1 %v1414_v11  ;;  %v1777_v9 = vrot.slane %v1776_v3, 2 }
 0x584   : > { %v1778_v10 = vadd.f32 %v1777_v9, %v1776_v3 }
 0x586   : > { %v1779_v8 = vrot.slane %v1778_v10, 1 }
 0x588   : > { %v1780_v19 = vadd.f32 %v1779_v8, %v1778_v10 }
 0x58a   : > { %8710 = vrcp.f32 %v1780_v19 }
 0x594   : > { %v8711_v22 = vpop.eup %8710 }
 0x595   : > { %v9836_v23 = vmul.f32 %v8711_v22, %v8695_v12  ;;  %v9838_v26 = vmul.f32 %v8711_v22, %v8693_v63  ;;  %v9840_v28 = vmul.f32 %v8711_v22, %v8699_v15  ;;  %v9842_v30 = vmul.f32 %v8711_v22, %v8697_v6 }
 0x596   : > { %v9844_v44 = vmul.f32 %v8711_v22, %v8705_v39  ;;  %v9846_v49 = vmul.f32 %v8711_v22, %v8703_v31  ;;  %v9848_v54 = vmul.f32 %v8711_v22, %v8709_v57  ;;  %v9850_v55 = vmul.f32 %v8711_v22, %v8707_v59 }
 0x597   : > { %v1793_v2 = vsel %vm1317_vm3, %v9836_v23, 0.0  ;;  %v1790_v12 = vsel %vm1317_vm3, %v9838_v26, 0.0  ;;  %v1799_v63 = vsel %vm1317_vm3, %v9840_v28, 0.0  ;;  %v1796_v6 = vsel %vm1317_vm3, %v9842_v30, 0.0 }
 0x598   : > { %1794 = vadd.xlane.f32.xlu1 %v1793_v2  ;;  %1791 = vadd.xlane.f32.xlu0 %v1790_v12  ;;  %v1805_v15 = vsel %vm1317_vm3, %v9844_v44, 0.0  ;;  %v1802_v31 = vsel %vm1317_vm3, %v9846_v49, 0.0  ;;  %v1811_v39 = vsel %vm1317_vm3, %v9848_v54, 0.0  ;;  %v1808_v59 = vsel %vm1317_vm3, %v9850_v55, 0.0 }
 0x59c   : > { %1800 = vadd.xlane.f32.xlu1 %v1799_v63  ;;  %1797 = vadd.xlane.f32.xlu0 %v1796_v6 }
 0x5a0   : > { %1806 = vadd.xlane.f32.xlu1 %v1805_v15  ;;  %1803 = vadd.xlane.f32.xlu0 %v1802_v31 }
 0x5a4   : > { %1812 = vadd.xlane.f32.xlu1 %v1811_v39  ;;  %1809 = vadd.xlane.f32.xlu0 %v1808_v59 }
 0x603   : > { %v1398_v57 = vpop.xlane.xlu0 %1397  ;;  %v1395_v7 = vpop.xlane.xlu1 %1394 }
 0x604   : > { %v1418_v18 = vadd.f32 1e-09, %v1398_v57  ;;  %v1417_v58 = vadd.f32 1e-09, %v1395_v7 }
 0x606   : > { %8712 = vrcp.f32 %v1418_v18 }
 0x607   : > { %8714 = vrcp.f32 %v1417_v58  ;;  %v1401_v62 = vpop.xlane.xlu0 %1400  ;;  %v1404_v0 = vpop.xlane.xlu1 %1403 }
 0x608   : > { %v1419_v17 = vadd.f32 1e-09, %v1401_v62  ;;  %v1420_v1 = vadd.f32 1e-09, %v1404_v0 }
 0x60a   : > { %8716 = vrcp.f32 %v1419_v17 }
 0x60b   : > { %8718 = vrcp.f32 %v1420_v1  ;;  %v1407_v33 = vpop.xlane.xlu0 %1406  ;;  %v1410_v56 = vpop.xlane.xlu1 %1409 }
 0x60c   : > { %v1421_v25 = vadd.f32 1e-09, %v1407_v33  ;;  %v1422_v50 = vadd.f32 1e-09, %v1410_v56 }
 0x60e   : > { %8720 = vrcp.f32 %v1421_v25  ;;  %v1985_v25 = vld [vmem:[#allocation8 + $0x10] sm:$0xff] }
 0x60f   : > { %8722 = vrcp.f32 %v1422_v50  ;;  %v1413_v11 = vpop.xlane.xlu0 %1412  ;;  %v1416_v3 = vpop.xlane.xlu1 %1415  ;;  %v1986_v50 = vld [vmem:[#allocation8 + $0x18] sm:$0xff] }
 0x610   : > { %v8713_v9 = vpop.eup %8712  ;;  %v1423_v10 = vadd.f32 1e-09, %v1413_v11  ;;  %v1424_v8 = vadd.f32 1e-09, %v1416_v3 }
 0x611   : > { %v8715_v19 = vpop.eup %8714  ;;  %v1434_v22 = vmul.f32 %v8713_v9, %v9795_v35 }
 0x612   : > { %8724 = vrcp.f32 %v1423_v10  ;;  %v1433_v2 = vmul.f32 %v8715_v19, %v9798_v36 }
 0x613   : > { %8726 = vrcp.f32 %v1424_v8 }
 0x614   : > { %v8717_v12 = vpop.eup %8716  ;;  %7545 = vmatprep.mubr.msk.f32.mxu1 %vm1317_vm3, %v1433_v2 }
 0x615   : > { %v8719_v63 = vpop.eup %8718  ;;  %7546 = vmatmul.mubr.msk.f32.vlgmr.msra.gmra.mrb[32].mxu1 %vm1317_vm3, %v1434_v22  ;;  %v1435_v6 = vmul.f32 %v8717_v12, %v9801_v40  ;;  %v1983_v40 = vld [vmem:[#allocation8] sm:$0xff]  ;;  %v8289_v22 = vpack.c.bf16 %v1986_v50, %v1985_v25 }
 0x616   : > { %8272 = vmatpush3.bf16.msra.mxu1 %v9641_v14  ;;  %v1436_v15 = vmul.f32 %v8719_v63, %v9804_v43  ;;  %v1984_v43 = vld [vmem:[#allocation8 + $0x8] sm:$0xff] }
 0x617   : > { %8274 = vmatprep.subr.bf16.mxu1 %v9648_v20  ;;  %7548 = vmatprep.mubr.msk.f32.mxu1 %vm1317_vm3, %v1435_v6 }
 0x618   : > { %v8721_v35 = vpop.eup %8720 }
 0x619   : > { %v8723_v31 = vpop.eup %8722  ;;  %7549 = vmatmul.mubr.msk.f32.gmra.mrb[34].mxu1 %vm1317_vm3, %v1436_v15  ;;  %v1437_v36 = vmul.f32 %v8721_v35, %v9807_v45 }
 0x61a   : > { %8276 = vmatpush3.bf16.msra.mxu1 %v9648_v20  ;;  %v1438_v39 = vmul.f32 %v8723_v31, %v9810_v48  ;;  %v8285_v20 = vpack.c.bf16 %v1984_v43, %v1983_v40 }
 0x61b   : > { %8278 = vmatprep.subr.bf16.mxu1 %v9654_v27  ;;  %7551 = vmatprep.mubr.msk.f32.mxu1 %vm1317_vm3, %v1437_v36 }
 0x61c   : > { %v8725_v14 = vpop.eup %8724 }
 0x61d   : > { %v8727_v59 = vpop.eup %8726  ;;  %7552 = vmatmul.mubr.msk.f32.gmra.mrb[36].mxu1 %vm1317_vm3, %v1438_v39  ;;  %v1439_v57 = vmul.f32 %v8725_v14, %v9812_v47  ;;  %v2260_v39 = vld [vmem:[#allocation7 + $0x20] sm:$0xff]  ;;  %v2261_v14 = vld [vmem:[#allocation7 + $0x28] sm:$0xff] }
 0x61e   : > { %8280 = vmatpush3.bf16.msra.mxu1 %v9654_v27  ;;  %v1440_v45 = vmul.f32 %v8727_v59, %v9814_v51 }
 0x61f   : > { %8282 = vmatprep.subr.bf16.mxu1 %v9660_v34  ;;  %7554 = vmatprep.mubr.msk.f32.mxu1 %vm1317_vm3, %v1439_v57 }
 0x621   : > { %7555 = vmatmul.mubr.msk.f32.gmra.mrb[38].mxu1 %vm1317_vm3, %v1440_v45 }
 0x622   : > { %8284 = vmatpush3.bf16.msra.mxu1 %v9660_v34 }
 0x623   : > { %8286 = vmatprep.subr.bf16.mxu1 %v8285_v20 }
 0x625   : > { %v1792_v48 = vpop.xlane.xlu0 %1791  ;;  %v1795_v7 = vpop.xlane.xlu1 %1794 }
 0x626   : > { %v1814_v18 = vadd.f32 1e-09, %v1792_v48  ;;  %v1815_v58 = vadd.f32 1e-09, %v1795_v7 }
 0x628   : > { %8728 = vrcp.f32 %v1814_v18 }
 0x629   : > { %8730 = vrcp.f32 %v1815_v58  ;;  %v1798_v47 = vpop.xlane.xlu0 %1797  ;;  %v1801_v27 = vpop.xlane.xlu1 %1800 }
 0x62a   : > { %v1816_v62 = vadd.f32 1e-09, %v1798_v47  ;;  %v1817_v51 = vadd.f32 1e-09, %v1801_v27 }
 0x62c   : > { %8732 = vrcp.f32 %v1816_v62 }
 0x62d   : > { %8734 = vrcp.f32 %v1817_v51  ;;  %v1804_v0 = vpop.xlane.xlu0 %1803  ;;  %v1807_v17 = vpop.xlane.xlu1 %1806 }
 0x62e   : > { %v1818_v1 = vadd.f32 1e-09, %v1804_v0  ;;  %v1819_v33 = vadd.f32 1e-09, %v1807_v17 }
 0x630   : > { %8736 = vrcp.f32 %v1818_v1 }
 0x631   : > { %8738 = vrcp.f32 %v1819_v33  ;;  %v1810_v34 = vpop.xlane.xlu0 %1809  ;;  %v1813_v56 = vpop.xlane.xlu1 %1812 }
 0x632   : > { %v8729_v11 = vpop.eup %8728  ;;  %v1820_v3 = vadd.f32 1e-09, %v1810_v34  ;;  %v1821_v9 = vadd.f32 1e-09, %v1813_v56 }
 0x633   : > { %v8731_v10 = vpop.eup %8730  ;;  %v1830_v8 = vmul.f32 %v8729_v11, %v9838_v26 }
 0x634   : > { %v1831_v19 = vmul.f32 %v8731_v10, %v9836_v23  ;;  %8740 = vrcp.f32 %v1820_v3 }
 0x635   : > { %8742 = vrcp.f32 %v1821_v9  ;;  %7601 = vmatprep.mubr.msk.f32.mxu1 %vm1317_vm3, %v1830_v8 }
 0x636   : > { %v8733_v2 = vpop.eup %8732  ;;  %7602 = vmatmul.mubr.msk.f32.vlgmr.msra.gmra.mrb[40].mxu1 %vm1317_vm3, %v1831_v19 }
 0x637   : > { %v8735_v12 = vpop.eup %8734  ;;  %v1832_v63 = vmul.f32 %v8733_v2, %v9842_v30  ;;  %8288 = vmatpush3.bf16.msra.mxu1 %v8285_v20  ;;  %v2262_v2 = vld [vmem:[#allocation7 + $0x30] sm:$0xff] }
 0x638   : > { %v1833_v6 = vmul.f32 %v8735_v12, %v9840_v28  ;;  %8290 = vmatprep.subr.bf16.mxu1 %v8289_v22  ;;  %v2263_v12 = vld [vmem:[#allocation7 + $0x38] sm:$0xff] }
 0x639   : > { %7604 = vmatprep.mubr.msk.f32.mxu1 %vm1317_vm3, %v1832_v63  ;;  %v8297_v63 = vpack.c.bf16 %v2263_v12, %v2262_v2 }
 0x63a   : > { %v8737_v26 = vpop.eup %8736  ;;  %7605 = vmatmul.mubr.msk.f32.gmra.mrb[42].mxu1 %vm1317_vm3, %v1833_v6  ;;  %v9939_v6 = vld [vmem:[#allocation10 + $0x8] ss:$0 sm:$0xff] }
 0x63b   : > { %v8739_v23 = vpop.eup %8738  ;;  %v1834_v15 = vmul.f32 %v8737_v26, %v9846_v49  ;;  %8292 = vmatpush3.bf16.msra.mxu1 %v8289_v22  ;;  %v8293_v49 = vpack.c.bf16 %v2261_v14, %v2260_v39 }
 0x63c   : > { %v1835_v35 = vmul.f32 %v8739_v23, %v9844_v44  ;;  %v9941_v23 = vld [vmem:[#allocation10 + $0xc] ss:$0 sm:$0xff] }
 0x63d   : > { %7607 = vmatprep.mubr.msk.f32.mxu1 %vm1317_vm3, %v1834_v15  ;;  %8294 = vmatprep.subr.bf16.mxu0 %v8293_v49 }
 0x63e   : > { %v8741_v31 = vpop.eup %8740  ;;  %7608 = vmatmul.mubr.msk.f32.gmra.mrb[44].mxu1 %vm1317_vm3, %v1835_v35  ;;  %8296 = vmatpush3.bf16.msra.mxu0 %v8293_v49 }
 0x63f   : > { %v8743_v30 = vpop.eup %8742  ;;  %v1836_v28 = vmul.f32 %v8741_v31, %v9850_v55  ;;  %8298 = vmatprep.subr.bf16.mxu0 %v8297_v63  ;;  %v9944_v31 = vld [vmem:[#allocation10 + $0x10] ss:$0 sm:$0xff] }
 0x640   : > { %v1837_v36 = vmul.f32 %v8743_v30, %v9848_v54 }
 0x641   : > { %7610 = vmatprep.mubr.msk.f32.mxu1 %vm1317_vm3, %v1836_v28 }
 0x642   : > { %7611 = vmatmul.mubr.msk.f32.gmra.mrb[46].mxu1 %vm1317_vm3, %v1837_v36  ;;  %8300 = vmatpush3.bf16.msra.mxu0 %v8297_v63 }
 0x6e8   : > { %v7547_v44 = vpop.f32.mrb[32].mxu1 }
 0x6e9   : > { %v1531_v40 = vpop.f32.mrb[33].mxu1  ;;  %v1968_v59 = vsub.f32 %v9529_v53, %v7547_v44 }
 0x6ea   : > { %v1967_v43 = vsub.f32 %v9527_v52, %v1531_v40 }
 0x6ec   : > { %v7550_v57 = vpop.f32.mrb[34].mxu1  ;;  %7621 = vmatprep.mubr.msk.f32.mxu1 %vm348_vm0, %v1967_v43 }
 0x6ed   : > { %v1541_v55 = vpop.f32.mrb[35].mxu1  ;;  %7622 = vmatmul.mubr.msk.f32.vlgmr.msra.gmra.mrb[48].mxu1 %vm348_vm0, %v1968_v59  ;;  %v1970_v45 = vsub.f32 %v9541_v61, %v7550_v57 }
 0x6ee   : > { %v1969_v54 = vsub.f32 %v9539_v60, %v1541_v55 }
 0x6f0   : > { %v7553_v20 = vpop.f32.mrb[36].mxu1  ;;  %7624 = vmatprep.mubr.msk.f32.mxu1 %vm348_vm0, %v1969_v54 }
 0x6f1   : > { %v1551_v48 = vpop.f32.mrb[37].mxu1  ;;  %7625 = vmatmul.mubr.msk.f32.gmra.mrb[50].mxu1 %vm348_vm0, %v1970_v45  ;;  %v1972_v18 = vsub.f32 %v9551_v4, %v7553_v20 }
 0x6f2   : > { %v1971_v7 = vsub.f32 %v9553_v5, %v1551_v48 }
 0x6f4   : > { %v7556_v58 = vpop.f32.mrb[38].mxu1  ;;  %7627 = vmatprep.mubr.msk.f32.mxu1 %vm348_vm0, %v1971_v7 }
 0x6f5   : > { %v1561_v47 = vpop.f32.mrb[39].mxu1  ;;  %7628 = vmatmul.mubr.msk.f32.gmra.mrb[52].mxu1 %vm348_vm0, %v1972_v18  ;;  %v1974_v62 = vsub.f32 %v9563_v13, %v7556_v58 }
 0x6f6   : > { %v1973_v27 = vsub.f32 %v9566_v16, %v1561_v47 }
 0x6f8   : > { %7630 = vmatprep.mubr.msk.f32.mxu1 %vm348_vm0, %v1973_v27 }
 0x6f9   : > { %7631 = vmatmul.mubr.msk.f32.gmra.mrb[54].mxu1 %vm348_vm0, %v1974_v62 }
 0x709   : > { %v7603_v51 = vpop.f32.mrb[40].mxu1 }
 0x70a   : > { %v1928_v0 = vpop.f32.mrb[41].mxu1  ;;  %v1976_v1 = vsub.f32 %v9573_v21, %v7603_v51 }
 0x70b   : > { %v1975_v17 = vsub.f32 %v9578_v24, %v1928_v0 }
 0x70d   : > { %v7606_v33 = vpop.f32.mrb[42].mxu1  ;;  %7633 = vmatprep.mubr.msk.f32.mxu1 %vm348_vm0, %v1975_v17 }
 0x70e   : > { %v1938_v34 = vpop.f32.mrb[43].mxu1  ;;  %7634 = vmatmul.mubr.msk.f32.gmra.mrb[56].mxu1 %vm348_vm0, %v1976_v1  ;;  %v1978_v25 = vsub.f32 %v9585_v29, %v7606_v33 }
 0x70f   : > { %v1977_v56 = vsub.f32 %v9590_v32, %v1938_v34 }
 0x711   : > { %v7609_v50 = vpop.f32.mrb[44].mxu1  ;;  %7636 = vmatprep.mubr.msk.f32.mxu1 %vm348_vm0, %v1977_v56 }
 0x712   : > { %v1948_v11 = vpop.f32.mrb[45].mxu1  ;;  %7637 = vmatmul.mubr.msk.f32.gmra.mrb[58].mxu1 %vm348_vm0, %v1978_v25  ;;  %v1980_v9 = vsub.f32 %v9597_v37, %v7609_v50 }
 0x713   : > { %v1979_v3 = vsub.f32 %v9602_v42, %v1948_v11 }
 0x715   : > { %v7612_v10 = vpop.f32.mrb[46].mxu1  ;;  %7639 = vmatprep.mubr.msk.f32.mxu1 %vm348_vm0, %v1979_v3 }
 0x716   : > { %v1958_v8 = vpop.f32.mrb[47].mxu1  ;;  %7640 = vmatmul.mubr.msk.f32.gmra.mrb[60].mxu1 %vm348_vm0, %v1980_v9  ;;  %v1982_v22 = vsub.f32 %v9609_v46, %v7612_v10 }
 0x717   : > { %v1981_v19 = vsub.f32 %v9613_v41, %v1958_v8 }
 0x719   : > { %7642 = vmatprep.mubr.msk.f32.mxu1 %vm348_vm0, %v1981_v19 }
 0x71a   : > { %7643 = vmatmul.mubr.msk.f32.gmra.mrb[62].mxu1 %vm348_vm0, %v1982_v22 }
 0x7c0   : > { %v7623_v26 = vpop.f32.mrb[48].mxu1 }
 0x7c1   : > { %v2112_v15 = vadd.f32 %v7623_v26, %v9939_v6  ;;  %v2106_v35 = vpop.f32.mrb[49].mxu1 }
 0x7c2   : > { %v2107_v30 = vadd.f32 %v9939_v6, %v2106_v35 }
 0x7c3   : > { %v2191_v28 = vmul.f32 %v9941_v23, %v2112_v15 }
 0x7c4   : > { %v2190_v36 = vmul.f32 %v9941_v23, %v2107_v30  ;;  %v7626_v39 = vpop.f32.mrb[50].mxu1 }
 0x7c5   : > { %v2212_v14 = vadd.f32 %v9944_v31, %v2191_v28  ;;  %v2122_v49 = vadd.f32 %v7626_v39, %v9939_v6  ;;  %v2116_v44 = vpop.f32.mrb[51].mxu1 }
 0x7c6   : > { %v2211_v40 = vadd.f32 %v9944_v31, %v2190_v36  ;;  %v2117_v43 = vadd.f32 %v9939_v6, %v2116_v44 }
 0x7c7   : > { %v2228_v59 = vmax.f32 %v2212_v14, 0.0  ;;  %v2193_v57 = vmul.f32 %v9941_v23, %v2122_v49 }
 0x7c8   : > { %v2227_v55 = vmax.f32 %v2211_v40, 0.0  ;;  %v2192_v54 = vmul.f32 %v9941_v23, %v2117_v43  ;;  %v7629_v45 = vpop.f32.mrb[52].mxu1 }
 0x7c9   : > { %v2214_v20 = vadd.f32 %v9944_v31, %v2193_v57  ;;  %v2132_v48 = vadd.f32 %v7629_v45, %v9939_v6  ;;  %v2126_v7 = vpop.f32.mrb[53].mxu1  ;;  %v9963_v27 = vadd.f32 %v2228_v59, %v9529_v53 }
 0x7ca   : > { %v9958_v18 = vadd.f32 %v2227_v55, %v9527_v52  ;;  %v2213_v58 = vadd.f32 %v9944_v31, %v2192_v54  ;;  %v2127_v47 = vadd.f32 %v9939_v6, %v2126_v7 }
 0x7cb   : > { %11658 = vst [vmem:[#allocation17_spill] sm:$0xff] %v9963_v27  ;;  %v2230_v62 = vmax.f32 %v2214_v20, 0.0  ;;  %v2195_v51 = vmul.f32 %v9941_v23, %v2132_v48 }
 0x7cc   : > { %11657 = vst [vmem:[#allocation16_spill] sm:$0xff] %v9958_v18  ;;  %v2229_v0 = vmax.f32 %v2213_v58, 0.0  ;;  %v2194_v17 = vmul.f32 %v9941_v23, %v2127_v47  ;;  %v7632_v1 = vpop.f32.mrb[54].mxu1  ;;  %7653 = vmatprep.mubr.msk.f32.mxu0 %vm348_vm0, %v9958_v18 }
 0x7cd   : > { %v2216_v52 = vadd.f32 %v9944_v31, %v2195_v51  ;;  %v2142_v33 = vadd.f32 %v7632_v1, %v9939_v6  ;;  %v2136_v34 = vpop.f32.mrb[55].mxu1  ;;  %7654 = vmatmul.mubr.msk.f32.vlgmr.msra.gmra.mrb[32].mxu0 %vm348_vm0, %v9963_v27  ;;  %v9979_v50 = vadd.f32 %v2230_v62, %v9541_v61 }
 0x7ce   : > { %v9974_v53 = vadd.f32 %v2229_v0, %v9539_v60  ;;  %v2215_v56 = vadd.f32 %v9944_v31, %v2194_v17  ;;  %v2137_v25 = vadd.f32 %v9939_v6, %v2136_v34 }
 0x7cf   : > { %11660 = vst [vmem:[#allocation19_spill] sm:$0xff] %v9979_v50  ;;  %v2232_v11 = vmax.f32 %v2216_v52, 0.0  ;;  %v2197_v3 = vmul.f32 %v9941_v23, %v2142_v33 }
 0x7d0   : > { %11659 = vst [vmem:[#allocation18_spill] sm:$0xff] %v9974_v53  ;;  %v2231_v9 = vmax.f32 %v2215_v56, 0.0  ;;  %v2196_v10 = vmul.f32 %v9941_v23, %v2137_v25  ;;  %7656 = vmatprep.mubr.msk.f32.mxu0 %vm348_vm0, %v9974_v53 }
 0x7d1   : > { %v2218_v8 = vadd.f32 %v9944_v31, %v2197_v3  ;;  %7657 = vmatmul.mubr.msk.f32.gmra.mrb[34].mxu0 %vm348_vm0, %v9979_v50  ;;  %v9993_v19 = vadd.f32 %v2232_v11, %v9551_v4 }
 0x7d2   : > { %v9989_v60 = vadd.f32 %v2231_v9, %v9553_v5  ;;  %v2217_v61 = vadd.f32 %v9944_v31, %v2196_v10 }
 0x7d3   : > { %11662 = vst [vmem:[#allocation21_spill] sm:$0xff] %v9993_v19  ;;  %v2234_v22 = vmax.f32 %v2218_v8, 0.0 }
 0x7d4   : > { %11661 = vst [vmem:[#allocation20_spill] sm:$0xff] %v9989_v60  ;;  %v2233_v2 = vmax.f32 %v2217_v61, 0.0  ;;  %7659 = vmatprep.mubr.msk.f32.mxu0 %vm348_vm0, %v9989_v60 }
 0x7d5   : > { %7660 = vmatmul.mubr.msk.f32.gmra.mrb[36].mxu0 %vm348_vm0, %v9993_v19  ;;  %v10003_v63 = vadd.f32 %v2234_v22, %v9563_v13 }
 0x7d6   : > { %v10000_v12 = vadd.f32 %v2233_v2, %v9566_v16 }
 0x7d7   : > { %11664 = vst [vmem:[#allocation23_spill] sm:$0xff] %v10003_v63 }
 0x7d8   : > { %11663 = vst [vmem:[#allocation22_spill] sm:$0xff] %v10000_v12  ;;  %7662 = vmatprep.mubr.msk.f32.mxu0 %vm348_vm0, %v10000_v12 }
 0x7d9   : > { %7663 = vmatmul.mubr.msk.f32.gmra.mrb[38].mxu0 %vm348_vm0, %v10003_v63 }
 0x7e1   : > { %v7635_v4 = vpop.f32.mrb[56].mxu1 }
 0x7e2   : > { %v2152_v5 = vadd.f32 %v7635_v4, %v9939_v6  ;;  %v2146_v26 = vpop.f32.mrb[57].mxu1 }
 0x7e3   : > { %v2147_v15 = vadd.f32 %v9939_v6, %v2146_v26 }
 0x7e4   : > { %v2199_v35 = vmul.f32 %v9941_v23, %v2152_v5 }
 0x7e5   : > { %v2198_v16 = vmul.f32 %v9941_v23, %v2147_v15  ;;  %v7638_v30 = vpop.f32.mrb[58].mxu1 }
 0x7e6   : > { %v2220_v13 = vadd.f32 %v9944_v31, %v2199_v35  ;;  %v2162_v28 = vadd.f32 %v7638_v30, %v9939_v6  ;;  %v2156_v36 = vpop.f32.mrb[59].mxu1 }
 0x7e7   : > { %v2219_v39 = vadd.f32 %v9944_v31, %v2198_v16  ;;  %v2157_v14 = vadd.f32 %v9939_v6, %v2156_v36 }
 0x7e8   : > { %v2236_v49 = vmax.f32 %v2220_v13, 0.0  ;;  %v2201_v44 = vmul.f32 %v9941_v23, %v2162_v28 }
 0x7e9   : > { %v2235_v40 = vmax.f32 %v2219_v39, 0.0  ;;  %v2200_v43 = vmul.f32 %v9941_v23, %v2157_v14  ;;  %v7641_v59 = vpop.f32.mrb[60].mxu1 }
 0x7ea   : > { %v2222_v57 = vadd.f32 %v9944_v31, %v2201_v44  ;;  %v2172_v55 = vadd.f32 %v7641_v59, %v9939_v6  ;;  %v2166_v54 = vpop.f32.mrb[61].mxu1  ;;  %v10027_v7 = vadd.f32 %v2236_v49, %v9573_v21 }
 0x7eb   : > { %v10022_v45 = vadd.f32 %v2235_v40, %v9578_v24  ;;  %v2221_v20 = vadd.f32 %v9944_v31, %v2200_v43  ;;  %v2167_v48 = vadd.f32 %v9939_v6, %v2166_v54 }
 0x7ec   : > { %11666 = vst [vmem:[#allocation25_spill] sm:$0xff] %v10027_v7  ;;  %v2238_v58 = vmax.f32 %v2222_v57, 0.0  ;;  %v2203_v47 = vmul.f32 %v9941_v23, %v2172_v55 }
 0x7ed   : > { %11665 = vst [vmem:[#allocation24_spill] sm:$0xff] %v10022_v45  ;;  %v2237_v62 = vmax.f32 %v2221_v20, 0.0  ;;  %v2202_v51 = vmul.f32 %v9941_v23, %v2167_v48  ;;  %v7644_v0 = vpop.f32.mrb[62].mxu1  ;;  %7665 = vmatprep.mubr.msk.f32.mxu0 %vm348_vm0, %v10022_v45 }
 0x7ee   : > { %v2224_v24 = vadd.f32 %v9944_v31, %v2203_v47  ;;  %v2182_v17 = vadd.f32 %v7644_v0, %v9939_v6  ;;  %v2176_v1 = vpop.f32.mrb[63].mxu1  ;;  %7666 = vmatmul.mubr.msk.f32.gmra.mrb[40].mxu0 %vm348_vm0, %v10027_v7  ;;  %v10043_v34 = vadd.f32 %v2238_v58, %v9585_v29 }
 0x7ef   : > { %v10038_v21 = vadd.f32 %v2237_v62, %v9590_v32  ;;  %v2223_v52 = vadd.f32 %v9944_v31, %v2202_v51  ;;  %v2177_v33 = vadd.f32 %v9939_v6, %v2176_v1 }
 0x7f0   : > { %11668 = vst [vmem:[#allocation27_spill] sm:$0xff] %v10043_v34  ;;  %v2240_v56 = vmax.f32 %v2224_v24, 0.0  ;;  %v2205_v25 = vmul.f32 %v9941_v23, %v2182_v17 }
 0x7f1   : > { %11667 = vst [vmem:[#allocation26_spill] sm:$0xff] %v10038_v21  ;;  %v2239_v11 = vmax.f32 %v2223_v52, 0.0  ;;  %v2204_v3 = vmul.f32 %v9941_v23, %v2177_v33  ;;  %7668 = vmatprep.mubr.msk.f32.mxu0 %vm348_vm0, %v10038_v21 }
 0x7f2   : > { %v2226_v9 = vadd.f32 %v9944_v31, %v2205_v25  ;;  %7669 = vmatmul.mubr.msk.f32.gmra.mrb[42].mxu0 %vm348_vm0, %v10043_v34  ;;  %v10057_v6 = vadd.f32 %v2240_v56, %v9597_v37  ;;  %v10073_v37 = vld [vmem:[#allocation10 + $0x5] ss:$0 sm:$0xff] }
 0x7f3   : > { %v10053_v32 = vadd.f32 %v2239_v11, %v9602_v42  ;;  %v2225_v29 = vadd.f32 %v9944_v31, %v2204_v3 }
 0x7f4   : > { %11670 = vst [vmem:[#allocation29_spill] sm:$0xff] %v10057_v6  ;;  %v2242_v10 = vmax.f32 %v2226_v9, 0.0 }
 0x7f5   : > { %11669 = vst [vmem:[#allocation28_spill] sm:$0xff] %v10053_v32  ;;  %v2241_v8 = vmax.f32 %v2225_v29, 0.0  ;;  %7671 = vmatprep.mubr.msk.f32.mxu0 %vm348_vm0, %v10053_v32 }
 0x7f6   : > { %7672 = vmatmul.mubr.msk.f32.gmra.mrb[44].mxu0 %vm348_vm0, %v10057_v6  ;;  %v10067_v61 = vadd.f32 %v2242_v10, %v9609_v46 }
 0x7f7   : > { %v10064_v23 = vadd.f32 %v2241_v8, %v9613_v41 }
 0x7f8   : > { %11672 = vst [vmem:[#allocation31_spill] sm:$0xff] %v10067_v61 }
 0x7f9   : > { %11671 = vst [vmem:[#allocation30_spill] sm:$0xff] %v10064_v23  ;;  %7674 = vmatprep.mubr.msk.f32.mxu0 %vm348_vm0, %v10064_v23 }
 0x7fa   : > { %7675 = vmatmul.mubr.msk.f32.gmra.mrb[46].mxu0 %vm348_vm0, %v10067_v61 }
 0x8a0   : > { %v7655_v42 = vpop.f32.mrb[32].mxu0 }
 0x8a1   : > { %v2463_v31 = vadd.f32 %v7655_v42, %v10073_v37  ;;  %2488 = vrot.lane.b32.xlu1 %v7655_v42, %s9173_s24  ;;  %v2378_v22 = vpop.f32.mrb[33].mxu0 }
 0x8a2   : > { %v2462_v41 = vadd.f32 %v10073_v37, %v2378_v22  ;;  %2486 = vrot.lane.b32.xlu0 %v2378_v22, %s9173_s24 }
 0x8a4   : > { %v8325_v46 = vpack.c.bf16 %v2463_v31, %v2462_v41  ;;  %v7658_v2 = vpop.f32.mrb[34].mxu0 }
 0x8a5   : > { %v2465_v4 = vadd.f32 %v7658_v2, %v10073_v37  ;;  %v2388_v5 = vpop.f32.mrb[35].mxu0 }
 0x8a6   : > { %v2464_v26 = vadd.f32 %v10073_v37, %v2388_v5  ;;  %8326 = vmatprep.subr.bf16.mxu0 %v8325_v46  ;;  %2492 = vrot.lane.b32.xlu0 %v7658_v2, %s9173_s24 }
 0x8a7   : > { %2490 = vrot.lane.b32.xlu1 %v2388_v5, %s9173_s24  ;;  %8328 = vmatpush3.bf16.msra.mxu0 %v8325_v46 }
 0x8a8   : > { %v8329_v15 = vpack.c.bf16 %v2465_v4, %v2464_v26  ;;  %v7661_v35 = vpop.f32.mrb[36].mxu0 }
 0x8a9   : > { %v2467_v16 = vadd.f32 %v7661_v35, %v10073_v37  ;;  %v2398_v30 = vpop.f32.mrb[37].mxu0 }
 0x8aa   : > { %v2466_v13 = vadd.f32 %v10073_v37, %v2398_v30  ;;  %8330 = vmatprep.subr.bf16.mxu0 %v8329_v15  ;;  %2496 = vrot.lane.b32.xlu0 %v7661_v35, %s9173_s24 }
 0x8ab   : > { %2494 = vrot.lane.b32.xlu1 %v2398_v30, %s9173_s24  ;;  %8332 = vmatpush3.bf16.msra.mxu0 %v8329_v15 }
 0x8ac   : > { %v8333_v28 = vpack.c.bf16 %v2467_v16, %v2466_v13  ;;  %v7664_v36 = vpop.f32.mrb[38].mxu0 }
 0x8ad   : > { %v2469_v39 = vadd.f32 %v7664_v36, %v10073_v37  ;;  %v2408_v14 = vpop.f32.mrb[39].mxu0 }
 0x8ae   : > { %v2468_v49 = vadd.f32 %v10073_v37, %v2408_v14  ;;  %8334 = vmatprep.subr.bf16.mxu0 %v8333_v28  ;;  %2500 = vrot.lane.b32.xlu0 %v7664_v36, %s9173_s24 }
 0x8af   : > { %2498 = vrot.lane.b32.xlu1 %v2408_v14, %s9173_s24  ;;  %8336 = vmatpush3.bf16.msra.mxu0 %v8333_v28 }
 0x8b0   : > { %v8337_v44 = vpack.c.bf16 %v2469_v39, %v2468_v49 }
 0x8b2   : > { %8338 = vmatprep.subr.bf16.mxu0 %v8337_v44 }
 0x8b3   : > { %8340 = vmatpush3.bf16.msra.mxu0 %v8337_v44 }
 0x8c1   : > { %v7667_v40 = vpop.f32.mrb[40].mxu0 }
 0x8c2   : > { %v2471_v43 = vadd.f32 %v7667_v40, %v10073_v37  ;;  %2885 = vrot.lane.b32.xlu0 %v7667_v40, %s9173_s24  ;;  %v2418_v59 = vpop.f32.mrb[41].mxu0 }
 0x8c3   : > { %v2470_v57 = vadd.f32 %v10073_v37, %v2418_v59  ;;  %2883 = vrot.lane.b32.xlu1 %v2418_v59, %s9173_s24 }
 0x8c5   : > { %v10095_v55 = vpack.c.bf16 %v2471_v43, %v2470_v57  ;;  %v7670_v54 = vpop.f32.mrb[42].mxu0 }
 0x8c6   : > { %v2473_v20 = vadd.f32 %v7670_v54, %v10073_v37  ;;  %2889 = vrot.lane.b32.xlu0 %v7670_v54, %s9173_s24  ;;  %v2428_v48 = vpop.f32.mrb[43].mxu0 }
 0x8c7   : > { %v2472_v58 = vadd.f32 %v10073_v37, %v2428_v48  ;;  %8366 = vmatprep.subr.bf16.mxu0 %v10095_v55  ;;  %2887 = vrot.lane.b32.xlu1 %v2428_v48, %s9173_s24 }
 0x8c9   : > { %v10102_v47 = vpack.c.bf16 %v2473_v20, %v2472_v58  ;;  %v7673_v62 = vpop.f32.mrb[44].mxu0 }
 0x8ca   : > { %v2475_v51 = vadd.f32 %v7673_v62, %v10073_v37  ;;  %2893 = vrot.lane.b32.xlu0 %v7673_v62, %s9173_s24  ;;  %v2438_v0 = vpop.f32.mrb[45].mxu0 }
 0x8cb   : > { %v2474_v24 = vadd.f32 %v10073_v37, %v2438_v0  ;;  %2891 = vrot.lane.b32.xlu1 %v2438_v0, %s9173_s24 }
 0x8cd   : > { %v10108_v17 = vpack.c.bf16 %v2475_v51, %v2474_v24  ;;  %v7676_v1 = vpop.f32.mrb[46].mxu0 }
 0x8ce   : > { %v2477_v52 = vadd.f32 %v7676_v1, %v10073_v37  ;;  %2897 = vrot.lane.b32.xlu0 %v7676_v1, %s9173_s24  ;;  %v2448_v33 = vpop.f32.mrb[47].mxu0 }
 0x8cf   : > { %v2476_v56 = vadd.f32 %v10073_v37, %v2448_v33  ;;  %2895 = vrot.lane.b32.xlu1 %v2448_v33, %s9173_s24 }
 0x8d1   : > { %v10114_v25 = vpack.c.bf16 %v2477_v52, %v2476_v56 }
 0x913   : > { %v2489_v11 = vpop.permute.xlu1 %2488 }
 0x914   : > { %v2487_v3 = vpop.permute.xlu0 %2486 }
 0x915   : > { %v8301_v9 = vpack.c.bf16 %v2489_v11, %v2487_v3  ;;  %7693 = vmatprep.mubr.msk.f32.mxu1 %vm1195_vm1, %v2487_v3 }
 0x917   : > { %8303 = vmatprep.subr.msk.bf16.mxu1 %vm9664_vm2, %v8301_v9 }
 0x918   : > { %8306 = vmatpush3.bf16.xpose.msk.msra.mxu1 %vm9664_vm2, %v8301_v9  ;;  %v2493_v29 = vpop.permute.xlu0 %2492 }
 0x919   : > { %v2491_v10 = vpop.permute.xlu1 %2490 }
 0x91a   : > { %v8307_v8 = vpack.c.bf16 %v2493_v29, %v2491_v10 }
 0x91c   : > { %8309 = vmatprep.subr.msk.bf16.mxu1 %vm9664_vm2, %v8307_v8  ;;  %v2497_v37 = vpop.permute.xlu0 %2496 }
 0x91d   : > { %v2495_v42 = vpop.permute.xlu1 %2494 }
 0x91e   : > { %v8313_v31 = vpack.c.bf16 %v2497_v37, %v2495_v42 }
 0x920   : > { %8312 = vmatpush3.bf16.xpose.msk.msra.mxu1 %vm9664_vm2, %v8307_v8  ;;  %v2501_v22 = vpop.permute.xlu0 %2500 }
 0x921   : > { %8315 = vmatprep.subr.msk.bf16.mxu1 %vm9664_vm2, %v8313_v31  ;;  %v2499_v41 = vpop.permute.xlu1 %2498 }
 0x922   : > { %v8319_v46 = vpack.c.bf16 %v2501_v22, %v2499_v41 }
 0x928   : > { %8318 = vmatpush3.bf16.xpose.msk.msra.mxu1 %vm9664_vm2, %v8313_v31 }
 0x929   : > { %8321 = vmatprep.subr.msk.bf16.mxu1 %vm9664_vm2, %v8319_v46 }
 0x930   : > { %8324 = vmatpush3.bf16.xpose.msk.msra.mxu1 %vm9664_vm2, %v8319_v46 }
 0x934   : > { %v2886_v2 = vpop.permute.xlu0 %2885 }
 0x935   : > { %v2884_v4 = vpop.permute.xlu1 %2883 }
 0x936   : > { %v8341_v5 = vpack.c.bf16 %v2886_v2, %v2884_v4 }
 0x937   : > { %7694 = vmatmul.mubr.msk.f32.vlgmr.msra.gmra.mrb[64].mxu1 %vm1195_vm1, %v2489_v11 }
 0x938   : > { %7696 = vmatprep.mubr.msk.f32.mxu1 %vm1195_vm1, %v2491_v10  ;;  %8343 = vmatprep.subr.msk.bf16.mxu1 %vm9664_vm2, %v8341_v5  ;;  %v2890_v26 = vpop.permute.xlu0 %2889 }
 0x939   : > { %v2888_v15 = vpop.permute.xlu1 %2887  ;;  %8346 = vmatpush3.bf16.xpose.msk.msra.mxu1 %vm9664_vm2, %v8341_v5 }
 0x93a   : > { %v8347_v35 = vpack.c.bf16 %v2890_v26, %v2888_v15 }
 0x93b   : > { %7697 = vmatmul.mubr.msk.f32.gmra.mrb[66].mxu1 %vm1195_vm1, %v2493_v29 }
 0x93c   : > { %7699 = vmatprep.mubr.msk.f32.mxu1 %vm1195_vm1, %v2495_v42  ;;  %8349 = vmatprep.subr.msk.bf16.mxu1 %vm9664_vm2, %v8347_v35  ;;  %v2894_v16 = vpop.permute.xlu0 %2893 }
 0x93d   : > { %v2892_v30 = vpop.permute.xlu1 %2891 }
 0x93e   : > { %v8353_v13 = vpack.c.bf16 %v2894_v16, %v2892_v30 }
 0x93f   : > { %7700 = vmatmul.mubr.msk.f32.gmra.mrb[68].mxu1 %vm1195_vm1, %v2497_v37 }
 0x940   : > { %7702 = vmatprep.mubr.msk.f32.mxu1 %vm1195_vm1, %v2499_v41  ;;  %v2898_v28 = vpop.permute.xlu0 %2897 }
 0x941   : > { %8352 = vmatpush3.bf16.xpose.msk.msra.mxu1 %vm9664_vm2, %v8347_v35  ;;  %v2896_v36 = vpop.permute.xlu1 %2895 }
 0x942   : > { %8355 = vmatprep.subr.msk.bf16.mxu1 %vm9664_vm2, %v8353_v13  ;;  %v8359_v39 = vpack.c.bf16 %v2898_v28, %v2896_v36 }
 0x943   : > { %7703 = vmatmul.mubr.msk.f32.gmra.mrb[70].mxu1 %vm1195_vm1, %v2501_v22 }
 0x944   : > { %7749 = vmatprep.mubr.msk.f32.mxu1 %vm1195_vm1, %v2884_v4 }
 0x949   : > { %8358 = vmatpush3.bf16.xpose.msk.msra.mxu1 %vm9664_vm2, %v8353_v13 }
 0x94a   : > { %8361 = vmatprep.subr.msk.bf16.mxu1 %vm9664_vm2, %v8359_v39 }
 0x951   : > { %8364 = vmatpush3.bf16.xpose.msk.msra.mxu1 %vm9664_vm2, %v8359_v39 }
 0x958   : > { %7750 = vmatmul.mubr.msk.f32.vlgmr.msra.gmra.mrb[72].mxu1 %vm1195_vm1, %v2886_v2 }
 0x959   : > { %7752 = vmatprep.mubr.msk.f32.mxu1 %vm1195_vm1, %v2888_v15 }
 0x95c   : > { %7753 = vmatmul.mubr.msk.f32.gmra.mrb[74].mxu1 %vm1195_vm1, %v2890_v26 }
 0x95d   : > { %7755 = vmatprep.mubr.msk.f32.mxu1 %vm1195_vm1, %v2892_v30 }
 0x960   : > { %7756 = vmatmul.mubr.msk.f32.gmra.mrb[76].mxu1 %vm1195_vm1, %v2894_v16 }
 0x961   : > { %7758 = vmatprep.mubr.msk.f32.mxu1 %vm1195_vm1, %v2896_v36 }
 0x964   : > { %7759 = vmatmul.mubr.msk.f32.gmra.mrb[78].mxu1 %vm1195_vm1, %v2898_v28 }
 0xa0a   : > { %v7695_v14 = vpop.f32.mrb[64].mxu1 }
 0xa0b   : > { %v2584_v49 = vpop.f32.mrb[65].mxu1  ;;  %v2624_v59 = vsel %vm1317_vm3, %v7695_v14, -inf }
 0xa0c   : > { %v2623_v20 = vsel %vm1317_vm3, %v2584_v49, -inf }
 0xa0e   : > { %v7698_v44 = vpop.f32.mrb[66].mxu1 }
 0xa0f   : > { %v2594_v40 = vpop.f32.mrb[67].mxu1  ;;  %v2626_v0 = vsel %vm1317_vm3, %v7698_v44, -inf }
 0xa10   : > { %v2625_v33 = vsel %vm1317_vm3, %v2594_v40, -inf }
 0xa12   : > { %v7701_v43 = vpop.f32.mrb[68].mxu1 }
 0xa13   : > { %v2629_v57 = vsel %vm1317_vm3, %v7701_v43, -inf  ;;  %v2604_v54 = vpop.f32.mrb[69].mxu1 }
 0xa14   : > { %v2630_v48 = vmax.f32 %v2624_v59, %v2629_v57  ;;  %v2627_v58 = vsel %vm1317_vm3, %v2604_v54, -inf }
 0xa15   : > { %v2628_v62 = vmax.f32 %v2623_v20, %v2627_v58 }
 0xa16   : > { %v7704_v51 = vpop.f32.mrb[70].mxu1 }
 0xa17   : > { %v2635_v24 = vmax.f32 %v2628_v62, %v2630_v48  ;;  %v2633_v1 = vsel %vm1317_vm3, %v7704_v51, -inf  ;;  %v2614_v52 = vpop.f32.mrb[71].mxu1 }
 0xa18   : > { %v2634_v56 = vmax.f32 %v2626_v0, %v2633_v1  ;;  %v2631_v11 = vsel %vm1317_vm3, %v2614_v52, -inf }
 0xa19   : > { %v2632_v3 = vmax.f32 %v2625_v33, %v2631_v11 }
 0xa1b   : > { %v2636_v9 = vmax.f32 %v2632_v3, %v2634_v56 }
 0xa1d   : > { %v2637_v29 = vmax.f32 %v2635_v24, %v2636_v9 }
 0xa1f   : > { %v2638_v10 = vrot.slane %v2637_v29, 4 }
 0xa21   : > { %v2639_v8 = vmax.f32 %v2637_v29, %v2638_v10 }
 0xa23   : > { %v2640_v37 = vrot.slane %v2639_v8, 2 }
 0xa25   : > { %v2641_v42 = vmax.f32 %v2639_v8, %v2640_v37 }
 0xa27   : > { %v2642_v31 = vrot.slane %v2641_v42, 1 }
 0xa29   : > { %v2643_v22 = vmax.f32 %v2641_v42, %v2642_v31 }
 0xa2b   : > { %v2649_v41 = vsub.f32 %v7701_v43, %v2643_v22  ;;  %v2650_v46 = vsub.f32 %v2614_v52, %v2643_v22  ;;  %v2651_v2 = vsub.f32 %v7704_v51, %v2643_v22  ;;  %v2644_v4 = vsub.f32 %v2584_v49, %v2643_v22  ;;  %v10172_v5 = vpop.f32.mrb[72].mxu1 }
 0xa2c   : > { %v2645_v26 = vsub.f32 %v7695_v14, %v2643_v22  ;;  %v2646_v15 = vsub.f32 %v2594_v40, %v2643_v22  ;;  %v2647_v35 = vsub.f32 %v7698_v44, %v2643_v22  ;;  %v2648_v16 = vsub.f32 %v2604_v54, %v2643_v22  ;;  %v10174_v30 = vpop.f32.mrb[73].mxu1 }
 0xa2d   : > { %v2652_v13 = vmul.f32 1.442695, %v2644_v4  ;;  %v2662_v49 = vmul.f32 1.442695, %v2649_v41  ;;  %v2664_v14 = vmul.f32 1.442695, %v2650_v46 }
 0xa2e   : > { %v2654_v28 = vmul.f32 1.442695, %v2645_v26  ;;  %v2656_v36 = vmul.f32 1.442695, %v2646_v15  ;;  %v2658_v59 = vmul.f32 1.442695, %v2647_v35 }
 0xa2f   : > { %v10176_v39 = vpop.f32.mrb[74].mxu1  ;;  %8744 = vpow2.f32 %v2652_v13  ;;  %v2660_v43 = vmul.f32 1.442695, %v2648_v16  ;;  %v3021_v44 = vsel %vm1317_vm3, %v10172_v5, -inf  ;;  %v3020_v48 = vsel %vm1317_vm3, %v10174_v30, -inf }
 0xa30   : > { %v10178_v57 = vpop.f32.mrb[75].mxu1  ;;  %8746 = vpow2.f32 %v2654_v28  ;;  %v2666_v0 = vmul.f32 1.442695, %v2651_v2  ;;  %v3023_v1 = vsel %vm1317_vm3, %v10176_v39, -inf }
 0xa31   : > { %8748 = vpow2.f32 %v2656_v36  ;;  %v3022_v11 = vsel %vm1317_vm3, %v10178_v57, -inf }
 0xa32   : > { %8750 = vpow2.f32 %v2658_v59 }
 0xa33   : > { %v10180_v20 = vpop.f32.mrb[76].mxu1  ;;  %8752 = vpow2.f32 %v2660_v43 }
 0xa34   : > { %v3026_v40 = vsel %vm1317_vm3, %v10180_v20, -inf  ;;  %v10186_v54 = vpop.f32.mrb[77].mxu1  ;;  %8754 = vpow2.f32 %v2662_v49 }
 0xa35   : > { %v3027_v58 = vmax.f32 %v3021_v44, %v3026_v40  ;;  %v3024_v62 = vsel %vm1317_vm3, %v10186_v54, -inf  ;;  %8756 = vpow2.f32 %v2664_v14 }
 0xa36   : > { %v3025_v51 = vmax.f32 %v3020_v48, %v3024_v62  ;;  %8758 = vpow2.f32 %v2666_v0 }
 0xa37   : > { %v10192_v24 = vpop.f32.mrb[78].mxu1 }
 0xa38   : > { %v3032_v52 = vmax.f32 %v3025_v51, %v3027_v58  ;;  %v3030_v33 = vsel %vm1317_vm3, %v10192_v24, -inf  ;;  %v10198_v56 = vpop.f32.mrb[79].mxu1 }
 0xa39   : > { %v3031_v3 = vmax.f32 %v3023_v1, %v3030_v33  ;;  %v3028_v9 = vsel %vm1317_vm3, %v10198_v56, -inf  ;;  %v10204_v29 = vpop.eup %8744 }
 0xa3a   : > { %v3029_v10 = vmax.f32 %v3022_v11, %v3028_v9  ;;  %v10206_v8 = vpop.eup %8746  ;;  %v2668_v37 = vsel %vm1317_vm3, %v10204_v29, 0.0 }
 0xa3b   : > { %v10210_v42 = vpop.eup %8748  ;;  %v2669_v22 = vsel %vm1317_vm3, %v10206_v8, 0.0 }
 0xa3c   : > { %v3033_v31 = vmax.f32 %v3029_v10, %v3031_v3  ;;  %v10214_v41 = vpop.eup %8750  ;;  %v2670_v46 = vadd.f32 %v2669_v22, %v2668_v37  ;;  %v2671_v4 = vsel %vm1317_vm3, %v10210_v42, 0.0 }
 0xa3d   : > { %v10218_v26 = vpop.eup %8752  ;;  %v2673_v16 = vsel %vm1317_vm3, %v10214_v41, 0.0 }
 0xa3e   : > { %v3034_v2 = vmax.f32 %v3032_v52, %v3033_v31  ;;  %v2672_v15 = vadd.f32 %v2671_v4, %v2670_v46  ;;  %v10222_v13 = vpop.eup %8754  ;;  %v2675_v59 = vsel %vm1317_vm3, %v10218_v26, 0.0 }
 0xa3f   : > { %v8757_v43 = vpop.eup %8756  ;;  %v2677_v44 = vsel %vm1317_vm3, %v10222_v13, 0.0 }
 0xa40   : > { %v3035_v35 = vrot.slane %v3034_v2, 4  ;;  %v2674_v28 = vadd.f32 %v2673_v16, %v2672_v15  ;;  %v8759_v40 = vpop.eup %8758  ;;  %v2679_v58 = vsel %vm1317_vm3, %v8757_v43, 0.0 }
 0xa41   : > { %v2681_v1 = vsel %vm1317_vm3, %v8759_v40, 0.0 }
 0xa42   : > { %v3036_v36 = vmax.f32 %v3034_v2, %v3035_v35  ;;  %v2676_v49 = vadd.f32 %v2675_v59, %v2674_v28 }
 0xa44   : > { %v3037_v14 = vrot.slane %v3036_v36, 2  ;;  %v2678_v48 = vadd.f32 %v2677_v44, %v2676_v49 }
 0xa46   : > { %v3038_v62 = vmax.f32 %v3036_v36, %v3037_v14  ;;  %v2680_v51 = vadd.f32 %v2679_v58, %v2678_v48 }
 0xa48   : > { %v3039_v0 = vrot.slane %v3038_v62, 1  ;;  %v2682_v52 = vadd.f32 %v2681_v1, %v2680_v51 }
 0xa4a   : > { %v3040_v33 = vmax.f32 %v3038_v62, %v3039_v0  ;;  %v2683_v11 = vrot.slane %v2682_v52, 4 }
 0xa4c   : > { %v3046_v3 = vsub.f32 %v10180_v20, %v3040_v33  ;;  %v3047_v9 = vsub.f32 %v10198_v56, %v3040_v33  ;;  %v3048_v10 = vsub.f32 %v10192_v24, %v3040_v33  ;;  %v3041_v37 = vsub.f32 %v10174_v30, %v3040_v33 }
 0xa4d   : > { %v2684_v31 = vadd.f32 %v2683_v11, %v2682_v52  ;;  %v3042_v22 = vsub.f32 %v10172_v5, %v3040_v33  ;;  %v3043_v46 = vsub.f32 %v10178_v57, %v3040_v33  ;;  %v3044_v2 = vsub.f32 %v10176_v39, %v3040_v33 }
 0xa4e   : > { %v3045_v4 = vsub.f32 %v10186_v54, %v3040_v33  ;;  %v3049_v35 = vmul.f32 1.442695, %v3041_v37  ;;  %v3059_v5 = vmul.f32 1.442695, %v3046_v3  ;;  %v3061_v57 = vmul.f32 1.442695, %v3047_v9 }
 0xa4f   : > { %v2685_v15 = vrot.slane %v2684_v31, 2  ;;  %v3051_v16 = vmul.f32 1.442695, %v3042_v22  ;;  %v3053_v28 = vmul.f32 1.442695, %v3043_v46 }
 0xa50   : > { %8760 = vpow2.f32 %v3049_v35  ;;  %v3055_v24 = vmul.f32 1.442695, %v3044_v2  ;;  %v3057_v36 = vmul.f32 1.442695, %v3045_v4  ;;  %v3063_v59 = vmul.f32 1.442695, %v3048_v10 }
 0xa51   : > { %v2686_v20 = vadd.f32 %v2685_v15, %v2684_v31  ;;  %8762 = vpow2.f32 %v3051_v16 }
 0xa52   : > { %8764 = vpow2.f32 %v3053_v28 }
 0xa53   : > { %v2687_v56 = vrot.slane %v2686_v20, 1 }
 0xa55   : > { %v2688_v30 = vadd.f32 %v2687_v56, %v2686_v20 }
 0xa57   : > { %8766 = vrcp.f32 %v2688_v30 }
 0xa58   : > { %8768 = vpow2.f32 %v3055_v24 }
 0xa59   : > { %8770 = vpow2.f32 %v3057_v36 }
 0xa5a   : > { %v8761_v39 = vpop.eup %8760  ;;  %8772 = vpow2.f32 %v3059_v5 }
 0xa5b   : > { %v8763_v54 = vpop.eup %8762  ;;  %v3065_v49 = vsel %vm1317_vm3, %v8761_v39, 0.0  ;;  %8774 = vpow2.f32 %v3061_v57 }
 0xa5c   : > { %v8765_v14 = vpop.eup %8764  ;;  %v3066_v44 = vsel %vm1317_vm3, %v8763_v54, 0.0  ;;  %8776 = vpow2.f32 %v3063_v59 }
 0xa5d   : > { %v3067_v48 = vadd.f32 %v3066_v44, %v3065_v49  ;;  %v3068_v58 = vsel %vm1317_vm3, %v8765_v14, 0.0 }
 0xa5f   : > { %v3069_v51 = vadd.f32 %v3068_v58, %v3067_v48 }
 0xa61   : > { %v8767_v62 = vpop.eup %8766 }
 0xa62   : > { %v8769_v0 = vpop.eup %8768  ;;  %v10242_v1 = vmul.f32 %v8767_v62, %v10206_v8  ;;  %v10245_v52 = vmul.f32 %v8767_v62, %v10204_v29  ;;  %v10248_v33 = vmul.f32 %v8767_v62, %v10210_v42  ;;  %v10251_v11 = vmul.f32 %v8767_v62, %v10214_v41 }
 0xa63   : > { %v10254_v3 = vmul.f32 %v8767_v62, %v10218_v26  ;;  %v10257_v9 = vmul.f32 %v8767_v62, %v10222_v13  ;;  %v10259_v10 = vmul.f32 %v8767_v62, %v8757_v43  ;;  %v10261_v37 = vmul.f32 %v8767_v62, %v8759_v40  ;;  %v8771_v8 = vpop.eup %8770 }
 0xa64   : > { %v2701_v29 = vsel %vm1317_vm3, %v10242_v1, 0.0  ;;  %v2698_v42 = vsel %vm1317_vm3, %v10245_v52, 0.0  ;;  %v3070_v41 = vsel %vm1317_vm3, %v8769_v0, 0.0  ;;  %v8773_v26 = vpop.eup %8772  ;;  %v3072_v13 = vsel %vm1317_vm3, %v8771_v8, 0.0 }
 0xa65   : > { %2702 = vadd.xlane.f32.xlu0 %v2701_v29  ;;  %2699 = vadd.xlane.f32.xlu1 %v2698_v42  ;;  %v3071_v31 = vadd.f32 %v3070_v41, %v3069_v51  ;;  %v8775_v22 = vpop.eup %8774  ;;  %v2704_v43 = vsel %vm1317_vm3, %v10248_v33, 0.0  ;;  %v2707_v40 = vsel %vm1317_vm3, %v10251_v11, 0.0  ;;  %v3074_v2 = vsel %vm1317_vm3, %v8773_v26, 0.0 }
 0xa66   : > { %v8777_v4 = vpop.eup %8776  ;;  %v3076_v35 = vsel %vm1317_vm3, %v8775_v22, 0.0  ;;  %v2710_v16 = vsel %vm1317_vm3, %v10254_v3, 0.0  ;;  %v2713_v28 = vsel %vm1317_vm3, %v10257_v9, 0.0  ;;  %v2716_v30 = vsel %vm1317_vm3, %v10259_v10, 0.0 }
 0xa67   : > { %v3073_v46 = vadd.f32 %v3072_v13, %v3071_v31  ;;  %v3078_v56 = vsel %vm1317_vm3, %v8777_v4, 0.0  ;;  %v2719_v36 = vsel %vm1317_vm3, %v10261_v37, 0.0 }
 0xa69   : > { %2705 = vadd.xlane.f32.xlu0 %v2704_v43  ;;  %2708 = vadd.xlane.f32.xlu1 %v2707_v40  ;;  %v3075_v15 = vadd.f32 %v3074_v2, %v3073_v46 }
 0xa6b   : > { %v3077_v20 = vadd.f32 %v3076_v35, %v3075_v15 }
 0xa6d   : > { %2711 = vadd.xlane.f32.xlu0 %v2710_v16  ;;  %2714 = vadd.xlane.f32.xlu1 %v2713_v28  ;;  %v3079_v24 = vadd.f32 %v3078_v56, %v3077_v20 }
 0xa6f   : > { %v3080_v5 = vrot.slane %v3079_v24, 4 }
 0xa71   : > { %2717 = vadd.xlane.f32.xlu0 %v2716_v30  ;;  %2720 = vadd.xlane.f32.xlu1 %v2719_v36  ;;  %v3081_v57 = vadd.f32 %v3080_v5, %v3079_v24 }
 0xa73   : > { %v3082_v59 = vrot.slane %v3081_v57, 2 }
 0xa75   : > { %v3083_v49 = vadd.f32 %v3082_v59, %v3081_v57 }
 0xa77   : > { %v3084_v44 = vrot.slane %v3083_v49, 1 }
 0xa79   : > { %v3085_v48 = vadd.f32 %v3084_v44, %v3083_v49 }
 0xa7b   : > { %8778 = vrcp.f32 %v3085_v48 }
 0xa85   : > { %v8779_v58 = vpop.eup %8778 }
 0xa86   : > { %v10284_v62 = vmul.f32 %v8779_v58, %v8763_v54  ;;  %v10286_v51 = vmul.f32 %v8779_v58, %v8761_v39  ;;  %v10288_v29 = vmul.f32 %v8779_v58, %v8769_v0  ;;  %v10290_v42 = vmul.f32 %v8779_v58, %v8765_v14 }
 0xa87   : > { %v10292_v41 = vmul.f32 %v8779_v58, %v8773_v26  ;;  %v10294_v31 = vmul.f32 %v8779_v58, %v8771_v8  ;;  %v10296_v13 = vmul.f32 %v8779_v58, %v8777_v4  ;;  %v10298_v43 = vmul.f32 %v8779_v58, %v8775_v22 }
 0xa88   : > { %v3098_v40 = vsel %vm1317_vm3, %v10284_v62, 0.0  ;;  %v3095_v54 = vsel %vm1317_vm3, %v10286_v51, 0.0  ;;  %v3104_v39 = vsel %vm1317_vm3, %v10288_v29, 0.0  ;;  %v3101_v14 = vsel %vm1317_vm3, %v10290_v42, 0.0 }
 0xa89   : > { %3099 = vadd.xlane.f32.xlu1 %v3098_v40  ;;  %3096 = vadd.xlane.f32.xlu0 %v3095_v54  ;;  %v3110_v0 = vsel %vm1317_vm3, %v10292_v41, 0.0  ;;  %v3107_v8 = vsel %vm1317_vm3, %v10294_v31, 0.0  ;;  %v3116_v26 = vsel %vm1317_vm3, %v10296_v13, 0.0  ;;  %v3113_v22 = vsel %vm1317_vm3, %v10298_v43, 0.0 }
 0xa8d   : > { %3105 = vadd.xlane.f32.xlu1 %v3104_v39  ;;  %3102 = vadd.xlane.f32.xlu0 %v3101_v14 }
 0xa91   : > { %3111 = vadd.xlane.f32.xlu1 %v3110_v0  ;;  %3108 = vadd.xlane.f32.xlu0 %v3107_v8 }
 0xa95   : > { %3117 = vadd.xlane.f32.xlu1 %v3116_v26  ;;  %3114 = vadd.xlane.f32.xlu0 %v3113_v22 }
 0xaf2   : > { %v2703_v46 = vpop.xlane.xlu0 %2702  ;;  %v2700_v2 = vpop.xlane.xlu1 %2699 }
 0xaf3   : > { %v2723_v4 = vadd.f32 1e-09, %v2703_v46  ;;  %v2722_v15 = vadd.f32 1e-09, %v2700_v2 }
 0xaf5   : > { %8780 = vrcp.f32 %v2723_v4 }
 0xaf6   : > { %8782 = vrcp.f32 %v2722_v15  ;;  %v2706_v35 = vpop.xlane.xlu0 %2705  ;;  %v2709_v16 = vpop.xlane.xlu1 %2708 }
 0xaf7   : > { %v2724_v28 = vadd.f32 1e-09, %v2706_v35  ;;  %v2725_v20 = vadd.f32 1e-09, %v2709_v16 }
 0xaf9   : > { %8784 = vrcp.f32 %v2724_v28 }
 0xafa   : > { %8786 = vrcp.f32 %v2725_v20  ;;  %v2712_v56 = vpop.xlane.xlu0 %2711  ;;  %v2715_v24 = vpop.xlane.xlu1 %2714 }
 0xafb   : > { %v2726_v30 = vadd.f32 1e-09, %v2712_v56  ;;  %v2727_v36 = vadd.f32 1e-09, %v2715_v24 }
 0xafd   : > { %8788 = vrcp.f32 %v2726_v30  ;;  %v3291_v30 = vld [vmem:[#allocation8 + $0x30] sm:$0xff] }
 0xafe   : > { %8790 = vrcp.f32 %v2727_v36  ;;  %v2718_v5 = vpop.xlane.xlu0 %2717  ;;  %v2721_v57 = vpop.xlane.xlu1 %2720  ;;  %v3292_v36 = vld [vmem:[#allocation8 + $0x38] sm:$0xff] }
 0xaff   : > { %v8781_v59 = vpop.eup %8780  ;;  %v2728_v49 = vadd.f32 1e-09, %v2718_v5  ;;  %v2729_v44 = vadd.f32 1e-09, %v2721_v57 }
 0xb00   : > { %v8783_v48 = vpop.eup %8782  ;;  %v2739_v58 = vmul.f32 %v8781_v59, %v10242_v1 }
 0xb01   : > { %8792 = vrcp.f32 %v2728_v49  ;;  %v2738_v40 = vmul.f32 %v8783_v48, %v10245_v52 }
 0xb02   : > { %8794 = vrcp.f32 %v2729_v44 }
 0xb03   : > { %v8785_v54 = vpop.eup %8784  ;;  %7721 = vmatprep.mubr.msk.f32.mxu0 %vm1317_vm3, %v2738_v40 }
 0xb04   : > { %v8787_v39 = vpop.eup %8786  ;;  %7722 = vmatmul.mubr.msk.f32.vlgmr.msra.gmra.mrb[48].mxu0 %vm1317_vm3, %v2739_v58  ;;  %v2740_v14 = vmul.f32 %v8785_v54, %v10248_v33  ;;  %v3289_v33 = vld [vmem:[#allocation8 + $0x20] sm:$0xff]  ;;  %v8385_v58 = vpack.c.bf16 %v3292_v36, %v3291_v30 }
 0xb05   : > { %8368 = vmatpush3.bf16.msra.mxu0 %v10095_v55  ;;  %v2741_v0 = vmul.f32 %v8787_v39, %v10251_v11  ;;  %v3290_v11 = vld [vmem:[#allocation8 + $0x28] sm:$0xff] }
 0xb06   : > { %8370 = vmatprep.subr.bf16.mxu0 %v10102_v47  ;;  %7724 = vmatprep.mubr.msk.f32.mxu0 %vm1317_vm3, %v2740_v14 }
 0xb07   : > { %v8789_v1 = vpop.eup %8788 }
 0xb08   : > { %v8791_v8 = vpop.eup %8790  ;;  %7725 = vmatmul.mubr.msk.f32.gmra.mrb[50].mxu0 %vm1317_vm3, %v2741_v0  ;;  %v2742_v52 = vmul.f32 %v8789_v1, %v10254_v3 }
 0xb09   : > { %8372 = vmatpush3.bf16.msra.mxu0 %v10102_v47  ;;  %v2743_v26 = vmul.f32 %v8791_v8, %v10257_v9  ;;  %v8381_v47 = vpack.c.bf16 %v3290_v11, %v3289_v33 }
 0xb0a   : > { %8374 = vmatprep.subr.bf16.mxu0 %v10108_v17  ;;  %7727 = vmatprep.mubr.msk.f32.mxu0 %vm1317_vm3, %v2742_v52 }
 0xb0b   : > { %v8793_v55 = vpop.eup %8792 }
 0xb0c   : > { %v8795_v22 = vpop.eup %8794  ;;  %7728 = vmatmul.mubr.msk.f32.gmra.mrb[52].mxu0 %vm1317_vm3, %v2743_v26  ;;  %v2744_v46 = vmul.f32 %v8793_v55, %v10259_v10  ;;  %v3566_v26 = vld [vmem:[#allocation7 + $0x40] sm:$0xff]  ;;  %v3567_v55 = vld [vmem:[#allocation7 + $0x48] sm:$0xff] }
 0xb0d   : > { %8376 = vmatpush3.bf16.msra.mxu0 %v10108_v17  ;;  %v2745_v3 = vmul.f32 %v8795_v22, %v10261_v37 }
 0xb0e   : > { %8378 = vmatprep.subr.bf16.mxu0 %v10114_v25  ;;  %7730 = vmatprep.mubr.msk.f32.mxu0 %vm1317_vm3, %v2744_v46 }
 0xb10   : > { %7731 = vmatmul.mubr.msk.f32.gmra.mrb[54].mxu0 %vm1317_vm3, %v2745_v3 }
 0xb11   : > { %8380 = vmatpush3.bf16.msra.mxu0 %v10114_v25 }
 0xb12   : > { %8382 = vmatprep.subr.bf16.mxu0 %v8381_v47 }
 0xb16   : > { %v3097_v9 = vpop.xlane.xlu0 %3096  ;;  %v3100_v2 = vpop.xlane.xlu1 %3099 }
 0xb17   : > { %v3119_v4 = vadd.f32 1e-09, %v3097_v9  ;;  %v3120_v15 = vadd.f32 1e-09, %v3100_v2 }
 0xb19   : > { %8796 = vrcp.f32 %v3119_v4 }
 0xb1a   : > { %8798 = vrcp.f32 %v3120_v15  ;;  %v3103_v10 = vpop.xlane.xlu0 %3102  ;;  %v3106_v17 = vpop.xlane.xlu1 %3105 }
 0xb1b   : > { %v3121_v35 = vadd.f32 1e-09, %v3103_v10  ;;  %v3122_v37 = vadd.f32 1e-09, %v3106_v17 }
 0xb1d   : > { %8800 = vrcp.f32 %v3121_v35 }
 0xb1e   : > { %8802 = vrcp.f32 %v3122_v37  ;;  %v3109_v16 = vpop.xlane.xlu0 %3108  ;;  %v3112_v28 = vpop.xlane.xlu1 %3111 }
 0xb1f   : > { %v3123_v20 = vadd.f32 1e-09, %v3109_v16  ;;  %v3124_v56 = vadd.f32 1e-09, %v3112_v28 }
 0xb21   : > { %8804 = vrcp.f32 %v3123_v20 }
 0xb22   : > { %8806 = vrcp.f32 %v3124_v56  ;;  %v3115_v25 = vpop.xlane.xlu0 %3114  ;;  %v3118_v24 = vpop.xlane.xlu1 %3117 }
 0xb23   : > { %v8797_v5 = vpop.eup %8796  ;;  %v3125_v57 = vadd.f32 1e-09, %v3115_v25  ;;  %v3126_v59 = vadd.f32 1e-09, %v3118_v24 }
 0xb24   : > { %v8799_v49 = vpop.eup %8798  ;;  %v3135_v44 = vmul.f32 %v8797_v5, %v10286_v51 }
 0xb25   : > { %v3136_v48 = vmul.f32 %v8799_v49, %v10284_v62  ;;  %8808 = vrcp.f32 %v3125_v57 }
 0xb26   : > { %8810 = vrcp.f32 %v3126_v59  ;;  %7777 = vmatprep.mubr.msk.f32.mxu0 %vm1317_vm3, %v3135_v44 }
 0xb27   : > { %v8801_v40 = vpop.eup %8800  ;;  %7778 = vmatmul.mubr.msk.f32.vlgmr.msra.gmra.mrb[56].mxu0 %vm1317_vm3, %v3136_v48 }
 0xb28   : > { %v8803_v54 = vpop.eup %8802  ;;  %v3137_v39 = vmul.f32 %v8801_v40, %v10290_v42  ;;  %8384 = vmatpush3.bf16.msra.mxu0 %v8381_v47  ;;  %v3568_v40 = vld [vmem:[#allocation7 + $0x50] sm:$0xff] }
 0xb29   : > { %v3138_v14 = vmul.f32 %v8803_v54, %v10288_v29  ;;  %8386 = vmatprep.subr.bf16.mxu0 %v8385_v58  ;;  %v3569_v54 = vld [vmem:[#allocation7 + $0x58] sm:$0xff] }
 0xb2a   : > { %7780 = vmatprep.mubr.msk.f32.mxu0 %vm1317_vm3, %v3137_v39  ;;  %v8393_v39 = vpack.c.bf16 %v3569_v54, %v3568_v40 }
 0xb2b   : > { %v8805_v51 = vpop.eup %8804  ;;  %7781 = vmatmul.mubr.msk.f32.gmra.mrb[58].mxu0 %vm1317_vm3, %v3138_v14  ;;  %v10387_v14 = vld [vmem:[#allocation10 + $0x9] ss:$0 sm:$0xff] }
 0xb2c   : > { %v8807_v62 = vpop.eup %8806  ;;  %v3139_v0 = vmul.f32 %v8805_v51, %v10294_v31  ;;  %8388 = vmatpush3.bf16.msra.mxu0 %v8385_v58  ;;  %v8389_v31 = vpack.c.bf16 %v3567_v55, %v3566_v26 }
 0xb2d   : > { %v3140_v1 = vmul.f32 %v8807_v62, %v10292_v41  ;;  %v10389_v62 = vld [vmem:[#allocation10 + $0xd] ss:$0 sm:$0xff] }
 0xb2e   : > { %7783 = vmatprep.mubr.msk.f32.mxu0 %vm1317_vm3, %v3139_v0  ;;  %8390 = vmatprep.subr.bf16.mxu1 %v8389_v31 }
 0xb2f   : > { %v8809_v8 = vpop.eup %8808  ;;  %7784 = vmatmul.mubr.msk.f32.gmra.mrb[60].mxu0 %vm1317_vm3, %v3140_v1  ;;  %8392 = vmatpush3.bf16.msra.mxu1 %v8389_v31 }
 0xb30   : > { %v8811_v42 = vpop.eup %8810  ;;  %v3141_v29 = vmul.f32 %v8809_v8, %v10298_v43  ;;  %8394 = vmatprep.subr.bf16.mxu1 %v8393_v39  ;;  %v10392_v8 = vld [vmem:[#allocation10 + $0x11] ss:$0 sm:$0xff] }
 0xb31   : > { %v3142_v52 = vmul.f32 %v8811_v42, %v10296_v13 }
 0xb32   : > { %7786 = vmatprep.mubr.msk.f32.mxu0 %vm1317_vm3, %v3141_v29 }
 0xb33   : > { %7787 = vmatmul.mubr.msk.f32.gmra.mrb[62].mxu0 %vm1317_vm3, %v3142_v52  ;;  %8396 = vmatpush3.bf16.msra.mxu1 %v8393_v39 }
 0xbd7   : > { %v7723_v41 = vpop.f32.mrb[48].mxu0 }
 0xbd8   : > { %v2836_v33 = vpop.f32.mrb[49].mxu0  ;;  %v3273_v22 = vsub.f32 %v9963_v27, %v7723_v41 }
 0xbd9   : > { %v3272_v11 = vsub.f32 %v9958_v18, %v2836_v33 }
 0xbdb   : > { %v7726_v46 = vpop.f32.mrb[50].mxu0  ;;  %7797 = vmatprep.mubr.msk.f32.mxu0 %vm348_vm0, %v3272_v11 }
 0xbdc   : > { %v2846_v43 = vpop.f32.mrb[51].mxu0  ;;  %7798 = vmatmul.mubr.msk.f32.vlgmr.msra.gmra.mrb[64].mxu0 %vm348_vm0, %v3273_v22  ;;  %v3275_v3 = vsub.f32 %v9979_v50, %v7726_v46 }
 0xbdd   : > { %v3274_v13 = vsub.f32 %v9974_v53, %v2846_v43 }
 0xbdf   : > { %v7729_v47 = vpop.f32.mrb[52].mxu0  ;;  %7800 = vmatprep.mubr.msk.f32.mxu0 %vm348_vm0, %v3274_v13 }
 0xbe0   : > { %v2856_v9 = vpop.f32.mrb[53].mxu0  ;;  %7801 = vmatmul.mubr.msk.f32.gmra.mrb[66].mxu0 %vm348_vm0, %v3275_v3  ;;  %v3277_v4 = vsub.f32 %v9993_v19, %v7729_v47 }
 0xbe1   : > { %v3276_v2 = vsub.f32 %v9989_v60, %v2856_v9 }
 0xbe3   : > { %v7732_v15 = vpop.f32.mrb[54].mxu0  ;;  %7803 = vmatprep.mubr.msk.f32.mxu0 %vm348_vm0, %v3276_v2 }
 0xbe4   : > { %v2866_v10 = vpop.f32.mrb[55].mxu0  ;;  %7804 = vmatmul.mubr.msk.f32.gmra.mrb[68].mxu0 %vm348_vm0, %v3277_v4  ;;  %v3279_v35 = vsub.f32 %v10003_v63, %v7732_v15 }
 0xbe5   : > { %v3278_v17 = vsub.f32 %v10000_v12, %v2866_v10 }
 0xbe7   : > { %7806 = vmatprep.mubr.msk.f32.mxu0 %vm348_vm0, %v3278_v17 }
 0xbe8   : > { %7807 = vmatmul.mubr.msk.f32.gmra.mrb[70].mxu0 %vm348_vm0, %v3279_v35 }
 0xbfa   : > { %v7779_v37 = vpop.f32.mrb[56].mxu0 }
 0xbfb   : > { %v3233_v16 = vpop.f32.mrb[57].mxu0  ;;  %v3281_v20 = vsub.f32 %v10027_v7, %v7779_v37 }
 0xbfc   : > { %v3280_v28 = vsub.f32 %v10022_v45, %v3233_v16 }
 0xbfe   : > { %v7782_v56 = vpop.f32.mrb[58].mxu0  ;;  %7809 = vmatprep.mubr.msk.f32.mxu0 %vm348_vm0, %v3280_v28 }
 0xbff   : > { %v3243_v25 = vpop.f32.mrb[59].mxu0  ;;  %7810 = vmatmul.mubr.msk.f32.gmra.mrb[72].mxu0 %vm348_vm0, %v3281_v20  ;;  %v3283_v30 = vsub.f32 %v10043_v34, %v7782_v56 }
 0xc00   : > { %v3282_v24 = vsub.f32 %v10038_v21, %v3243_v25 }
 0xc02   : > { %v7785_v36 = vpop.f32.mrb[60].mxu0  ;;  %7812 = vmatprep.mubr.msk.f32.mxu0 %vm348_vm0, %v3282_v24 }
 0xc03   : > { %v3253_v5 = vpop.f32.mrb[61].mxu0  ;;  %7813 = vmatmul.mubr.msk.f32.gmra.mrb[74].mxu0 %vm348_vm0, %v3283_v30  ;;  %v3285_v59 = vsub.f32 %v10057_v6, %v7785_v36 }
 0xc04   : > { %v3284_v57 = vsub.f32 %v10053_v32, %v3253_v5 }
 0xc06   : > { %v7788_v49 = vpop.f32.mrb[62].mxu0  ;;  %7815 = vmatprep.mubr.msk.f32.mxu0 %vm348_vm0, %v3284_v57 }
 0xc07   : > { %v3263_v44 = vpop.f32.mrb[63].mxu0  ;;  %7816 = vmatmul.mubr.msk.f32.gmra.mrb[76].mxu0 %vm348_vm0, %v3285_v59  ;;  %v3287_v58 = vsub.f32 %v10067_v61, %v7788_v49 }
 0xc08   : > { %v3286_v48 = vsub.f32 %v10064_v23, %v3263_v44 }
 0xc0a   : > { %7818 = vmatprep.mubr.msk.f32.mxu0 %vm348_vm0, %v3286_v48 }
 0xc0b   : > { %7819 = vmatmul.mubr.msk.f32.gmra.mrb[78].mxu0 %vm348_vm0, %v3287_v58 }
 0xcaf   : > { %v7799_v51 = vpop.f32.mrb[64].mxu0 }
 0xcb0   : > { %v3418_v0 = vadd.f32 %v7799_v51, %v10387_v14  ;;  %v3412_v1 = vpop.f32.mrb[65].mxu0 }
 0xcb1   : > { %v3413_v42 = vadd.f32 %v10387_v14, %v3412_v1 }
 0xcb2   : > { %v3497_v29 = vmul.f32 %v10389_v62, %v3418_v0 }
 0xcb3   : > { %v3496_v52 = vmul.f32 %v10389_v62, %v3413_v42  ;;  %v7802_v26 = vpop.f32.mrb[66].mxu0 }
 0xcb4   : > { %v3518_v55 = vadd.f32 %v10392_v8, %v3497_v29  ;;  %v3428_v31 = vadd.f32 %v7802_v26, %v10387_v14  ;;  %v3422_v41 = vpop.f32.mrb[67].mxu0 }
 0xcb5   : > { %v3517_v33 = vadd.f32 %v10392_v8, %v3496_v52  ;;  %v3423_v11 = vadd.f32 %v10387_v14, %v3422_v41 }
 0xcb6   : > { %v3534_v22 = vmax.f32 %v3518_v55, 0.0  ;;  %v3499_v46 = vmul.f32 %v10389_v62, %v3428_v31 }
 0xcb7   : > { %v3533_v43 = vmax.f32 %v3517_v33, 0.0  ;;  %v3498_v13 = vmul.f32 %v10389_v62, %v3423_v11  ;;  %v7805_v3 = vpop.f32.mrb[68].mxu0 }
 0xcb8   : > { %v3520_v47 = vadd.f32 %v10392_v8, %v3499_v46  ;;  %v3438_v9 = vadd.f32 %v7805_v3, %v10387_v14  ;;  %v3432_v2 = vpop.f32.mrb[69].mxu0  ;;  %v10411_v17 = vadd.f32 %v3534_v22, %v9963_v27 }
 0xcb9   : > { %v10406_v4 = vadd.f32 %v3533_v43, %v9958_v18  ;;  %v3519_v15 = vadd.f32 %v10392_v8, %v3498_v13  ;;  %v3433_v10 = vadd.f32 %v10387_v14, %v3432_v2 }
 0xcba   : > { %v3536_v35 = vmax.f32 %v3520_v47, 0.0  ;;  %v3501_v37 = vmul.f32 %v10389_v62, %v3438_v9 }
 0xcbb   : > { %v3535_v16 = vmax.f32 %v3519_v15, 0.0  ;;  %v3500_v28 = vmul.f32 %v10389_v62, %v3433_v10  ;;  %v7808_v20 = vpop.f32.mrb[70].mxu0  ;;  %7829 = vmatprep.mubr.msk.f32.mxu1 %vm348_vm0, %v10406_v4 }
 0xcbc   : > { %v3522_v56 = vadd.f32 %v10392_v8, %v3501_v37  ;;  %v3448_v25 = vadd.f32 %v7808_v20, %v10387_v14  ;;  %v3442_v24 = vpop.f32.mrb[71].mxu0  ;;  %7830 = vmatmul.mubr.msk.f32.vlgmr.msra.gmra.mrb[80].mxu1 %vm348_vm0, %v10411_v17  ;;  %v10427_v57 = vadd.f32 %v3536_v35, %v9979_v50 }
 0xcbd   : > { %v10422_v30 = vadd.f32 %v3535_v16, %v9974_v53  ;;  %v3521_v36 = vadd.f32 %v10392_v8, %v3500_v28  ;;  %v3443_v5 = vadd.f32 %v10387_v14, %v3442_v24 }
 0xcbe   : > { %v3538_v59 = vmax.f32 %v3522_v56, 0.0  ;;  %v3503_v49 = vmul.f32 %v10389_v62, %v3448_v25 }
 0xcbf   : > { %v3537_v44 = vmax.f32 %v3521_v36, 0.0  ;;  %v3502_v48 = vmul.f32 %v10389_v62, %v3443_v5  ;;  %7832 = vmatprep.mubr.msk.f32.mxu1 %vm348_vm0, %v10422_v30 }
 0xcc0   : > { %v3524_v58 = vadd.f32 %v10392_v8, %v3503_v49  ;;  %7833 = vmatmul.mubr.msk.f32.gmra.mrb[82].mxu1 %vm348_vm0, %v10427_v57  ;;  %v10441_v39 = vadd.f32 %v3538_v59, %v9993_v19 }
 0xcc1   : > { %v10437_v40 = vadd.f32 %v3537_v44, %v9989_v60  ;;  %v3523_v54 = vadd.f32 %v10392_v8, %v3502_v48 }
 0xcc2   : > { %v3540_v51 = vmax.f32 %v3524_v58, 0.0 }
 0xcc3   : > { %v3539_v0 = vmax.f32 %v3523_v54, 0.0  ;;  %7835 = vmatprep.mubr.msk.f32.mxu1 %vm348_vm0, %v10437_v40 }
 0xcc4   : > { %7836 = vmatmul.mubr.msk.f32.gmra.mrb[84].mxu1 %vm348_vm0, %v10441_v39  ;;  %v10451_v42 = vadd.f32 %v3540_v51, %v10003_v63 }
 0xcc5   : > { %v10448_v1 = vadd.f32 %v3539_v0, %v10000_v12 }
 0xcc7   : > { %7838 = vmatprep.mubr.msk.f32.mxu1 %vm348_vm0, %v10448_v1 }
 0xcc8   : > { %7839 = vmatmul.mubr.msk.f32.gmra.mrb[86].mxu1 %vm348_vm0, %v10451_v42 }
 0xcd2   : > { %v7811_v29 = vpop.f32.mrb[72].mxu0 }
 0xcd3   : > { %v3458_v52 = vadd.f32 %v7811_v29, %v10387_v14  ;;  %v3452_v26 = vpop.f32.mrb[73].mxu0 }
 0xcd4   : > { %v3453_v55 = vadd.f32 %v10387_v14, %v3452_v26 }
 0xcd5   : > { %v3505_v31 = vmul.f32 %v10389_v62, %v3458_v52 }
 0xcd6   : > { %v3504_v41 = vmul.f32 %v10389_v62, %v3453_v55  ;;  %v7814_v33 = vpop.f32.mrb[74].mxu0 }
 0xcd7   : > { %v3526_v11 = vadd.f32 %v10392_v8, %v3505_v31  ;;  %v3468_v22 = vadd.f32 %v7814_v33, %v10387_v14  ;;  %v3462_v46 = vpop.f32.mrb[75].mxu0 }
 0xcd8   : > { %v3525_v43 = vadd.f32 %v10392_v8, %v3504_v41  ;;  %v3463_v13 = vadd.f32 %v10387_v14, %v3462_v46 }
 0xcd9   : > { %v3542_v3 = vmax.f32 %v3526_v11, 0.0  ;;  %v3507_v47 = vmul.f32 %v10389_v62, %v3468_v22 }
 0xcda   : > { %v3541_v9 = vmax.f32 %v3525_v43, 0.0  ;;  %v3506_v2 = vmul.f32 %v10389_v62, %v3463_v13  ;;  %v7817_v15 = vpop.f32.mrb[76].mxu0 }
 0xcdb   : > { %v3528_v10 = vadd.f32 %v10392_v8, %v3507_v47  ;;  %v3478_v35 = vadd.f32 %v7817_v15, %v10387_v14  ;;  %v3472_v37 = vpop.f32.mrb[77].mxu0  ;;  %v10475_v56 = vadd.f32 %v3542_v3, %v10027_v7 }
 0xcdc   : > { %v10470_v16 = vadd.f32 %v3541_v9, %v10022_v45  ;;  %v3527_v28 = vadd.f32 %v10392_v8, %v3506_v2  ;;  %v3473_v20 = vadd.f32 %v10387_v14, %v3472_v37 }
 0xcdd   : > { %v3544_v25 = vmax.f32 %v3528_v10, 0.0  ;;  %v3509_v24 = vmul.f32 %v10389_v62, %v3478_v35 }
 0xcde   : > { %v3543_v36 = vmax.f32 %v3527_v28, 0.0  ;;  %v3508_v5 = vmul.f32 %v10389_v62, %v3473_v20  ;;  %v7820_v59 = vpop.f32.mrb[78].mxu0  ;;  %7841 = vmatprep.mubr.msk.f32.mxu1 %vm348_vm0, %v10470_v16 }
 0xcdf   : > { %v3530_v49 = vadd.f32 %v10392_v8, %v3509_v24  ;;  %v3488_v44 = vadd.f32 %v7820_v59, %v10387_v14  ;;  %v3482_v48 = vpop.f32.mrb[79].mxu0  ;;  %7842 = vmatmul.mubr.msk.f32.gmra.mrb[88].mxu1 %vm348_vm0, %v10475_v56  ;;  %v10491_v0 = vadd.f32 %v3544_v25, %v10043_v34 }
 0xce0   : > { %v10486_v58 = vadd.f32 %v3543_v36, %v10038_v21  ;;  %v3529_v54 = vadd.f32 %v10392_v8, %v3508_v5  ;;  %v3483_v51 = vadd.f32 %v10387_v14, %v3482_v48 }
 0xce1   : > { %v3546_v29 = vmax.f32 %v3530_v49, 0.0  ;;  %v3511_v52 = vmul.f32 %v10389_v62, %v3488_v44 }
 0xce2   : > { %v3545_v26 = vmax.f32 %v3529_v54, 0.0  ;;  %v3510_v55 = vmul.f32 %v10389_v62, %v3483_v51  ;;  %7844 = vmatprep.mubr.msk.f32.mxu1 %vm348_vm0, %v10486_v58 }
 0xce3   : > { %v3532_v31 = vadd.f32 %v10392_v8, %v3511_v52  ;;  %7845 = vmatmul.mubr.msk.f32.gmra.mrb[90].mxu1 %vm348_vm0, %v10491_v0  ;;  %v10505_v33 = vadd.f32 %v3546_v29, %v10057_v6 }
 0xce4   : > { %v10501_v41 = vadd.f32 %v3545_v26, %v10053_v32  ;;  %v3531_v14 = vadd.f32 %v10392_v8, %v3510_v55  ;;  %v10521_v8 = vld [vmem:[#allocation10 + $0x6] ss:$0 sm:$0xff] }
 0xce5   : > { %v3548_v11 = vmax.f32 %v3532_v31, 0.0 }
 0xce6   : > { %v3547_v22 = vmax.f32 %v3531_v14, 0.0  ;;  %7847 = vmatprep.mubr.msk.f32.mxu1 %vm348_vm0, %v10501_v41 }
 0xce7   : > { %7848 = vmatmul.mubr.msk.f32.gmra.mrb[92].mxu1 %vm348_vm0, %v10505_v33  ;;  %v10515_v46 = vadd.f32 %v3548_v11, %v10067_v61 }
 0xce8   : > { %v10512_v62 = vadd.f32 %v3547_v22, %v10064_v23 }
 0xcea   : > { %7850 = vmatprep.mubr.msk.f32.mxu1 %vm348_vm0, %v10512_v62 }
 0xceb   : > { %7851 = vmatmul.mubr.msk.f32.gmra.mrb[94].mxu1 %vm348_vm0, %v10515_v46 }
 0xd8f   : > { %v7831_v43 = vpop.f32.mrb[80].mxu1 }
 0xd90   : > { %v3769_v13 = vadd.f32 %v7831_v43, %v10521_v8  ;;  %3794 = vrot.lane.b32.xlu1 %v7831_v43, %s9173_s24  ;;  %v3684_v3 = vpop.f32.mrb[81].mxu1 }
 0xd91   : > { %v3768_v47 = vadd.f32 %v10521_v8, %v3684_v3  ;;  %3792 = vrot.lane.b32.xlu0 %v3684_v3, %s9173_s24 }
 0xd93   : > { %v8421_v9 = vpack.c.bf16 %v3769_v13, %v3768_v47  ;;  %v7834_v2 = vpop.f32.mrb[82].mxu1 }
 0xd94   : > { %v3771_v15 = vadd.f32 %v7834_v2, %v10521_v8  ;;  %v3694_v10 = vpop.f32.mrb[83].mxu1 }
 0xd95   : > { %v3770_v35 = vadd.f32 %v10521_v8, %v3694_v10  ;;  %8422 = vmatprep.subr.bf16.mxu1 %v8421_v9  ;;  %3798 = vrot.lane.b32.xlu0 %v7834_v2, %s9173_s24 }
 0xd96   : > { %3796 = vrot.lane.b32.xlu1 %v3694_v10, %s9173_s24  ;;  %8424 = vmatpush3.bf16.msra.mxu1 %v8421_v9 }
 0xd97   : > { %v8425_v37 = vpack.c.bf16 %v3771_v15, %v3770_v35  ;;  %v7837_v28 = vpop.f32.mrb[84].mxu1 }
 0xd98   : > { %v3773_v20 = vadd.f32 %v7837_v28, %v10521_v8  ;;  %v3704_v25 = vpop.f32.mrb[85].mxu1 }
 0xd99   : > { %v3772_v24 = vadd.f32 %v10521_v8, %v3704_v25  ;;  %8426 = vmatprep.subr.bf16.mxu1 %v8425_v37  ;;  %3802 = vrot.lane.b32.xlu0 %v7837_v28, %s9173_s24 }
 0xd9a   : > { %3800 = vrot.lane.b32.xlu1 %v3704_v25, %s9173_s24  ;;  %8428 = vmatpush3.bf16.msra.mxu1 %v8425_v37 }
 0xd9b   : > { %v8429_v36 = vpack.c.bf16 %v3773_v20, %v3772_v24  ;;  %v7840_v5 = vpop.f32.mrb[86].mxu1 }
 0xd9c   : > { %v3775_v59 = vadd.f32 %v7840_v5, %v10521_v8  ;;  %v3714_v49 = vpop.f32.mrb[87].mxu1 }
 0xd9d   : > { %v3774_v44 = vadd.f32 %v10521_v8, %v3714_v49  ;;  %8430 = vmatprep.subr.bf16.mxu1 %v8429_v36  ;;  %3806 = vrot.lane.b32.xlu0 %v7840_v5, %s9173_s24 }
 0xd9e   : > { %3804 = vrot.lane.b32.xlu1 %v3714_v49, %s9173_s24  ;;  %8432 = vmatpush3.bf16.msra.mxu1 %v8429_v36 }
 0xd9f   : > { %v8433_v48 = vpack.c.bf16 %v3775_v59, %v3774_v44 }
 0xda1   : > { %8434 = vmatprep.subr.bf16.mxu1 %v8433_v48 }
 0xda2   : > { %8436 = vmatpush3.bf16.msra.mxu1 %v8433_v48 }
 0xdb2   : > { %v7843_v54 = vpop.f32.mrb[88].mxu1 }
 0xdb3   : > { %v3777_v51 = vadd.f32 %v7843_v54, %v10521_v8  ;;  %4191 = vrot.lane.b32.xlu0 %v7843_v54, %s9173_s24  ;;  %v3724_v29 = vpop.f32.mrb[89].mxu1 }
 0xdb4   : > { %v3776_v52 = vadd.f32 %v10521_v8, %v3724_v29  ;;  %4189 = vrot.lane.b32.xlu1 %v3724_v29, %s9173_s24 }
 0xdb6   : > { %v10543_v26 = vpack.c.bf16 %v3777_v51, %v3776_v52  ;;  %v7846_v55 = vpop.f32.mrb[90].mxu1 }
 0xdb7   : > { %v3779_v31 = vadd.f32 %v7846_v55, %v10521_v8  ;;  %4195 = vrot.lane.b32.xlu0 %v7846_v55, %s9173_s24  ;;  %v3734_v14 = vpop.f32.mrb[91].mxu1 }
 0xdb8   : > { %v3778_v11 = vadd.f32 %v10521_v8, %v3734_v14  ;;  %8462 = vmatprep.subr.bf16.mxu1 %v10543_v26  ;;  %4193 = vrot.lane.b32.xlu1 %v3734_v14, %s9173_s24 }
 0xdba   : > { %v10550_v22 = vpack.c.bf16 %v3779_v31, %v3778_v11  ;;  %v7849_v43 = vpop.f32.mrb[92].mxu1 }
 0xdbb   : > { %v3781_v13 = vadd.f32 %v7849_v43, %v10521_v8  ;;  %4199 = vrot.lane.b32.xlu0 %v7849_v43, %s9173_s24  ;;  %v3744_v3 = vpop.f32.mrb[93].mxu1 }
 0xdbc   : > { %v3780_v47 = vadd.f32 %v10521_v8, %v3744_v3  ;;  %4197 = vrot.lane.b32.xlu1 %v3744_v3, %s9173_s24 }
 0xdbe   : > { %v10556_v9 = vpack.c.bf16 %v3781_v13, %v3780_v47  ;;  %v7852_v2 = vpop.f32.mrb[94].mxu1 }
 0xdbf   : > { %v3783_v15 = vadd.f32 %v7852_v2, %v10521_v8  ;;  %4203 = vrot.lane.b32.xlu0 %v7852_v2, %s9173_s24  ;;  %v3754_v10 = vpop.f32.mrb[95].mxu1 }
 0xdc0   : > { %v3782_v35 = vadd.f32 %v10521_v8, %v3754_v10  ;;  %4201 = vrot.lane.b32.xlu1 %v3754_v10, %s9173_s24 }
 0xdc2   : > { %v10562_v37 = vpack.c.bf16 %v3783_v15, %v3782_v35 }
 0xe02   : > { %v3795_v28 = vpop.permute.xlu1 %3794 }
 0xe03   : > { %v3793_v20 = vpop.permute.xlu0 %3792 }
 0xe04   : > { %v8397_v25 = vpack.c.bf16 %v3795_v28, %v3793_v20  ;;  %7869 = vmatprep.mubr.msk.f32.mxu0 %vm1195_vm1, %v3793_v20 }
 0xe06   : > { %8399 = vmatprep.subr.msk.bf16.mxu0 %vm9664_vm2, %v8397_v25 }
 0xe07   : > { %8402 = vmatpush3.bf16.xpose.msk.msra.mxu0 %vm9664_vm2, %v8397_v25  ;;  %v3799_v24 = vpop.permute.xlu0 %3798 }
 0xe08   : > { %v3797_v36 = vpop.permute.xlu1 %3796 }
 0xe09   : > { %v8403_v5 = vpack.c.bf16 %v3799_v24, %v3797_v36 }
 0xe0b   : > { %8405 = vmatprep.subr.msk.bf16.mxu0 %vm9664_vm2, %v8403_v5  ;;  %v3803_v8 = vpop.permute.xlu0 %3802 }
 0xe0c   : > { %v3801_v59 = vpop.permute.xlu1 %3800 }
 0xe0d   : > { %v8409_v49 = vpack.c.bf16 %v3803_v8, %v3801_v59 }
 0xe0f   : > { %8408 = vmatpush3.bf16.xpose.msk.msra.mxu0 %vm9664_vm2, %v8403_v5  ;;  %v3807_v44 = vpop.permute.xlu0 %3806 }
 0xe10   : > { %8411 = vmatprep.subr.msk.bf16.mxu0 %vm9664_vm2, %v8409_v49  ;;  %v3805_v48 = vpop.permute.xlu1 %3804 }
 0xe11   : > { %v8415_v54 = vpack.c.bf16 %v3807_v44, %v3805_v48 }
 0xe17   : > { %8414 = vmatpush3.bf16.xpose.msk.msra.mxu0 %vm9664_vm2, %v8409_v49 }
 0xe18   : > { %8417 = vmatprep.subr.msk.bf16.mxu0 %vm9664_vm2, %v8415_v54 }
 0xe1f   : > { %8420 = vmatpush3.bf16.xpose.msk.msra.mxu0 %vm9664_vm2, %v8415_v54 }
 0xe25   : > { %v4192_v51 = vpop.permute.xlu0 %4191 }
 0xe26   : > { %7870 = vmatmul.mubr.msk.f32.vlgmr.msra.gmra.mrb[80].mxu0 %vm1195_vm1, %v3795_v28  ;;  %v4190_v29 = vpop.permute.xlu1 %4189 }
 0xe27   : > { %7872 = vmatprep.mubr.msk.f32.mxu0 %vm1195_vm1, %v3797_v36  ;;  %v8437_v52 = vpack.c.bf16 %v4192_v51, %v4190_v29 }
 0xe29   : > { %8439 = vmatprep.subr.msk.bf16.mxu0 %vm9664_vm2, %v8437_v52  ;;  %v4196_v55 = vpop.permute.xlu0 %4195 }
 0xe2a   : > { %7873 = vmatmul.mubr.msk.f32.gmra.mrb[82].mxu0 %vm1195_vm1, %v3799_v24  ;;  %v4194_v31 = vpop.permute.xlu1 %4193 }
 0xe2b   : > { %8442 = vmatpush3.bf16.xpose.msk.msra.mxu0 %vm9664_vm2, %v8437_v52  ;;  %7875 = vmatprep.mubr.msk.f32.mxu0 %vm1195_vm1, %v3801_v59  ;;  %v8443_v14 = vpack.c.bf16 %v4196_v55, %v4194_v31 }
 0xe2d   : > { %8445 = vmatprep.subr.msk.bf16.mxu0 %vm9664_vm2, %v8443_v14  ;;  %v4200_v11 = vpop.permute.xlu0 %4199 }
 0xe2e   : > { %7876 = vmatmul.mubr.msk.f32.gmra.mrb[84].mxu0 %vm1195_vm1, %v3803_v8  ;;  %v4198_v43 = vpop.permute.xlu1 %4197 }
 0xe2f   : > { %7878 = vmatprep.mubr.msk.f32.mxu0 %vm1195_vm1, %v3805_v48  ;;  %v8449_v13 = vpack.c.bf16 %v4200_v11, %v4198_v43 }
 0xe31   : > { %v4204_v3 = vpop.permute.xlu0 %4203 }
 0xe32   : > { %7879 = vmatmul.mubr.msk.f32.gmra.mrb[86].mxu0 %vm1195_vm1, %v3807_v44  ;;  %v4202_v47 = vpop.permute.xlu1 %4201 }
 0xe33   : > { %8448 = vmatpush3.bf16.xpose.msk.msra.mxu0 %vm9664_vm2, %v8443_v14  ;;  %7925 = vmatprep.mubr.msk.f32.mxu0 %vm1195_vm1, %v4190_v29  ;;  %v8455_v2 = vpack.c.bf16 %v4204_v3, %v4202_v47 }
 0xe34   : > { %8451 = vmatprep.subr.msk.bf16.mxu0 %vm9664_vm2, %v8449_v13 }
 0xe3b   : > { %8454 = vmatpush3.bf16.xpose.msk.msra.mxu0 %vm9664_vm2, %v8449_v13 }
 0xe3c   : > { %8457 = vmatprep.subr.msk.bf16.mxu0 %vm9664_vm2, %v8455_v2 }
 0xe43   : > { %8460 = vmatpush3.bf16.xpose.msk.msra.mxu0 %vm9664_vm2, %v8455_v2 }
 0xe4a   : > { %7926 = vmatmul.mubr.msk.f32.vlgmr.msra.gmra.mrb[88].mxu0 %vm1195_vm1, %v4192_v51 }
 0xe4b   : > { %7928 = vmatprep.mubr.msk.f32.mxu0 %vm1195_vm1, %v4194_v31 }
 0xe4e   : > { %7929 = vmatmul.mubr.msk.f32.gmra.mrb[90].mxu0 %vm1195_vm1, %v4196_v55 }
 0xe4f   : > { %7931 = vmatprep.mubr.msk.f32.mxu0 %vm1195_vm1, %v4198_v43 }
 0xe52   : > { %7932 = vmatmul.mubr.msk.f32.gmra.mrb[92].mxu0 %vm1195_vm1, %v4200_v11 }
 0xe53   : > { %7934 = vmatprep.mubr.msk.f32.mxu0 %vm1195_vm1, %v4202_v47 }
 0xe56   : > { %7935 = vmatmul.mubr.msk.f32.gmra.mrb[94].mxu0 %vm1195_vm1, %v4204_v3 }
 0xef9   : > { %v7871_v15 = vpop.f32.mrb[80].mxu0 }
 0xefa   : > { %v3890_v10 = vpop.f32.mrb[81].mxu0  ;;  %v3930_v25 = vsel %vm1317_vm3, %v7871_v15, -inf }
 0xefb   : > { %v3929_v5 = vsel %vm1317_vm3, %v3890_v10, -inf }
 0xefd   : > { %v7874_v35 = vpop.f32.mrb[82].mxu0 }
 0xefe   : > { %v3900_v28 = vpop.f32.mrb[83].mxu0  ;;  %v3932_v48 = vsel %vm1317_vm3, %v7874_v35, -inf }
 0xeff   : > { %v3931_v52 = vsel %vm1317_vm3, %v3900_v28, -inf }
 0xf01   : > { %v7877_v20 = vpop.f32.mrb[84].mxu0 }
 0xf02   : > { %v3935_v24 = vsel %vm1317_vm3, %v7877_v20, -inf  ;;  %v3910_v36 = vpop.f32.mrb[85].mxu0 }
 0xf03   : > { %v3936_v8 = vmax.f32 %v3930_v25, %v3935_v24  ;;  %v3933_v59 = vsel %vm1317_vm3, %v3910_v36, -inf }
 0xf04   : > { %v3934_v49 = vmax.f32 %v3929_v5, %v3933_v59 }
 0xf05   : > { %v7880_v44 = vpop.f32.mrb[86].mxu0 }
 0xf06   : > { %v3941_v54 = vmax.f32 %v3934_v49, %v3936_v8  ;;  %v3939_v51 = vsel %vm1317_vm3, %v7880_v44, -inf  ;;  %v3920_v29 = vpop.f32.mrb[87].mxu0 }
 0xf07   : > { %v3940_v55 = vmax.f32 %v3932_v48, %v3939_v51  ;;  %v3937_v31 = vsel %vm1317_vm3, %v3920_v29, -inf }
 0xf08   : > { %v3938_v14 = vmax.f32 %v3931_v52, %v3937_v31 }
 0xf0a   : > { %v3942_v11 = vmax.f32 %v3938_v14, %v3940_v55 }
 0xf0c   : > { %v3943_v43 = vmax.f32 %v3941_v54, %v3942_v11 }
 0xf0e   : > { %v3944_v13 = vrot.slane %v3943_v43, 4 }
 0xf10   : > { %v3945_v3 = vmax.f32 %v3943_v43, %v3944_v13 }
 0xf12   : > { %v3946_v47 = vrot.slane %v3945_v3, 2 }
 0xf14   : > { %v3947_v2 = vmax.f32 %v3945_v3, %v3946_v47 }
 0xf16   : > { %v3948_v25 = vrot.slane %v3947_v2, 1 }
 0xf18   : > { %v3949_v24 = vmax.f32 %v3947_v2, %v3948_v25 }
 0xf1a   : > { %v3955_v5 = vsub.f32 %v7877_v20, %v3949_v24  ;;  %v3956_v59 = vsub.f32 %v3920_v29, %v3949_v24  ;;  %v3957_v8 = vsub.f32 %v7880_v44, %v3949_v24  ;;  %v3950_v49 = vsub.f32 %v3890_v10, %v3949_v24 }
 0xf1b   : > { %v3951_v23 = vsub.f32 %v7871_v15, %v3949_v24  ;;  %v3952_v61 = vsub.f32 %v3900_v28, %v3949_v24  ;;  %v3953_v32 = vsub.f32 %v7874_v35, %v3949_v24  ;;  %v3954_v6 = vsub.f32 %v3910_v36, %v3949_v24 }
 0xf1c   : > { %v3958_v51 = vmul.f32 1.442695, %v3950_v49  ;;  %v3968_v15 = vmul.f32 1.442695, %v3955_v5  ;;  %v3970_v10 = vmul.f32 1.442695, %v3956_v59 }
 0xf1d   : > { %v10620_v48 = vpop.f32.mrb[88].mxu0  ;;  %v3960_v52 = vmul.f32 1.442695, %v3951_v23  ;;  %v3962_v54 = vmul.f32 1.442695, %v3952_v61 }
 0xf1e   : > { %v10622_v55 = vpop.f32.mrb[89].mxu0  ;;  %v3964_v31 = vmul.f32 1.442695, %v3953_v32  ;;  %8812 = vpow2.f32 %v3958_v51  ;;  %v3966_v20 = vmul.f32 1.442695, %v3954_v6  ;;  %v4327_v23 = vsel %vm1317_vm3, %v10620_v48, -inf }
 0xf1f   : > { %8814 = vpow2.f32 %v3960_v52  ;;  %v3972_v28 = vmul.f32 1.442695, %v3957_v8  ;;  %v4326_v6 = vsel %vm1317_vm3, %v10622_v55, -inf }
 0xf20   : > { %8816 = vpow2.f32 %v3962_v54 }
 0xf21   : > { %v10624_v14 = vpop.f32.mrb[90].mxu0  ;;  %8818 = vpow2.f32 %v3964_v31 }
 0xf22   : > { %v10626_v29 = vpop.f32.mrb[91].mxu0  ;;  %8820 = vpow2.f32 %v3966_v20  ;;  %v4329_v3 = vsel %vm1317_vm3, %v10624_v14, -inf }
 0xf23   : > { %8822 = vpow2.f32 %v3968_v15  ;;  %v4328_v5 = vsel %vm1317_vm3, %v10626_v29, -inf }
 0xf24   : > { %8824 = vpow2.f32 %v3970_v10 }
 0xf25   : > { %v10628_v35 = vpop.f32.mrb[92].mxu0  ;;  %8826 = vpow2.f32 %v3972_v28 }
 0xf26   : > { %v4332_v32 = vsel %vm1317_vm3, %v10628_v35, -inf  ;;  %v10634_v61 = vpop.f32.mrb[93].mxu0 }
 0xf27   : > { %v4333_v36 = vmax.f32 %v4327_v23, %v4332_v32  ;;  %v4330_v44 = vsel %vm1317_vm3, %v10634_v61, -inf }
 0xf28   : > { %v4331_v11 = vmax.f32 %v4326_v6, %v4330_v44  ;;  %v10642_v13 = vpop.eup %8812 }
 0xf29   : > { %v10640_v43 = vpop.f32.mrb[94].mxu0  ;;  %v10648_v24 = vpop.eup %8814  ;;  %v3974_v49 = vsel %vm1317_vm3, %v10642_v13, 0.0 }
 0xf2a   : > { %v4338_v47 = vmax.f32 %v4331_v11, %v4333_v36  ;;  %v4336_v2 = vsel %vm1317_vm3, %v10640_v43, -inf  ;;  %v4317_v25 = vpop.f32.mrb[95].mxu0  ;;  %v10655_v51 = vpop.eup %8816  ;;  %v3975_v54 = vsel %vm1317_vm3, %v10648_v24, 0.0 }
 0xf2b   : > { %v4337_v59 = vmax.f32 %v4329_v3, %v4336_v2  ;;  %v4334_v8 = vsel %vm1317_vm3, %v4317_v25, -inf  ;;  %v10659_v31 = vpop.eup %8818  ;;  %v3976_v20 = vadd.f32 %v3975_v54, %v3974_v49  ;;  %v3977_v10 = vsel %vm1317_vm3, %v10655_v51, 0.0 }
 0xf2c   : > { %v4335_v52 = vmax.f32 %v4328_v5, %v4334_v8  ;;  %v10663_v28 = vpop.eup %8820  ;;  %v3979_v6 = vsel %vm1317_vm3, %v10659_v31, 0.0 }
 0xf2d   : > { %v3978_v23 = vadd.f32 %v3977_v10, %v3976_v20  ;;  %v10667_v36 = vpop.eup %8822  ;;  %v3981_v3 = vsel %vm1317_vm3, %v10663_v28, 0.0 }
 0xf2e   : > { %v4339_v15 = vmax.f32 %v4335_v52, %v4337_v59  ;;  %v10671_v2 = vpop.eup %8824  ;;  %v3983_v49 = vsel %vm1317_vm3, %v10667_v36, 0.0 }
 0xf2f   : > { %v3980_v44 = vadd.f32 %v3979_v6, %v3978_v23  ;;  %v10673_v59 = vpop.eup %8826  ;;  %v3985_v52 = vsel %vm1317_vm3, %v10671_v2, 0.0 }
 0xf30   : > { %v4340_v32 = vmax.f32 %v4338_v47, %v4339_v15  ;;  %v3987_v10 = vsel %vm1317_vm3, %v10673_v59, 0.0 }
 0xf31   : > { %v3982_v5 = vadd.f32 %v3981_v3, %v3980_v44 }
 0xf32   : > { %v4341_v11 = vrot.slane %v4340_v32, 4 }
 0xf33   : > { %v3984_v47 = vadd.f32 %v3983_v49, %v3982_v5 }
 0xf34   : > { %v4342_v8 = vmax.f32 %v4340_v32, %v4341_v11 }
 0xf35   : > { %v3986_v20 = vadd.f32 %v3985_v52, %v3984_v47 }
 0xf36   : > { %v4343_v54 = vrot.slane %v4342_v8, 2 }
 0xf37   : > { %v3988_v23 = vadd.f32 %v3987_v10, %v3986_v20 }
 0xf38   : > { %v4344_v15 = vmax.f32 %v4342_v8, %v4343_v54 }
 0xf39   : > { %v3989_v21 = vrot.slane %v3988_v23, 4 }
 0xf3a   : > { %v4345_v6 = vrot.slane %v4344_v15, 1 }
 0xf3b   : > { %v3990_v3 = vadd.f32 %v3989_v21, %v3988_v23 }
 0xf3c   : > { %v4346_v44 = vmax.f32 %v4344_v15, %v4345_v6 }
 0xf3e   : > { %v4347_v32 = vsub.f32 %v10622_v55, %v4346_v44  ;;  %v4348_v11 = vsub.f32 %v10620_v48, %v4346_v44  ;;  %v4349_v5 = vsub.f32 %v10626_v29, %v4346_v44  ;;  %v4350_v49 = vsub.f32 %v10624_v14, %v4346_v44 }
 0xf3f   : > { %v4351_v34 = vsub.f32 %v10634_v61, %v4346_v44  ;;  %v4352_v8 = vsub.f32 %v10628_v35, %v4346_v44  ;;  %v4353_v47 = vsub.f32 %v4317_v25, %v4346_v44  ;;  %v4354_v52 = vsub.f32 %v10640_v43, %v4346_v44 }
 0xf40   : > { %v4355_v54 = vmul.f32 1.442695, %v4347_v32  ;;  %v4357_v20 = vmul.f32 1.442695, %v4348_v11  ;;  %v4359_v10 = vmul.f32 1.442695, %v4349_v5 }
 0xf41   : > { %v4361_v15 = vmul.f32 1.442695, %v4350_v49  ;;  %v4363_v21 = vmul.f32 1.442695, %v4351_v34  ;;  %v3991_v55 = vrot.slane %v3990_v3, 2 }
 0xf42   : > { %8828 = vpow2.f32 %v4355_v54  ;;  %v4365_v48 = vmul.f32 1.442695, %v4352_v8  ;;  %v4367_v61 = vmul.f32 1.442695, %v4353_v47  ;;  %v4369_v25 = vmul.f32 1.442695, %v4354_v52 }
 0xf43   : > { %8830 = vpow2.f32 %v4357_v20  ;;  %v3992_v29 = vadd.f32 %v3991_v55, %v3990_v3 }
 0xf44   : > { %8832 = vpow2.f32 %v4359_v10 }
 0xf45   : > { %8834 = vpow2.f32 %v4361_v15  ;;  %v3993_v14 = vrot.slane %v3992_v29, 1 }
 0xf46   : > { %8836 = vpow2.f32 %v4363_v21 }
 0xf47   : > { %8838 = vpow2.f32 %v4365_v48  ;;  %v3994_v35 = vadd.f32 %v3993_v14, %v3992_v29 }
 0xf49   : > { %8840 = vrcp.f32 %v3994_v35 }
 0xf4a   : > { %8842 = vpow2.f32 %v4367_v61 }
 0xf4b   : > { %8844 = vpow2.f32 %v4369_v25 }
 0xf4c   : > { %v8829_v43 = vpop.eup %8828 }
 0xf4d   : > { %v8831_v23 = vpop.eup %8830  ;;  %v4371_v6 = vsel %vm1317_vm3, %v8829_v43, 0.0 }
 0xf4e   : > { %v8833_v34 = vpop.eup %8832  ;;  %v4372_v44 = vsel %vm1317_vm3, %v8831_v23, 0.0 }
 0xf4f   : > { %v8835_v32 = vpop.eup %8834  ;;  %v4373_v11 = vadd.f32 %v4372_v44, %v4371_v6  ;;  %v4374_v5 = vsel %vm1317_vm3, %v8833_v34, 0.0 }
 0xf50   : > { %v8837_v3 = vpop.eup %8836  ;;  %v4376_v47 = vsel %vm1317_vm3, %v8835_v32, 0.0 }
 0xf51   : > { %v8839_v49 = vpop.eup %8838  ;;  %v4375_v8 = vadd.f32 %v4374_v5, %v4373_v11  ;;  %v4378_v20 = vsel %vm1317_vm3, %v8837_v3, 0.0 }
 0xf52   : > { %v4380_v10 = vsel %vm1317_vm3, %v8839_v49, 0.0 }
 0xf53   : > { %v4377_v52 = vadd.f32 %v4376_v47, %v4375_v8  ;;  %v8841_v54 = vpop.eup %8840 }
 0xf54   : > { %v8843_v15 = vpop.eup %8842  ;;  %v10695_v55 = vmul.f32 %v8841_v54, %v10648_v24  ;;  %v10698_v48 = vmul.f32 %v8841_v54, %v10642_v13  ;;  %v10701_v29 = vmul.f32 %v8841_v54, %v10655_v51  ;;  %v10704_v14 = vmul.f32 %v8841_v54, %v10659_v31 }
 0xf55   : > { %v4379_v21 = vadd.f32 %v4378_v20, %v4377_v52  ;;  %v10707_v61 = vmul.f32 %v8841_v54, %v10663_v28  ;;  %v10710_v35 = vmul.f32 %v8841_v54, %v10667_v36  ;;  %v10713_v25 = vmul.f32 %v8841_v54, %v10671_v2  ;;  %v8845_v24 = vpop.eup %8844 }
 0xf56   : > { %v4007_v13 = vsel %vm1317_vm3, %v10695_v55, 0.0  ;;  %v4004_v51 = vsel %vm1317_vm3, %v10698_v48, 0.0  ;;  %v4382_v31 = vsel %vm1317_vm3, %v8843_v15, 0.0  ;;  %v10721_v44 = vmul.f32 %v8841_v54, %v10673_v59 }
 0xf57   : > { %v4381_v6 = vadd.f32 %v4380_v10, %v4379_v21  ;;  %4008 = vadd.xlane.f32.xlu0 %v4007_v13  ;;  %4005 = vadd.xlane.f32.xlu1 %v4004_v51  ;;  %v4384_v36 = vsel %vm1317_vm3, %v8845_v24, 0.0  ;;  %v4010_v11 = vsel %vm1317_vm3, %v10701_v29, 0.0  ;;  %v4013_v5 = vsel %vm1317_vm3, %v10704_v14, 0.0 }
 0xf58   : > { %v4016_v52 = vsel %vm1317_vm3, %v10707_v61, 0.0  ;;  %v4019_v59 = vsel %vm1317_vm3, %v10710_v35, 0.0  ;;  %v4022_v10 = vsel %vm1317_vm3, %v10713_v25, 0.0  ;;  %v4025_v21 = vsel %vm1317_vm3, %v10721_v44, 0.0 }
 0xf59   : > { %v4383_v28 = vadd.f32 %v4382_v31, %v4381_v6 }
 0xf5b   : > { %v4385_v2 = vadd.f32 %v4384_v36, %v4383_v28  ;;  %4011 = vadd.xlane.f32.xlu0 %v4010_v11  ;;  %4014 = vadd.xlane.f32.xlu1 %v4013_v5 }
 0xf5d   : > { %v4386_v8 = vrot.slane %v4385_v2, 4 }
 0xf5f   : > { %v4387_v47 = vadd.f32 %v4386_v8, %v4385_v2  ;;  %4017 = vadd.xlane.f32.xlu0 %v4016_v52  ;;  %4020 = vadd.xlane.f32.xlu1 %v4019_v59 }
 0xf61   : > { %v4388_v54 = vrot.slane %v4387_v47, 2 }
 0xf63   : > { %v4389_v20 = vadd.f32 %v4388_v54, %v4387_v47  ;;  %4023 = vadd.xlane.f32.xlu0 %v4022_v10  ;;  %4026 = vadd.xlane.f32.xlu1 %v4025_v21 }
 0xf65   : > { %v4390_v6 = vrot.slane %v4389_v20, 1 }
 0xf67   : > { %v4391_v13 = vadd.f32 %v4390_v6, %v4389_v20 }
 0xf69   : > { %8846 = vrcp.f32 %v4391_v13 }
 0xf73   : > { %v8847_v51 = vpop.eup %8846 }
 0xf74   : > { %v10736_v31 = vmul.f32 %v8847_v51, %v8831_v23  ;;  %v10738_v28 = vmul.f32 %v8847_v51, %v8829_v43  ;;  %v10740_v36 = vmul.f32 %v8847_v51, %v8835_v32  ;;  %v10742_v2 = vmul.f32 %v8847_v51, %v8833_v34 }
 0xf75   : > { %v10744_v11 = vmul.f32 %v8847_v51, %v8839_v49  ;;  %v10746_v5 = vmul.f32 %v8847_v51, %v8837_v3  ;;  %v10748_v8 = vmul.f32 %v8847_v51, %v8845_v24  ;;  %v10750_v47 = vmul.f32 %v8847_v51, %v8843_v15 }
 0xf76   : > { %v4404_v52 = vsel %vm1317_vm3, %v10736_v31, 0.0  ;;  %v4401_v23 = vsel %vm1317_vm3, %v10738_v28, 0.0  ;;  %v4410_v43 = vsel %vm1317_vm3, %v10740_v36, 0.0  ;;  %v4407_v34 = vsel %vm1317_vm3, %v10742_v2, 0.0 }
 0xf77   : > { %4405 = vadd.xlane.f32.xlu1 %v4404_v52  ;;  %4402 = vadd.xlane.f32.xlu0 %v4401_v23  ;;  %v4416_v32 = vsel %vm1317_vm3, %v10744_v11, 0.0  ;;  %v4413_v3 = vsel %vm1317_vm3, %v10746_v5, 0.0  ;;  %v4422_v49 = vsel %vm1317_vm3, %v10748_v8, 0.0  ;;  %v4419_v15 = vsel %vm1317_vm3, %v10750_v47, 0.0 }
 0xf7b   : > { %4411 = vadd.xlane.f32.xlu1 %v4410_v43  ;;  %4408 = vadd.xlane.f32.xlu0 %v4407_v34 }
 0xf7f   : > { %4417 = vadd.xlane.f32.xlu1 %v4416_v32  ;;  %4414 = vadd.xlane.f32.xlu0 %v4413_v3 }
 0xf83   : > { %4423 = vadd.xlane.f32.xlu1 %v4422_v49  ;;  %4420 = vadd.xlane.f32.xlu0 %v4419_v15 }
 0xfe4   : > { %v4009_v24 = vpop.xlane.xlu0 %4008  ;;  %v4006_v59 = vpop.xlane.xlu1 %4005 }
 0xfe5   : > { %v4029_v54 = vadd.f32 1e-09, %v4009_v24  ;;  %v4028_v20 = vadd.f32 1e-09, %v4006_v59 }
 0xfe7   : > { %8848 = vrcp.f32 %v4029_v54 }
 0xfe8   : > { %8850 = vrcp.f32 %v4028_v20  ;;  %v4012_v10 = vpop.xlane.xlu0 %4011  ;;  %v4015_v21 = vpop.xlane.xlu1 %4014 }
 0xfe9   : > { %v4030_v6 = vadd.f32 1e-09, %v4012_v10  ;;  %v4031_v13 = vadd.f32 1e-09, %v4015_v21 }
 0xfeb   : > { %8852 = vrcp.f32 %v4030_v6 }
 0xfec   : > { %8854 = vrcp.f32 %v4031_v13  ;;  %v4018_v51 = vpop.xlane.xlu0 %4017  ;;  %v4021_v52 = vpop.xlane.xlu1 %4020 }
 0xfed   : > { %v4032_v23 = vadd.f32 1e-09, %v4018_v51  ;;  %v4033_v43 = vadd.f32 1e-09, %v4021_v52 }
 0xfef   : > { %8856 = vrcp.f32 %v4032_v23 }
 0xff0   : > { %8858 = vrcp.f32 %v4033_v43  ;;  %v4024_v34 = vpop.xlane.xlu0 %4023  ;;  %v4027_v32 = vpop.xlane.xlu1 %4026 }
 0xff1   : > { %v8849_v3 = vpop.eup %8848  ;;  %v4034_v49 = vadd.f32 1e-09, %v4024_v34  ;;  %v4035_v15 = vadd.f32 1e-09, %v4027_v32 }
 0xff2   : > { %v8851_v24 = vpop.eup %8850  ;;  %v4045_v59 = vmul.f32 %v8849_v3, %v10695_v55 }
 0xff3   : > { %8860 = vrcp.f32 %v4034_v49  ;;  %v4044_v54 = vmul.f32 %v8851_v24, %v10698_v48 }
 0xff4   : > { %8862 = vrcp.f32 %v4035_v15 }
 0xff5   : > { %v8853_v20 = vpop.eup %8852  ;;  %7897 = vmatprep.mubr.msk.f32.mxu1 %vm1317_vm3, %v4044_v54 }
 0xff6   : > { %v8855_v10 = vpop.eup %8854  ;;  %7898 = vmatmul.mubr.msk.f32.vlgmr.msra.gmra.mrb[96].mxu1 %vm1317_vm3, %v4045_v59  ;;  %v4046_v21 = vmul.f32 %v8853_v20, %v10701_v29  ;;  %v4595_v29 = vld [vmem:[#allocation8 + $0x40] sm:$0xff]  ;;  %v4597_v20 = vld [vmem:[#allocation8 + $0x50] sm:$0xff] }
 0xff7   : > { %8464 = vmatpush3.bf16.msra.mxu1 %v10543_v26  ;;  %v4047_v6 = vmul.f32 %v8855_v10, %v10704_v14  ;;  %v4596_v14 = vld [vmem:[#allocation8 + $0x48] sm:$0xff]  ;;  %v4598_v10 = vld [vmem:[#allocation8 + $0x58] sm:$0xff] }
 0xff8   : > { %8466 = vmatprep.subr.bf16.mxu1 %v10550_v22  ;;  %7900 = vmatprep.mubr.msk.f32.mxu1 %vm1317_vm3, %v4046_v21 }
 0xff9   : > { %v8857_v55 = vpop.eup %8856 }
 0xffa   : > { %v8859_v13 = vpop.eup %8858  ;;  %7901 = vmatmul.mubr.msk.f32.gmra.mrb[98].mxu1 %vm1317_vm3, %v4047_v6  ;;  %v4048_v48 = vmul.f32 %v8857_v55, %v10707_v61 }
 0xffb   : > { %8468 = vmatpush3.bf16.msra.mxu1 %v10550_v22  ;;  %v4049_v51 = vmul.f32 %v8859_v13, %v10710_v35  ;;  %v8477_v22 = vpack.c.bf16 %v4596_v14, %v4595_v29 }
 0xffc   : > { %8470 = vmatprep.subr.bf16.mxu1 %v10556_v9  ;;  %7903 = vmatprep.mubr.msk.f32.mxu1 %vm1317_vm3, %v4048_v48 }
 0xffd   : > { %v8861_v26 = vpop.eup %8860 }
 0xffe   : > { %v8863_v52 = vpop.eup %8862  ;;  %7904 = vmatmul.mubr.msk.f32.gmra.mrb[100].mxu1 %vm1317_vm3, %v4049_v51  ;;  %v4050_v23 = vmul.f32 %v8861_v26, %v10713_v25  ;;  %v8481_v26 = vpack.c.bf16 %v4598_v10, %v4597_v20 }
 0xfff   : > { %8472 = vmatpush3.bf16.msra.mxu1 %v10556_v9  ;;  %v4051_v61 = vmul.f32 %v8863_v52, %v10721_v44 }
0x1000   : > { %8474 = vmatprep.subr.bf16.mxu1 %v10562_v37  ;;  %7906 = vmatprep.mubr.msk.f32.mxu1 %vm1317_vm3, %v4050_v23 }
0x1002   : > { %7907 = vmatmul.mubr.msk.f32.gmra.mrb[102].mxu1 %vm1317_vm3, %v4051_v61 }
0x1003   : > { %8476 = vmatpush3.bf16.msra.mxu1 %v10562_v37 }
0x1004   : > { %v4403_v35 = vpop.xlane.xlu0 %4402  ;;  %v4406_v43 = vpop.xlane.xlu1 %4405  ;;  %8478 = vmatprep.subr.bf16.mxu1 %v8477_v22 }
0x1005   : > { %v4425_v34 = vadd.f32 1e-09, %v4403_v35  ;;  %v4426_v32 = vadd.f32 1e-09, %v4406_v43 }
0x1007   : > { %8864 = vrcp.f32 %v4425_v34  ;;  %v4872_v34 = vld [vmem:[#allocation7 + $0x60] sm:$0xff] }
0x1008   : > { %8866 = vrcp.f32 %v4426_v32  ;;  %v4409_v25 = vpop.xlane.xlu0 %4408  ;;  %v4412_v9 = vpop.xlane.xlu1 %4411  ;;  %v4873_v32 = vld [vmem:[#allocation7 + $0x68] sm:$0xff] }
0x1009   : > { %v4427_v3 = vadd.f32 1e-09, %v4409_v25  ;;  %v4428_v44 = vadd.f32 1e-09, %v4412_v9 }
0x100b   : > { %8868 = vrcp.f32 %v4427_v3 }
0x100c   : > { %8870 = vrcp.f32 %v4428_v44  ;;  %v4415_v49 = vpop.xlane.xlu0 %4414  ;;  %v4418_v15 = vpop.xlane.xlu1 %4417 }
0x100d   : > { %v4429_v24 = vadd.f32 1e-09, %v4415_v49  ;;  %v4430_v59 = vadd.f32 1e-09, %v4418_v15 }
0x100f   : > { %8872 = vrcp.f32 %v4429_v24 }
0x1010   : > { %8874 = vrcp.f32 %v4430_v59  ;;  %v4421_v37 = vpop.xlane.xlu0 %4420  ;;  %v4424_v54 = vpop.xlane.xlu1 %4423 }
0x1011   : > { %v8865_v21 = vpop.eup %8864  ;;  %v4431_v6 = vadd.f32 1e-09, %v4421_v37  ;;  %v4432_v55 = vadd.f32 1e-09, %v4424_v54 }
0x1012   : > { %v8867_v13 = vpop.eup %8866  ;;  %v4441_v48 = vmul.f32 %v8865_v21, %v10738_v28 }
0x1013   : > { %v4442_v51 = vmul.f32 %v8867_v13, %v10736_v31  ;;  %8876 = vrcp.f32 %v4431_v6 }
0x1014   : > { %8878 = vrcp.f32 %v4432_v55  ;;  %7953 = vmatprep.mubr.msk.f32.mxu1 %vm1317_vm3, %v4441_v48 }
0x1015   : > { %v8869_v29 = vpop.eup %8868  ;;  %7954 = vmatmul.mubr.msk.f32.vlgmr.msra.gmra.mrb[104].mxu1 %vm1317_vm3, %v4442_v51 }
0x1016   : > { %v8871_v14 = vpop.eup %8870  ;;  %v4443_v52 = vmul.f32 %v8869_v29, %v10742_v2  ;;  %8480 = vmatpush3.bf16.msra.mxu1 %v8477_v22 }
0x1017   : > { %v4444_v23 = vmul.f32 %v8871_v14, %v10740_v36  ;;  %8482 = vmatprep.subr.bf16.mxu1 %v8481_v26 }
0x1018   : > { %7956 = vmatprep.mubr.msk.f32.mxu1 %vm1317_vm3, %v4443_v52 }
0x1019   : > { %v8873_v28 = vpop.eup %8872  ;;  %7957 = vmatmul.mubr.msk.f32.gmra.mrb[106].mxu1 %vm1317_vm3, %v4444_v23 }
0x101a   : > { %v8875_v31 = vpop.eup %8874  ;;  %v4445_v61 = vmul.f32 %v8873_v28, %v10746_v5  ;;  %8484 = vmatpush3.bf16.msra.mxu1 %v8481_v26  ;;  %v8485_v5 = vpack.c.bf16 %v4873_v32, %v4872_v34  ;;  %v10839_v32 = vld [vmem:[#allocation10 + $0xa] ss:$0 sm:$0xff] }
0x101b   : > { %v4446_v35 = vmul.f32 %v8875_v31, %v10744_v11 }
0x101c   : > { %7959 = vmatprep.mubr.msk.f32.mxu1 %vm1317_vm3, %v4445_v61  ;;  %8486 = vmatprep.subr.bf16.mxu0 %v8485_v5 }
0x101d   : > { %v8877_v43 = vpop.eup %8876  ;;  %7960 = vmatmul.mubr.msk.f32.gmra.mrb[108].mxu1 %vm1317_vm3, %v4446_v35  ;;  %8488 = vmatpush3.bf16.msra.mxu0 %v8485_v5 }
0x101e   : > { %v8879_v2 = vpop.eup %8878  ;;  %v4447_v36 = vmul.f32 %v8877_v43, %v10750_v47 }
0x101f   : > { %v4448_v22 = vmul.f32 %v8879_v2, %v10748_v8 }
0x1020   : > { %7962 = vmatprep.mubr.msk.f32.mxu1 %vm1317_vm3, %v4447_v36  ;;  %v4874_v36 = vld [vmem:[#allocation7 + $0x70] sm:$0xff] }
0x1021   : > { %7963 = vmatmul.mubr.msk.f32.gmra.mrb[110].mxu1 %vm1317_vm3, %v4448_v22  ;;  %v4875_v22 = vld [vmem:[#allocation7 + $0x78] sm:$0xff] }
0x1022   : > { %v8489_v34 = vpack.c.bf16 %v4875_v22, %v4874_v36 }
0x1024   : > { %8490 = vmatprep.subr.bf16.mxu0 %v8489_v34 }
0x1025   : > { %8492 = vmatpush3.bf16.msra.mxu0 %v8489_v34 }
0x10c9   : > { %v7899_v11 = vpop.f32.mrb[96].mxu1 }
0x10ca   : > { %v4142_v25 = vpop.f32.mrb[97].mxu1  ;;  %v4579_v3 = vsub.f32 %v10411_v17, %v7899_v11  ;;  %v10841_v11 = vld [vmem:[#allocation10 + $0xe] ss:$0 sm:$0xff] }
0x10cb   : > { %v4578_v9 = vsub.f32 %v10406_v4, %v4142_v25 }
0x10cd   : > { %v7902_v44 = vpop.f32.mrb[98].mxu1  ;;  %7973 = vmatprep.mubr.msk.f32.mxu1 %vm348_vm0, %v4578_v9 }
0x10ce   : > { %v4152_v47 = vpop.f32.mrb[99].mxu1  ;;  %7974 = vmatmul.mubr.msk.f32.vlgmr.msra.gmra.mrb[112].mxu1 %vm348_vm0, %v4579_v3  ;;  %v4581_v49 = vsub.f32 %v10427_v57, %v7902_v44  ;;  %v10844_v3 = vld [vmem:[#allocation10 + $0x12] ss:$0 sm:$0xff] }
0x10cf   : > { %v4580_v8 = vsub.f32 %v10422_v30, %v4152_v47 }
0x10d1   : > { %v7905_v15 = vpop.f32.mrb[100].mxu1  ;;  %7976 = vmatprep.mubr.msk.f32.mxu1 %vm348_vm0, %v4580_v8 }
0x10d2   : > { %v4162_v24 = vpop.f32.mrb[101].mxu1  ;;  %7977 = vmatmul.mubr.msk.f32.gmra.mrb[114].mxu1 %vm348_vm0, %v4581_v49  ;;  %v4583_v37 = vsub.f32 %v10441_v39, %v7905_v15 }
0x10d3   : > { %v4582_v59 = vsub.f32 %v10437_v40, %v4162_v24 }
0x10d5   : > { %v7908_v54 = vpop.f32.mrb[102].mxu1  ;;  %7979 = vmatprep.mubr.msk.f32.mxu1 %vm348_vm0, %v4582_v59 }
0x10d6   : > { %v4172_v20 = vpop.f32.mrb[103].mxu1  ;;  %7980 = vmatmul.mubr.msk.f32.gmra.mrb[116].mxu1 %vm348_vm0, %v4583_v37  ;;  %v4585_v21 = vsub.f32 %v10451_v42, %v7908_v54 }
0x10d7   : > { %v4584_v10 = vsub.f32 %v10448_v1, %v4172_v20 }
0x10d9   : > { %7982 = vmatprep.mubr.msk.f32.mxu1 %vm348_vm0, %v4584_v10 }
0x10da   : > { %7983 = vmatmul.mubr.msk.f32.gmra.mrb[118].mxu1 %vm348_vm0, %v4585_v21 }
0x10e8   : > { %v7955_v6 = vpop.f32.mrb[104].mxu1 }
0x10e9   : > { %v4539_v55 = vpop.f32.mrb[105].mxu1  ;;  %v4587_v48 = vsub.f32 %v10475_v56, %v7955_v6 }
0x10ea   : > { %v4586_v13 = vsub.f32 %v10470_v16, %v4539_v55 }
0x10ec   : > { %v7958_v51 = vpop.f32.mrb[106].mxu1  ;;  %7985 = vmatprep.mubr.msk.f32.mxu1 %vm348_vm0, %v4586_v13 }
0x10ed   : > { %v4549_v26 = vpop.f32.mrb[107].mxu1  ;;  %7986 = vmatmul.mubr.msk.f32.gmra.mrb[120].mxu1 %vm348_vm0, %v4587_v48  ;;  %v4589_v14 = vsub.f32 %v10491_v0, %v7958_v51 }
0x10ee   : > { %v4588_v29 = vsub.f32 %v10486_v58, %v4549_v26 }
0x10f0   : > { %v7961_v52 = vpop.f32.mrb[108].mxu1  ;;  %7988 = vmatprep.mubr.msk.f32.mxu1 %vm348_vm0, %v4588_v29 }
0x10f1   : > { %v4559_v23 = vpop.f32.mrb[109].mxu1  ;;  %7989 = vmatmul.mubr.msk.f32.gmra.mrb[122].mxu1 %vm348_vm0, %v4589_v14  ;;  %v4591_v31 = vsub.f32 %v10505_v33, %v7961_v52 }
0x10f2   : > { %v4590_v28 = vsub.f32 %v10501_v41, %v4559_v23 }
0x10f4   : > { %v7964_v61 = vpop.f32.mrb[110].mxu1  ;;  %7991 = vmatprep.mubr.msk.f32.mxu1 %vm348_vm0, %v4590_v28 }
0x10f5   : > { %v4569_v35 = vpop.f32.mrb[111].mxu1  ;;  %7992 = vmatmul.mubr.msk.f32.gmra.mrb[124].mxu1 %vm348_vm0, %v4591_v31  ;;  %v4593_v2 = vsub.f32 %v10515_v46, %v7964_v61 }
0x10f6   : > { %v4592_v43 = vsub.f32 %v10512_v62, %v4569_v35 }
0x10f8   : > { %7994 = vmatprep.mubr.msk.f32.mxu1 %vm348_vm0, %v4592_v43 }
0x10f9   : > { %7995 = vmatmul.mubr.msk.f32.gmra.mrb[126].mxu1 %vm348_vm0, %v4593_v2 }
0x11a1   : > { %v7975_v5 = vpop.f32.mrb[112].mxu1 }
0x11a2   : > { %v4724_v25 = vadd.f32 %v7975_v5, %v10839_v32  ;;  %v4718_v9 = vpop.f32.mrb[113].mxu1 }
0x11a3   : > { %v4719_v44 = vadd.f32 %v10839_v32, %v4718_v9 }
0x11a4   : > { %v4803_v47 = vmul.f32 %v10841_v11, %v4724_v25 }
0x11a5   : > { %v4802_v8 = vmul.f32 %v10841_v11, %v4719_v44  ;;  %v7978_v49 = vpop.f32.mrb[114].mxu1 }
0x11a6   : > { %v4824_v15 = vadd.f32 %v10844_v3, %v4803_v47  ;;  %v4734_v24 = vadd.f32 %v7978_v49, %v10839_v32  ;;  %v4728_v59 = vpop.f32.mrb[115].mxu1 }
0x11a7   : > { %v4823_v37 = vadd.f32 %v10844_v3, %v4802_v8  ;;  %v4729_v54 = vadd.f32 %v10839_v32, %v4728_v59 }
0x11a8   : > { %v4840_v20 = vmax.f32 %v4824_v15, 0.0  ;;  %v4805_v10 = vmul.f32 %v10841_v11, %v4734_v24 }
0x11a9   : > { %v4839_v21 = vmax.f32 %v4823_v37, 0.0  ;;  %v4804_v6 = vmul.f32 %v10841_v11, %v4729_v54  ;;  %v7981_v55 = vpop.f32.mrb[116].mxu1 }
0x11aa   : > { %v4826_v13 = vadd.f32 %v10844_v3, %v4805_v10  ;;  %v4744_v48 = vadd.f32 %v7981_v55, %v10839_v32  ;;  %v4738_v51 = vpop.f32.mrb[117].mxu1  ;;  %v10863_v52 = vadd.f32 %v4840_v20, %v10411_v17 }
0x11ab   : > { %v10858_v26 = vadd.f32 %v4839_v21, %v10406_v4  ;;  %v4825_v29 = vadd.f32 %v10844_v3, %v4804_v6  ;;  %v4739_v14 = vadd.f32 %v10839_v32, %v4738_v51 }
0x11ac   : > { %v4842_v23 = vmax.f32 %v4826_v13, 0.0  ;;  %v4807_v28 = vmul.f32 %v10841_v11, %v4744_v48 }
0x11ad   : > { %v4841_v31 = vmax.f32 %v4825_v29, 0.0  ;;  %v4806_v61 = vmul.f32 %v10841_v11, %v4739_v14  ;;  %v7984_v35 = vpop.f32.mrb[118].mxu1  ;;  %8005 = vmatprep.mubr.msk.f32.mxu0 %vm348_vm0, %v10858_v26 }
0x11ae   : > { %v4828_v43 = vadd.f32 %v10844_v3, %v4807_v28  ;;  %v4754_v2 = vadd.f32 %v7984_v35, %v10839_v32  ;;  %v4748_v36 = vpop.f32.mrb[119].mxu1  ;;  %8006 = vmatmul.mubr.msk.f32.vlgmr.msra.gmra.mrb[96].mxu0 %vm348_vm0, %v10863_v52  ;;  %v10879_v25 = vadd.f32 %v4842_v23, %v10427_v57 }
0x11af   : > { %v10874_v22 = vadd.f32 %v4841_v31, %v10422_v30  ;;  %v4827_v34 = vadd.f32 %v10844_v3, %v4806_v61  ;;  %v4749_v5 = vadd.f32 %v10839_v32, %v4748_v36 }
0x11b0   : > { %v4844_v9 = vmax.f32 %v4828_v43, 0.0  ;;  %v4809_v44 = vmul.f32 %v10841_v11, %v4754_v2 }
0x11b1   : > { %v4843_v47 = vmax.f32 %v4827_v34, 0.0  ;;  %v4808_v8 = vmul.f32 %v10841_v11, %v4749_v5  ;;  %8008 = vmatprep.mubr.msk.f32.mxu0 %vm348_vm0, %v10874_v22 }
0x11b2   : > { %v4830_v49 = vadd.f32 %v10844_v3, %v4809_v44  ;;  %8009 = vmatmul.mubr.msk.f32.gmra.mrb[98].mxu0 %vm348_vm0, %v10879_v25  ;;  %v10893_v59 = vadd.f32 %v4844_v9, %v10441_v39 }
0x11b3   : > { %v10889_v15 = vadd.f32 %v4843_v47, %v10437_v40  ;;  %v4829_v24 = vadd.f32 %v10844_v3, %v4808_v8 }
0x11b4   : > { %v4846_v37 = vmax.f32 %v4830_v49, 0.0 }
0x11b5   : > { %v4845_v54 = vmax.f32 %v4829_v24, 0.0  ;;  %8011 = vmatprep.mubr.msk.f32.mxu0 %vm348_vm0, %v10889_v15 }
0x11b6   : > { %8012 = vmatmul.mubr.msk.f32.gmra.mrb[100].mxu0 %vm348_vm0, %v10893_v59  ;;  %v10903_v10 = vadd.f32 %v4846_v37, %v10451_v42 }
0x11b7   : > { %v10900_v20 = vadd.f32 %v4845_v54, %v10448_v1 }
0x11b9   : > { %8014 = vmatprep.mubr.msk.f32.mxu0 %vm348_vm0, %v10900_v20 }
0x11ba   : > { %8015 = vmatmul.mubr.msk.f32.gmra.mrb[102].mxu0 %vm348_vm0, %v10903_v10 }
0x11c0   : > { %v7987_v21 = vpop.f32.mrb[120].mxu1 }
0x11c1   : > { %v4764_v6 = vadd.f32 %v7987_v21, %v10839_v32  ;;  %v4758_v55 = vpop.f32.mrb[121].mxu1 }
0x11c2   : > { %v4759_v13 = vadd.f32 %v10839_v32, %v4758_v55 }
0x11c3   : > { %v4811_v48 = vmul.f32 %v10841_v11, %v4764_v6 }
0x11c4   : > { %v4810_v51 = vmul.f32 %v10841_v11, %v4759_v13  ;;  %v7990_v29 = vpop.f32.mrb[122].mxu1 }
0x11c5   : > { %v4832_v14 = vadd.f32 %v10844_v3, %v4811_v48  ;;  %v4774_v23 = vadd.f32 %v7990_v29, %v10839_v32  ;;  %v4768_v28 = vpop.f32.mrb[123].mxu1 }
0x11c6   : > { %v4831_v31 = vadd.f32 %v10844_v3, %v4810_v51  ;;  %v4769_v61 = vadd.f32 %v10839_v32, %v4768_v28 }
0x11c7   : > { %v4848_v35 = vmax.f32 %v4832_v14, 0.0  ;;  %v4813_v43 = vmul.f32 %v10841_v11, %v4774_v23 }
0x11c8   : > { %v4847_v2 = vmax.f32 %v4831_v31, 0.0  ;;  %v4812_v36 = vmul.f32 %v10841_v11, %v4769_v61  ;;  %v7993_v34 = vpop.f32.mrb[124].mxu1 }
0x11c9   : > { %v4834_v5 = vadd.f32 %v10844_v3, %v4813_v43  ;;  %v4784_v9 = vadd.f32 %v7993_v34, %v10839_v32  ;;  %v4778_v44 = vpop.f32.mrb[125].mxu1  ;;  %v10927_v24 = vadd.f32 %v4848_v35, %v10475_v56 }
0x11ca   : > { %v10922_v47 = vadd.f32 %v4847_v2, %v10470_v16  ;;  %v4833_v8 = vadd.f32 %v10844_v3, %v4812_v36  ;;  %v4779_v49 = vadd.f32 %v10839_v32, %v4778_v44 }
0x11cb   : > { %v4850_v37 = vmax.f32 %v4834_v5, 0.0  ;;  %v4815_v54 = vmul.f32 %v10841_v11, %v4784_v9 }
0x11cc   : > { %v4849_v21 = vmax.f32 %v4833_v8, 0.0  ;;  %v4814_v6 = vmul.f32 %v10841_v11, %v4779_v49  ;;  %v7996_v55 = vpop.f32.mrb[126].mxu1  ;;  %8017 = vmatprep.mubr.msk.f32.mxu0 %vm348_vm0, %v10922_v47 }
0x11cd   : > { %v4836_v13 = vadd.f32 %v10844_v3, %v4815_v54  ;;  %v4794_v48 = vadd.f32 %v7996_v55, %v10839_v32  ;;  %v4788_v51 = vpop.f32.mrb[127].mxu1  ;;  %8018 = vmatmul.mubr.msk.f32.gmra.mrb[104].mxu0 %vm348_vm0, %v10927_v24  ;;  %v10943_v28 = vadd.f32 %v4850_v37, %v10491_v0 }
0x11ce   : > { %v10938_v29 = vadd.f32 %v4849_v21, %v10486_v58  ;;  %v4835_v14 = vadd.f32 %v10844_v3, %v4814_v6  ;;  %v4789_v23 = vadd.f32 %v10839_v32, %v4788_v51 }
0x11cf   : > { %v4852_v31 = vmax.f32 %v4836_v13, 0.0  ;;  %v4817_v61 = vmul.f32 %v10841_v11, %v4794_v48 }
0x11d0   : > { %v4851_v35 = vmax.f32 %v4835_v14, 0.0  ;;  %v4816_v43 = vmul.f32 %v10841_v11, %v4789_v23  ;;  %8020 = vmatprep.mubr.msk.f32.mxu0 %vm348_vm0, %v10938_v29 }
0x11d1   : > { %v4838_v2 = vadd.f32 %v10844_v3, %v4817_v61  ;;  %8021 = vmatmul.mubr.msk.f32.gmra.mrb[106].mxu0 %vm348_vm0, %v10943_v28  ;;  %v10957_v34 = vadd.f32 %v4852_v31, %v10505_v33 }
0x11d2   : > { %v10953_v36 = vadd.f32 %v4851_v35, %v10501_v41  ;;  %v4837_v32 = vadd.f32 %v10844_v3, %v4816_v43  ;;  %v10973_v3 = vld [vmem:[#allocation10 + $0x7] ss:$0 sm:$0xff] }
0x11d3   : > { %v4854_v5 = vmax.f32 %v4838_v2, 0.0 }
0x11d4   : > { %v4853_v9 = vmax.f32 %v4837_v32, 0.0  ;;  %8023 = vmatprep.mubr.msk.f32.mxu0 %vm348_vm0, %v10953_v36 }
0x11d5   : > { %8024 = vmatmul.mubr.msk.f32.gmra.mrb[108].mxu0 %vm348_vm0, %v10957_v34  ;;  %v10967_v44 = vadd.f32 %v4854_v5, %v10515_v46 }
0x11d6   : > { %v10964_v11 = vadd.f32 %v4853_v9, %v10512_v62 }
0x11d7   : > { %11673 = vst [vmem:[#allocation32_spill] sm:$0xff] %v10967_v44 }
0x11d8   : > { %8026 = vmatprep.mubr.msk.f32.mxu0 %vm348_vm0, %v10964_v11 }
0x11d9   : > { %8027 = vmatmul.mubr.msk.f32.gmra.mrb[110].mxu0 %vm348_vm0, %v10967_v44 }
0x1281   : > { %v8007_v8 = vpop.f32.mrb[96].mxu0 }
0x1282   : > { %v5075_v49 = vadd.f32 %v8007_v8, %v10973_v3  ;;  %5100 = vrot.lane.b32.xlu1 %v8007_v8, %s9173_s24  ;;  %v4990_v37 = vpop.f32.mrb[97].mxu0 }
0x1283   : > { %v5074_v54 = vadd.f32 %v10973_v3, %v4990_v37  ;;  %5098 = vrot.lane.b32.xlu0 %v4990_v37, %s9173_s24 }
0x1285   : > { %v8517_v21 = vpack.c.bf16 %v5075_v49, %v5074_v54  ;;  %v8010_v6 = vpop.f32.mrb[98].mxu0 }
0x1286   : > { %v5077_v55 = vadd.f32 %v8010_v6, %v10973_v3  ;;  %v5000_v13 = vpop.f32.mrb[99].mxu0 }
0x1287   : > { %v5076_v48 = vadd.f32 %v10973_v3, %v5000_v13  ;;  %8518 = vmatprep.subr.bf16.mxu0 %v8517_v21  ;;  %5104 = vrot.lane.b32.xlu0 %v8010_v6, %s9173_s24 }
0x1288   : > { %5102 = vrot.lane.b32.xlu1 %v5000_v13, %s9173_s24  ;;  %8520 = vmatpush3.bf16.msra.mxu0 %v8517_v21 }
0x1289   : > { %v8521_v51 = vpack.c.bf16 %v5077_v55, %v5076_v48  ;;  %v8013_v14 = vpop.f32.mrb[100].mxu0 }
0x128a   : > { %v5079_v23 = vadd.f32 %v8013_v14, %v10973_v3  ;;  %v5010_v31 = vpop.f32.mrb[101].mxu0 }
0x128b   : > { %v5078_v61 = vadd.f32 %v10973_v3, %v5010_v31  ;;  %8522 = vmatprep.subr.bf16.mxu0 %v8521_v51  ;;  %5108 = vrot.lane.b32.xlu0 %v8013_v14, %s9173_s24 }
0x128c   : > { %5106 = vrot.lane.b32.xlu1 %v5010_v31, %s9173_s24  ;;  %8524 = vmatpush3.bf16.msra.mxu0 %v8521_v51 }
0x128d   : > { %v8525_v35 = vpack.c.bf16 %v5079_v23, %v5078_v61  ;;  %v8016_v43 = vpop.f32.mrb[102].mxu0 }
0x128e   : > { %v5081_v2 = vadd.f32 %v8016_v43, %v10973_v3  ;;  %v5020_v32 = vpop.f32.mrb[103].mxu0 }
0x128f   : > { %v5080_v5 = vadd.f32 %v10973_v3, %v5020_v32  ;;  %8526 = vmatprep.subr.bf16.mxu0 %v8525_v35  ;;  %5112 = vrot.lane.b32.xlu0 %v8016_v43, %s9173_s24 }
0x1290   : > { %5110 = vrot.lane.b32.xlu1 %v5020_v32, %s9173_s24  ;;  %8528 = vmatpush3.bf16.msra.mxu0 %v8525_v35 }
0x1291   : > { %v8529_v9 = vpack.c.bf16 %v5081_v2, %v5080_v5 }
0x1293   : > { %8530 = vmatprep.subr.bf16.mxu0 %v8529_v9 }
0x1294   : > { %8532 = vmatpush3.bf16.msra.mxu0 %v8529_v9 }
0x12a0   : > { %v8019_v8 = vpop.f32.mrb[104].mxu0 }
0x12a1   : > { %v5083_v49 = vadd.f32 %v8019_v8, %v10973_v3  ;;  %5497 = vrot.lane.b32.xlu0 %v8019_v8, %s9173_s24  ;;  %v5030_v37 = vpop.f32.mrb[105].mxu0 }
0x12a2   : > { %v5082_v54 = vadd.f32 %v10973_v3, %v5030_v37  ;;  %5495 = vrot.lane.b32.xlu1 %v5030_v37, %s9173_s24 }
0x12a4   : > { %v10995_v21 = vpack.c.bf16 %v5083_v49, %v5082_v54  ;;  %v8022_v6 = vpop.f32.mrb[106].mxu0 }
0x12a5   : > { %v5085_v55 = vadd.f32 %v8022_v6, %v10973_v3  ;;  %5501 = vrot.lane.b32.xlu0 %v8022_v6, %s9173_s24  ;;  %v5040_v13 = vpop.f32.mrb[107].mxu0 }
0x12a6   : > { %11674 = vst [vmem:[#allocation33_spill] sm:$0xff] %v10995_v21  ;;  %v5084_v48 = vadd.f32 %v10973_v3, %v5040_v13  ;;  %8558 = vmatprep.subr.bf16.mxu0 %v10995_v21  ;;  %5499 = vrot.lane.b32.xlu1 %v5040_v13, %s9173_s24 }
0x12a8   : > { %v11002_v51 = vpack.c.bf16 %v5085_v55, %v5084_v48  ;;  %v8025_v14 = vpop.f32.mrb[108].mxu0 }
0x12a9   : > { %v5087_v23 = vadd.f32 %v8025_v14, %v10973_v3  ;;  %5505 = vrot.lane.b32.xlu0 %v8025_v14, %s9173_s24  ;;  %v5050_v31 = vpop.f32.mrb[109].mxu0 }
0x12aa   : > { %11675 = vst [vmem:[#allocation34_spill] sm:$0xff] %v11002_v51  ;;  %v5086_v61 = vadd.f32 %v10973_v3, %v5050_v31  ;;  %5503 = vrot.lane.b32.xlu1 %v5050_v31, %s9173_s24 }
0x12ac   : > { %v11008_v35 = vpack.c.bf16 %v5087_v23, %v5086_v61  ;;  %v8028_v43 = vpop.f32.mrb[110].mxu0 }
0x12ad   : > { %v5089_v2 = vadd.f32 %v8028_v43, %v10973_v3  ;;  %5509 = vrot.lane.b32.xlu0 %v8028_v43, %s9173_s24  ;;  %v5060_v32 = vpop.f32.mrb[111].mxu0 }
0x12ae   : > { %11676 = vst [vmem:[#allocation35_spill] sm:$0xff] %v11008_v35  ;;  %v5088_v5 = vadd.f32 %v10973_v3, %v5060_v32  ;;  %5507 = vrot.lane.b32.xlu1 %v5060_v32, %s9173_s24 }
0x12b0   : > { %v11014_v9 = vpack.c.bf16 %v5089_v2, %v5088_v5 }
0x12b2   : > { %11677 = vst [vmem:[#allocation36_spill] sm:$0xff] %v11014_v9 }
0x12f4   : > { %v5101_v8 = vpop.permute.xlu1 %5100 }
0x12f5   : > { %v5099_v49 = vpop.permute.xlu0 %5098 }
0x12f6   : > { %v8493_v37 = vpack.c.bf16 %v5101_v8, %v5099_v49  ;;  %8045 = vmatprep.mubr.msk.f32.mxu1 %vm1195_vm1, %v5099_v49 }
0x12f8   : > { %8495 = vmatprep.subr.msk.bf16.mxu1 %vm9664_vm2, %v8493_v37 }
0x12f9   : > { %8498 = vmatpush3.bf16.xpose.msk.msra.mxu1 %vm9664_vm2, %v8493_v37  ;;  %v5105_v54 = vpop.permute.xlu0 %5104 }
0x12fa   : > { %v5103_v6 = vpop.permute.xlu1 %5102 }
0x12fb   : > { %v8499_v55 = vpack.c.bf16 %v5105_v54, %v5103_v6 }
0x12fd   : > { %8501 = vmatprep.subr.msk.bf16.mxu1 %vm9664_vm2, %v8499_v55  ;;  %v5109_v3 = vpop.permute.xlu0 %5108 }
0x12fe   : > { %v5107_v13 = vpop.permute.xlu1 %5106 }
0x12ff   : > { %v8505_v48 = vpack.c.bf16 %v5109_v3, %v5107_v13 }
0x1301   : > { %8504 = vmatpush3.bf16.xpose.msk.msra.mxu1 %vm9664_vm2, %v8499_v55  ;;  %v5113_v14 = vpop.permute.xlu0 %5112 }
0x1302   : > { %8507 = vmatprep.subr.msk.bf16.mxu1 %vm9664_vm2, %v8505_v48  ;;  %v5111_v23 = vpop.permute.xlu1 %5110 }
0x1303   : > { %v8511_v31 = vpack.c.bf16 %v5113_v14, %v5111_v23 }
0x1309   : > { %8510 = vmatpush3.bf16.xpose.msk.msra.mxu1 %vm9664_vm2, %v8505_v48 }
0x130a   : > { %8513 = vmatprep.subr.msk.bf16.mxu1 %vm9664_vm2, %v8511_v31 }
0x1311   : > { %8516 = vmatpush3.bf16.xpose.msk.msra.mxu1 %vm9664_vm2, %v8511_v31 }
0x1313   : > { %v5498_v61 = vpop.permute.xlu0 %5497 }
0x1314   : > { %v5496_v43 = vpop.permute.xlu1 %5495 }
0x1315   : > { %v8533_v2 = vpack.c.bf16 %v5498_v61, %v5496_v43 }
0x1317   : > { %8535 = vmatprep.subr.msk.bf16.mxu1 %vm9664_vm2, %v8533_v2  ;;  %v5502_v32 = vpop.permute.xlu0 %5501 }
0x1318   : > { %v5500_v5 = vpop.permute.xlu1 %5499  ;;  %8046 = vmatmul.mubr.msk.f32.vlgmr.msra.gmra.mrb[128].mxu1 %vm1195_vm1, %v5101_v8 }
0x1319   : > { %v8539_v49 = vpack.c.bf16 %v5502_v32, %v5500_v5  ;;  %8048 = vmatprep.mubr.msk.f32.mxu1 %vm1195_vm1, %v5103_v6  ;;  %8538 = vmatpush3.bf16.xpose.msk.msra.mxu1 %vm9664_vm2, %v8533_v2 }
0x131b   : > { %8541 = vmatprep.subr.msk.bf16.mxu1 %vm9664_vm2, %v8539_v49  ;;  %v5506_v37 = vpop.permute.xlu0 %5505 }
0x131c   : > { %8049 = vmatmul.mubr.msk.f32.gmra.mrb[130].mxu1 %vm1195_vm1, %v5105_v54  ;;  %v5504_v55 = vpop.permute.xlu1 %5503 }
0x131d   : > { %8051 = vmatprep.mubr.msk.f32.mxu1 %vm1195_vm1, %v5107_v13  ;;  %v8545_v48 = vpack.c.bf16 %v5506_v37, %v5504_v55 }
0x131f   : > { %v5510_v8 = vpop.permute.xlu0 %5509 }
0x1320   : > { %8052 = vmatmul.mubr.msk.f32.gmra.mrb[132].mxu1 %vm1195_vm1, %v5109_v3  ;;  %v5508_v6 = vpop.permute.xlu1 %5507 }
0x1321   : > { %8054 = vmatprep.mubr.msk.f32.mxu1 %vm1195_vm1, %v5111_v23  ;;  %8544 = vmatpush3.bf16.xpose.msk.msra.mxu1 %vm9664_vm2, %v8539_v49  ;;  %v8551_v54 = vpack.c.bf16 %v5510_v8, %v5508_v6 }
0x1322   : > { %8547 = vmatprep.subr.msk.bf16.mxu1 %vm9664_vm2, %v8545_v48 }
0x1324   : > { %8055 = vmatmul.mubr.msk.f32.gmra.mrb[134].mxu1 %vm1195_vm1, %v5113_v14 }
0x1325   : > { %8101 = vmatprep.mubr.msk.f32.mxu1 %vm1195_vm1, %v5496_v43 }
0x1329   : > { %8550 = vmatpush3.bf16.xpose.msk.msra.mxu1 %vm9664_vm2, %v8545_v48 }
0x132a   : > { %8553 = vmatprep.subr.msk.bf16.mxu1 %vm9664_vm2, %v8551_v54 }
0x1331   : > { %8556 = vmatpush3.bf16.xpose.msk.msra.mxu1 %vm9664_vm2, %v8551_v54 }
0x1338   : > { %8102 = vmatmul.mubr.msk.f32.vlgmr.msra.gmra.mrb[136].mxu1 %vm1195_vm1, %v5498_v61 }
0x1339   : > { %8104 = vmatprep.mubr.msk.f32.mxu1 %vm1195_vm1, %v5500_v5 }
0x133c   : > { %8105 = vmatmul.mubr.msk.f32.gmra.mrb[138].mxu1 %vm1195_vm1, %v5502_v32 }
0x133d   : > { %8107 = vmatprep.mubr.msk.f32.mxu1 %vm1195_vm1, %v5504_v55 }
0x1340   : > { %8108 = vmatmul.mubr.msk.f32.gmra.mrb[140].mxu1 %vm1195_vm1, %v5506_v37 }
0x1341   : > { %8110 = vmatprep.mubr.msk.f32.mxu1 %vm1195_vm1, %v5508_v6 }
0x1344   : > { %8111 = vmatmul.mubr.msk.f32.gmra.mrb[142].mxu1 %vm1195_vm1, %v5510_v8 }
0x13eb   : > { %v8047_v3 = vpop.f32.mrb[128].mxu1 }
0x13ec   : > { %v5196_v13 = vpop.f32.mrb[129].mxu1  ;;  %v5236_v31 = vsel %vm1317_vm3, %v8047_v3, -inf }
0x13ed   : > { %v5235_v2 = vsel %vm1317_vm3, %v5196_v13, -inf }
0x13ef   : > { %v8050_v14 = vpop.f32.mrb[130].mxu1 }
0x13f0   : > { %v5206_v23 = vpop.f32.mrb[131].mxu1  ;;  %v5238_v55 = vsel %vm1317_vm3, %v8050_v14, -inf }
0x13f1   : > { %v5237_v54 = vsel %vm1317_vm3, %v5206_v23, -inf }
0x13f3   : > { %v8053_v38 = vpop.f32.mrb[132].mxu1 }
0x13f4   : > { %v5241_v61 = vsel %vm1317_vm3, %v8053_v38, -inf  ;;  %v5216_v43 = vpop.f32.mrb[133].mxu1 }
0x13f5   : > { %v5242_v32 = vmax.f32 %v5236_v31, %v5241_v61  ;;  %v5239_v5 = vsel %vm1317_vm3, %v5216_v43, -inf }
0x13f6   : > { %v5240_v49 = vmax.f32 %v5235_v2, %v5239_v5 }
0x13f7   : > { %v8056_v37 = vpop.f32.mrb[134].mxu1 }
0x13f8   : > { %v5247_v48 = vmax.f32 %v5240_v49, %v5242_v32  ;;  %v5245_v8 = vsel %vm1317_vm3, %v8056_v37, -inf  ;;  %v5226_v6 = vpop.f32.mrb[135].mxu1 }
0x13f9   : > { %v5246_v45 = vmax.f32 %v5238_v55, %v5245_v8  ;;  %v5243_v7 = vsel %vm1317_vm3, %v5226_v6, -inf }
0x13fa   : > { %v5244_v12 = vmax.f32 %v5237_v54, %v5243_v7 }
0x13fc   : > { %v5248_v63 = vmax.f32 %v5244_v12, %v5246_v45 }
0x13fe   : > { %v5249_v60 = vmax.f32 %v5247_v48, %v5248_v63 }
0x1400   : > { %v5250_v19 = vrot.slane %v5249_v60, 4 }
0x1402   : > { %v5251_v31 = vmax.f32 %v5249_v60, %v5250_v19 }
0x1404   : > { %v5252_v61 = vrot.slane %v5251_v31, 2 }
0x1406   : > { %v5253_v53 = vmax.f32 %v5251_v31, %v5252_v61 }
0x1408   : > { %v5254_v2 = vrot.slane %v5253_v53, 1 }
0x140a   : > { %v5255_v5 = vmax.f32 %v5253_v53, %v5254_v2 }
0x140b   : > { %v11072_v50 = vpop.f32.mrb[136].mxu1 }
0x140c   : > { %v5256_v32 = vsub.f32 %v5196_v13, %v5255_v5  ;;  %v5257_v49 = vsub.f32 %v8047_v3, %v5255_v5  ;;  %v5258_v18 = vsub.f32 %v5206_v23, %v5255_v5  ;;  %v5259_v27 = vsub.f32 %v8050_v14, %v5255_v5  ;;  %v11074_v9 = vpop.f32.mrb[137].mxu1 }
0x140d   : > { %v5260_v55 = vsub.f32 %v5216_v43, %v5255_v5  ;;  %v5261_v8 = vsub.f32 %v8053_v38, %v5255_v5  ;;  %v5262_v35 = vsub.f32 %v5226_v6, %v5255_v5  ;;  %v5263_v7 = vsub.f32 %v8056_v37, %v5255_v5 }
0x140e   : > { %v5264_v12 = vmul.f32 1.442695, %v5256_v32  ;;  %v5266_v63 = vmul.f32 1.442695, %v5257_v49  ;;  %v5268_v45 = vmul.f32 1.442695, %v5258_v18 }
0x140f   : > { %v5270_v60 = vmul.f32 1.442695, %v5259_v27  ;;  %v11076_v19 = vpop.f32.mrb[138].mxu1  ;;  %v5272_v53 = vmul.f32 1.442695, %v5260_v55  ;;  %v5633_v23 = vsel %vm1317_vm3, %v11072_v50, -inf }
0x1410   : > { %8880 = vpow2.f32 %v5264_v12  ;;  %v11078_v48 = vpop.f32.mrb[139].mxu1  ;;  %v5274_v3 = vmul.f32 1.442695, %v5261_v8  ;;  %v5276_v14 = vmul.f32 1.442695, %v5262_v35  ;;  %v5632_v38 = vsel %vm1317_vm3, %v11074_v9, -inf }
0x1411   : > { %8882 = vpow2.f32 %v5266_v63  ;;  %v5278_v54 = vmul.f32 1.442695, %v5263_v7  ;;  %v5635_v31 = vsel %vm1317_vm3, %v11076_v19, -inf  ;;  %v5634_v32 = vsel %vm1317_vm3, %v11078_v48, -inf }
0x1412   : > { %8884 = vpow2.f32 %v5268_v45 }
0x1413   : > { %8886 = vpow2.f32 %v5270_v60  ;;  %v11080_v13 = vpop.f32.mrb[140].mxu1 }
0x1414   : > { %v5638_v18 = vsel %vm1317_vm3, %v11080_v13, -inf  ;;  %v11086_v27 = vpop.f32.mrb[141].mxu1  ;;  %8888 = vpow2.f32 %v5272_v53 }
0x1415   : > { %v5639_v43 = vmax.f32 %v5633_v23, %v5638_v18  ;;  %v5636_v37 = vsel %vm1317_vm3, %v11086_v27, -inf  ;;  %8890 = vpow2.f32 %v5274_v3 }
0x1416   : > { %v5637_v6 = vmax.f32 %v5632_v38, %v5636_v37  ;;  %8892 = vpow2.f32 %v5276_v14 }
0x1417   : > { %v11092_v35 = vpop.f32.mrb[142].mxu1  ;;  %8894 = vpow2.f32 %v5278_v54 }
0x1418   : > { %v5644_v61 = vmax.f32 %v5637_v6, %v5639_v43  ;;  %v5642_v2 = vsel %vm1317_vm3, %v11092_v35, -inf  ;;  %v11098_v5 = vpop.f32.mrb[143].mxu1 }
0x1419   : > { %v5643_v49 = vmax.f32 %v5635_v31, %v5642_v2  ;;  %v5640_v55 = vsel %vm1317_vm3, %v11098_v5, -inf }
0x141a   : > { %v11104_v8 = vpop.eup %8880  ;;  %v5641_v7 = vmax.f32 %v5634_v32, %v5640_v55 }
0x141b   : > { %v11106_v12 = vpop.eup %8882  ;;  %v5280_v63 = vsel %vm1317_vm3, %v11104_v8, 0.0 }
0x141c   : > { %v11110_v45 = vpop.eup %8884  ;;  %v5281_v60 = vsel %vm1317_vm3, %v11106_v12, 0.0  ;;  %v5645_v53 = vmax.f32 %v5641_v7, %v5643_v49 }
0x141d   : > { %v11114_v3 = vpop.eup %8886  ;;  %v5282_v14 = vadd.f32 %v5281_v60, %v5280_v63  ;;  %v5283_v23 = vsel %vm1317_vm3, %v11110_v45, 0.0 }
0x141e   : > { %v5646_v18 = vmax.f32 %v5644_v61, %v5645_v53  ;;  %v11118_v38 = vpop.eup %8888  ;;  %v5285_v37 = vsel %vm1317_vm3, %v11114_v3, 0.0 }
0x141f   : > { %v5284_v43 = vadd.f32 %v5283_v23, %v5282_v14  ;;  %v11122_v54 = vpop.eup %8890  ;;  %v5287_v2 = vsel %vm1317_vm3, %v11118_v38, 0.0 }
0x1420   : > { %v5647_v6 = vrot.slane %v5646_v18, 4  ;;  %v11126_v49 = vpop.eup %8892  ;;  %v5289_v61 = vsel %vm1317_vm3, %v11122_v54, 0.0 }
0x1421   : > { %v5286_v31 = vadd.f32 %v5285_v37, %v5284_v43  ;;  %v11130_v63 = vpop.eup %8894  ;;  %v5291_v53 = vsel %vm1317_vm3, %v11126_v49, 0.0 }
0x1422   : > { %v5648_v32 = vmax.f32 %v5646_v18, %v5647_v6  ;;  %v5293_v43 = vsel %vm1317_vm3, %v11130_v63, 0.0 }
0x1423   : > { %v5288_v55 = vadd.f32 %v5287_v2, %v5286_v31 }
0x1424   : > { %v5649_v7 = vrot.slane %v5648_v32, 2 }
0x1425   : > { %v5290_v60 = vadd.f32 %v5289_v61, %v5288_v55 }
0x1426   : > { %v5650_v14 = vmax.f32 %v5648_v32, %v5649_v7 }
0x1427   : > { %v5292_v23 = vadd.f32 %v5291_v53, %v5290_v60 }
0x1428   : > { %v5651_v37 = vrot.slane %v5650_v14, 1 }
0x1429   : > { %v5294_v18 = vadd.f32 %v5293_v43, %v5292_v23 }
0x142a   : > { %v5652_v6 = vmax.f32 %v5650_v14, %v5651_v37 }
0x142b   : > { %v5295_v51 = vrot.slane %v5294_v18, 4 }
0x142c   : > { %v5653_v31 = vsub.f32 %v11074_v9, %v5652_v6  ;;  %v5654_v2 = vsub.f32 %v11072_v50, %v5652_v6  ;;  %v5655_v21 = vsub.f32 %v11078_v48, %v5652_v6  ;;  %v5656_v55 = vsub.f32 %v11076_v19, %v5652_v6 }
0x142d   : > { %v5296_v61 = vadd.f32 %v5295_v51, %v5294_v18  ;;  %v5657_v44 = vsub.f32 %v11086_v27, %v5652_v6  ;;  %v5658_v32 = vsub.f32 %v11080_v13, %v5652_v6  ;;  %v5659_v7 = vsub.f32 %v11098_v5, %v5652_v6 }
0x142e   : > { %v5660_v60 = vsub.f32 %v11092_v35, %v5652_v6  ;;  %v5661_v53 = vmul.f32 1.442695, %v5653_v31  ;;  %v5663_v14 = vmul.f32 1.442695, %v5654_v2  ;;  %v5665_v23 = vmul.f32 1.442695, %v5655_v21 }
0x142f   : > { %v5297_v43 = vrot.slane %v5296_v61, 2  ;;  %v5667_v9 = vmul.f32 1.442695, %v5656_v55  ;;  %v5669_v50 = vmul.f32 1.442695, %v5657_v44 }
0x1430   : > { %8896 = vpow2.f32 %v5661_v53  ;;  %v5671_v19 = vmul.f32 1.442695, %v5658_v32  ;;  %v5673_v13 = vmul.f32 1.442695, %v5659_v7  ;;  %v5675_v27 = vmul.f32 1.442695, %v5660_v60 }
0x1431   : > { %v5298_v37 = vadd.f32 %v5297_v43, %v5296_v61  ;;  %8898 = vpow2.f32 %v5663_v14 }
0x1432   : > { %8900 = vpow2.f32 %v5665_v23 }
0x1433   : > { %v5299_v51 = vrot.slane %v5298_v37, 1  ;;  %8902 = vpow2.f32 %v5667_v9 }
0x1434   : > { %8904 = vpow2.f32 %v5669_v50 }
0x1435   : > { %v5300_v48 = vadd.f32 %v5299_v51, %v5298_v37  ;;  %8906 = vpow2.f32 %v5671_v19 }
0x1437   : > { %8908 = vrcp.f32 %v5300_v48 }
0x1438   : > { %8910 = vpow2.f32 %v5673_v13 }
0x1439   : > { %8912 = vpow2.f32 %v5675_v27 }
0x143a   : > { %v8897_v35 = vpop.eup %8896 }
0x143b   : > { %v8899_v5 = vpop.eup %8898  ;;  %v5677_v21 = vsel %vm1317_vm3, %v8897_v35, 0.0 }
0x143c   : > { %v8901_v18 = vpop.eup %8900  ;;  %v5678_v44 = vsel %vm1317_vm3, %v8899_v5, 0.0 }
0x143d   : > { %v8903_v6 = vpop.eup %8902  ;;  %v5679_v31 = vadd.f32 %v5678_v44, %v5677_v21  ;;  %v5680_v55 = vsel %vm1317_vm3, %v8901_v18, 0.0 }
0x143e   : > { %v8905_v2 = vpop.eup %8904  ;;  %v5682_v7 = vsel %vm1317_vm3, %v8903_v6, 0.0 }
0x143f   : > { %v5681_v61 = vadd.f32 %v5680_v55, %v5679_v31  ;;  %v8907_v32 = vpop.eup %8906  ;;  %v5684_v14 = vsel %vm1317_vm3, %v8905_v2, 0.0 }
0x1441   : > { %v8909_v53 = vpop.eup %8908  ;;  %v5683_v60 = vadd.f32 %v5682_v7, %v5681_v61 }
0x1442   : > { %v11150_v23 = vmul.f32 %v8909_v53, %v11106_v12  ;;  %v11153_v43 = vmul.f32 %v8909_v53, %v11104_v8  ;;  %v11156_v9 = vmul.f32 %v8909_v53, %v11110_v45  ;;  %v11159_v50 = vmul.f32 %v8909_v53, %v11114_v3  ;;  %v8911_v37 = vpop.eup %8910 }
0x1443   : > { %v5685_v19 = vadd.f32 %v5684_v14, %v5683_v60  ;;  %v11162_v51 = vmul.f32 %v8909_v53, %v11118_v38  ;;  %v11165_v48 = vmul.f32 %v8909_v53, %v11122_v54  ;;  %v5686_v12 = vsel %vm1317_vm3, %v8907_v32, 0.0  ;;  %v8913_v13 = vpop.eup %8912 }
0x1444   : > { %v5313_v8 = vsel %vm1317_vm3, %v11150_v23, 0.0  ;;  %v5310_v45 = vsel %vm1317_vm3, %v11153_v43, 0.0  ;;  %v11173_v3 = vmul.f32 %v8909_v53, %v11126_v49  ;;  %v5688_v38 = vsel %vm1317_vm3, %v8911_v37, 0.0 }
0x1445   : > { %v5687_v27 = vadd.f32 %v5686_v12, %v5685_v19  ;;  %5314 = vadd.xlane.f32.xlu0 %v5313_v8  ;;  %5311 = vadd.xlane.f32.xlu1 %v5310_v45  ;;  %v11177_v54 = vmul.f32 %v8909_v53, %v11130_v63  ;;  %v5690_v44 = vsel %vm1317_vm3, %v8913_v13, 0.0  ;;  %v5316_v31 = vsel %vm1317_vm3, %v11156_v9, 0.0 }
0x1446   : > { %v5319_v55 = vsel %vm1317_vm3, %v11159_v50, 0.0  ;;  %v5322_v49 = vsel %vm1317_vm3, %v11162_v51, 0.0  ;;  %v5325_v63 = vsel %vm1317_vm3, %v11165_v48, 0.0  ;;  %v5328_v14 = vsel %vm1317_vm3, %v11173_v3, 0.0 }
0x1447   : > { %v5689_v21 = vadd.f32 %v5688_v38, %v5687_v27  ;;  %v5331_v19 = vsel %vm1317_vm3, %v11177_v54, 0.0 }
0x1449   : > { %v5691_v61 = vadd.f32 %v5690_v44, %v5689_v21  ;;  %5317 = vadd.xlane.f32.xlu0 %v5316_v31  ;;  %5320 = vadd.xlane.f32.xlu1 %v5319_v55 }
0x144b   : > { %v5692_v7 = vrot.slane %v5691_v61, 4 }
0x144d   : > { %v5693_v53 = vadd.f32 %v5692_v7, %v5691_v61  ;;  %5323 = vadd.xlane.f32.xlu0 %v5322_v49  ;;  %5326 = vadd.xlane.f32.xlu1 %v5325_v63 }
0x144f   : > { %v5694_v60 = vrot.slane %v5693_v53, 2 }
0x1451   : > { %v5695_v12 = vadd.f32 %v5694_v60, %v5693_v53  ;;  %5329 = vadd.xlane.f32.xlu0 %v5328_v14  ;;  %5332 = vadd.xlane.f32.xlu1 %v5331_v19 }
0x1453   : > { %v5696_v8 = vrot.slane %v5695_v12, 1 }
0x1455   : > { %v5697_v45 = vadd.f32 %v5696_v8, %v5695_v12 }
0x1457   : > { %8914 = vrcp.f32 %v5697_v45 }
0x1461   : > { %v8915_v27 = vpop.eup %8914 }
0x1462   : > { %v11192_v38 = vmul.f32 %v8915_v27, %v8899_v5  ;;  %v11194_v21 = vmul.f32 %v8915_v27, %v8897_v35  ;;  %v11196_v44 = vmul.f32 %v8915_v27, %v8903_v6  ;;  %v11198_v31 = vmul.f32 %v8915_v27, %v8901_v18 }
0x1463   : > { %v11200_v55 = vmul.f32 %v8915_v27, %v8907_v32  ;;  %v11202_v61 = vmul.f32 %v8915_v27, %v8905_v2  ;;  %v11204_v7 = vmul.f32 %v8915_v27, %v8913_v13  ;;  %v11206_v49 = vmul.f32 %v8915_v27, %v8911_v37  ;;  %v11679_v27 = vld [vmem:[#allocation33_spill] sm:$0xff] }
0x1464   : > { %v5710_v63 = vsel %vm1317_vm3, %v11192_v38, 0.0  ;;  %v5707_v5 = vsel %vm1317_vm3, %v11194_v21, 0.0  ;;  %v5716_v35 = vsel %vm1317_vm3, %v11196_v44, 0.0  ;;  %v5713_v18 = vsel %vm1317_vm3, %v11198_v31, 0.0 }
0x1465   : > { %5711 = vadd.xlane.f32.xlu1 %v5710_v63  ;;  %5708 = vadd.xlane.f32.xlu0 %v5707_v5  ;;  %v5722_v6 = vsel %vm1317_vm3, %v11200_v55, 0.0  ;;  %v5719_v2 = vsel %vm1317_vm3, %v11202_v61, 0.0  ;;  %v5728_v32 = vsel %vm1317_vm3, %v11204_v7, 0.0  ;;  %v5725_v37 = vsel %vm1317_vm3, %v11206_v49, 0.0  ;;  %v11680_v5 = vld [vmem:[#allocation34_spill] sm:$0xff] }
0x1469   : > { %5717 = vadd.xlane.f32.xlu1 %v5716_v35  ;;  %5714 = vadd.xlane.f32.xlu0 %v5713_v18 }
0x146d   : > { %5723 = vadd.xlane.f32.xlu1 %v5722_v6  ;;  %5720 = vadd.xlane.f32.xlu0 %v5719_v2  ;;  %v11681_v6 = vld [vmem:[#allocation35_spill] sm:$0xff]  ;;  %v5902_v2 = vld [vmem:[#allocation8 + $0x68] sm:$0xff] }
0x1471   : > { %5729 = vadd.xlane.f32.xlu1 %v5728_v32  ;;  %5726 = vadd.xlane.f32.xlu0 %v5725_v37 }
0x1482   : > { %6179 = vrot.lane.b32.xlu1 %v10411_v17, %s9174_s26 }
0x1486   : > { %6181 = vrot.lane.b32.xlu1 %v10422_v30, %s9174_s26 }
0x1487   : > { %6177 = vrot.lane.b32.xlu0 %v10406_v4, %s9174_s26  ;;  %v11678_v4 = vld [vmem:[#allocation32_spill] sm:$0xff] }
0x148a   : > { %6185 = vrot.lane.b32.xlu1 %v10437_v40, %s9174_s26 }
0x148b   : > { %6183 = vrot.lane.b32.xlu0 %v10427_v57, %s9174_s26 }
0x148e   : > { %6189 = vrot.lane.b32.xlu1 %v10448_v1, %s9174_s26 }
0x148f   : > { %6187 = vrot.lane.b32.xlu0 %v10441_v39, %s9174_s26 }
0x1492   : > { %6193 = vrot.lane.b32.xlu1 %v10470_v16, %s9174_s26 }
0x1493   : > { %6191 = vrot.lane.b32.xlu0 %v10451_v42, %s9174_s26 }
0x1496   : > { %6197 = vrot.lane.b32.xlu1 %v10486_v58, %s9174_s26 }
0x1497   : > { %6195 = vrot.lane.b32.xlu0 %v10475_v56, %s9174_s26 }
0x149a   : > { %6201 = vrot.lane.b32.xlu1 %v10501_v41, %s9174_s26 }
0x149b   : > { %6199 = vrot.lane.b32.xlu0 %v10491_v0, %s9174_s26 }
0x149e   : > { %6205 = vrot.lane.b32.xlu1 %v10512_v62, %s9174_s26 }
0x149f   : > { %6203 = vrot.lane.b32.xlu0 %v10505_v33, %s9174_s26 }
0x14a2   : > { %6225 = vrot.lane.b32.xlu1 %v10858_v26, %s9175_s23 }
0x14a3   : > { %6207 = vrot.lane.b32.xlu0 %v10515_v46, %s9174_s26 }
0x14a6   : > { %6229 = vrot.lane.b32.xlu1 %v10874_v22, %s9175_s23 }
0x14a7   : > { %6227 = vrot.lane.b32.xlu0 %v10863_v52, %s9175_s23 }
0x14aa   : > { %6233 = vrot.lane.b32.xlu1 %v10889_v15, %s9175_s23 }
0x14ab   : > { %6231 = vrot.lane.b32.xlu0 %v10879_v25, %s9175_s23 }
0x14ae   : > { %6237 = vrot.lane.b32.xlu1 %v10900_v20, %s9175_s23 }
0x14af   : > { %6235 = vrot.lane.b32.xlu0 %v10893_v59, %s9175_s23 }
0x14b2   : > { %6241 = vrot.lane.b32.xlu1 %v10922_v47, %s9175_s23 }
0x14b3   : > { %6239 = vrot.lane.b32.xlu0 %v10903_v10, %s9175_s23 }
0x14b6   : > { %6245 = vrot.lane.b32.xlu1 %v10938_v29, %s9175_s23 }
0x14b7   : > { %6243 = vrot.lane.b32.xlu0 %v10927_v24, %s9175_s23 }
0x14ba   : > { %6249 = vrot.lane.b32.xlu1 %v10953_v36, %s9175_s23 }
0x14bb   : > { %6247 = vrot.lane.b32.xlu0 %v10943_v28, %s9175_s23 }
0x14be   : > { %6253 = vrot.lane.b32.xlu1 %v10964_v11, %s9175_s23 }
0x14bf   : > { %6251 = vrot.lane.b32.xlu0 %v10957_v34, %s9175_s23 }
0x14c3   : > { %6255 = vrot.lane.b32.xlu0 %v11678_v4, %s9175_s23 }
0x14d2   : > { %v5315_v17 = vpop.xlane.xlu0 %5314  ;;  %v5312_v30 = vpop.xlane.xlu1 %5311 }
0x14d3   : > { %v5335_v57 = vadd.f32 1e-09, %v5315_v17  ;;  %v5334_v40 = vadd.f32 1e-09, %v5312_v30  ;;  %v11682_v17 = vld [vmem:[#allocation36_spill] sm:$0xff] }
0x14d5   : > { %8916 = vrcp.f32 %v5335_v57 }
0x14d6   : > { %8918 = vrcp.f32 %v5334_v40  ;;  %v5318_v39 = vpop.xlane.xlu0 %5317  ;;  %v5321_v1 = vpop.xlane.xlu1 %5320 }
0x14d7   : > { %v5336_v42 = vadd.f32 1e-09, %v5318_v39  ;;  %v5337_v16 = vadd.f32 1e-09, %v5321_v1 }
0x14d9   : > { %8920 = vrcp.f32 %v5336_v42 }
0x14da   : > { %8922 = vrcp.f32 %v5337_v16  ;;  %v5324_v56 = vpop.xlane.xlu0 %5323  ;;  %v5327_v58 = vpop.xlane.xlu1 %5326 }
0x14db   : > { %v5338_v0 = vadd.f32 1e-09, %v5324_v56  ;;  %v5339_v41 = vadd.f32 1e-09, %v5327_v58 }
0x14dd   : > { %8924 = vrcp.f32 %v5338_v0 }
0x14de   : > { %8926 = vrcp.f32 %v5339_v41  ;;  %v5330_v33 = vpop.xlane.xlu0 %5329  ;;  %v5333_v62 = vpop.xlane.xlu1 %5332 }
0x14df   : > { %v8917_v46 = vpop.eup %8916  ;;  %v5340_v13 = vadd.f32 1e-09, %v5330_v33  ;;  %v5341_v53 = vadd.f32 1e-09, %v5333_v62 }
0x14e0   : > { %v8919_v60 = vpop.eup %8918  ;;  %v5351_v14 = vmul.f32 %v8917_v46, %v11150_v23 }
0x14e1   : > { %8928 = vrcp.f32 %v5340_v13  ;;  %v5350_v19 = vmul.f32 %v8919_v60, %v11153_v43 }
0x14e2   : > { %8930 = vrcp.f32 %v5341_v53 }
0x14e3   : > { %v8921_v12 = vpop.eup %8920  ;;  %8073 = vmatprep.mubr.msk.f32.mxu0 %vm1317_vm3, %v5350_v19 }
0x14e4   : > { %v8923_v8 = vpop.eup %8922  ;;  %8074 = vmatmul.mubr.msk.f32.vlgmr.msra.gmra.mrb[112].mxu0 %vm1317_vm3, %v5351_v14  ;;  %v5352_v45 = vmul.f32 %v8921_v12, %v11156_v9 }
0x14e5   : > { %8560 = vmatpush3.bf16.msra.mxu0 %v11679_v27  ;;  %v5353_v63 = vmul.f32 %v8923_v8, %v11159_v50  ;;  %v5901_v50 = vld [vmem:[#allocation8 + $0x60] sm:$0xff] }
0x14e6   : > { %8562 = vmatprep.subr.bf16.mxu0 %v11680_v5  ;;  %8076 = vmatprep.mubr.msk.f32.mxu0 %vm1317_vm3, %v5352_v45 }
0x14e7   : > { %v8925_v23 = vpop.eup %8924 }
0x14e8   : > { %v8927_v35 = vpop.eup %8926  ;;  %8077 = vmatmul.mubr.msk.f32.gmra.mrb[114].mxu0 %vm1317_vm3, %v5353_v63  ;;  %v5354_v43 = vmul.f32 %v8925_v23, %v11162_v51 }
0x14e9   : > { %8564 = vmatpush3.bf16.msra.mxu0 %v11680_v5  ;;  %v5355_v18 = vmul.f32 %v8927_v35, %v11165_v48  ;;  %v8573_v48 = vpack.c.bf16 %v5902_v2, %v5901_v50  ;;  %v5903_v35 = vld [vmem:[#allocation8 + $0x70] sm:$0xff] }
0x14ea   : > { %8566 = vmatprep.subr.bf16.mxu0 %v11681_v6  ;;  %8079 = vmatprep.mubr.msk.f32.mxu0 %vm1317_vm3, %v5354_v43  ;;  %v5904_v43 = vld [vmem:[#allocation8 + $0x78] sm:$0xff] }
0x14eb   : > { %v8929_v9 = vpop.eup %8928 }
0x14ec   : > { %v8931_v32 = vpop.eup %8930  ;;  %8080 = vmatmul.mubr.msk.f32.gmra.mrb[116].mxu0 %vm1317_vm3, %v5355_v18  ;;  %v5356_v37 = vmul.f32 %v8929_v9, %v11173_v3  ;;  %v8577_v18 = vpack.c.bf16 %v5904_v43, %v5903_v35 }
0x14ed   : > { %8568 = vmatpush3.bf16.msra.mxu0 %v11681_v6  ;;  %v5357_v51 = vmul.f32 %v8931_v32, %v11177_v54 }
0x14ee   : > { %8570 = vmatprep.subr.bf16.mxu0 %v11682_v17  ;;  %8082 = vmatprep.mubr.msk.f32.mxu0 %vm1317_vm3, %v5356_v37 }
0x14f0   : > { %8083 = vmatmul.mubr.msk.f32.gmra.mrb[118].mxu0 %vm1317_vm3, %v5357_v51 }
0x14f1   : > { %8572 = vmatpush3.bf16.msra.mxu0 %v11682_v17 }
0x14f2   : > { %v5709_v30 = vpop.xlane.xlu0 %5708  ;;  %v5712_v57 = vpop.xlane.xlu1 %5711  ;;  %8574 = vmatprep.subr.bf16.mxu0 %v8573_v48 }
0x14f3   : > { %v5731_v40 = vadd.f32 1e-09, %v5709_v30  ;;  %v5732_v39 = vadd.f32 1e-09, %v5712_v57 }
0x14f5   : > { %8932 = vrcp.f32 %v5731_v40 }
0x14f6   : > { %8934 = vrcp.f32 %v5732_v39  ;;  %v5715_v3 = vpop.xlane.xlu0 %5714  ;;  %v5718_v1 = vpop.xlane.xlu1 %5717 }
0x14f7   : > { %v5733_v42 = vadd.f32 1e-09, %v5715_v3  ;;  %v5734_v54 = vadd.f32 1e-09, %v5718_v1 }
0x14f9   : > { %8936 = vrcp.f32 %v5733_v42 }
0x14fa   : > { %8938 = vrcp.f32 %v5734_v54  ;;  %v5721_v16 = vpop.xlane.xlu0 %5720  ;;  %v5724_v56 = vpop.xlane.xlu1 %5723 }
0x14fb   : > { %v5735_v58 = vadd.f32 1e-09, %v5721_v16  ;;  %v5736_v0 = vadd.f32 1e-09, %v5724_v56 }
0x14fd   : > { %8940 = vrcp.f32 %v5735_v58 }
0x14fe   : > { %8942 = vrcp.f32 %v5736_v0  ;;  %v5727_v41 = vpop.xlane.xlu0 %5726  ;;  %v5730_v33 = vpop.xlane.xlu1 %5729 }
0x14ff   : > { %v8933_v62 = vpop.eup %8932  ;;  %v5737_v46 = vadd.f32 1e-09, %v5727_v41  ;;  %v5738_v13 = vadd.f32 1e-09, %v5730_v33 }
0x1500   : > { %v8935_v53 = vpop.eup %8934  ;;  %v5747_v60 = vmul.f32 %v8933_v62, %v11194_v21 }
0x1501   : > { %v5748_v14 = vmul.f32 %v8935_v53, %v11192_v38  ;;  %8944 = vrcp.f32 %v5737_v46 }
0x1502   : > { %8946 = vrcp.f32 %v5738_v13  ;;  %8129 = vmatprep.mubr.msk.f32.mxu0 %vm1317_vm3, %v5747_v60 }
0x1503   : > { %v8937_v19 = vpop.eup %8936  ;;  %8130 = vmatmul.mubr.msk.f32.vlgmr.msra.gmra.mrb[120].mxu0 %vm1317_vm3, %v5748_v14  ;;  %v11327_v14 = vld [vmem:[#allocation10 + $0xb] ss:$0 sm:$0xff] }
0x1504   : > { %v8939_v12 = vpop.eup %8938  ;;  %v5749_v8 = vmul.f32 %v8937_v19, %v11198_v31  ;;  %8576 = vmatpush3.bf16.msra.mxu0 %v8573_v48 }
0x1505   : > { %v5750_v45 = vmul.f32 %v8939_v12, %v11196_v44  ;;  %8578 = vmatprep.subr.bf16.mxu0 %v8577_v18  ;;  %v11329_v12 = vld [vmem:[#allocation10 + $0xf] ss:$0 sm:$0xff] }
0x1506   : > { %8132 = vmatprep.mubr.msk.f32.mxu0 %vm1317_vm3, %v5749_v8 }
0x1507   : > { %v8941_v27 = vpop.eup %8940  ;;  %8133 = vmatmul.mubr.msk.f32.gmra.mrb[122].mxu0 %vm1317_vm3, %v5750_v45 }
0x1508   : > { %v8943_v21 = vpop.eup %8942  ;;  %v5751_v38 = vmul.f32 %v8941_v27, %v11202_v61  ;;  %8580 = vmatpush3.bf16.msra.mxu0 %v8577_v18  ;;  %v11332_v27 = vld [vmem:[#allocation10 + $0x13] ss:$0 sm:$0xff] }
0x1509   : > { %v5752_v63 = vmul.f32 %v8943_v21, %v11200_v55 }
0x150a   : > { %8135 = vmatprep.mubr.msk.f32.mxu0 %vm1317_vm3, %v5751_v38 }
0x150b   : > { %v8945_v5 = vpop.eup %8944  ;;  %8136 = vmatmul.mubr.msk.f32.gmra.mrb[124].mxu0 %vm1317_vm3, %v5752_v63 }
0x150c   : > { %v8947_v23 = vpop.eup %8946  ;;  %v5753_v31 = vmul.f32 %v8945_v5, %v11206_v49 }
0x150d   : > { %v5754_v44 = vmul.f32 %v8947_v23, %v11204_v7 }
0x150e   : > { %8138 = vmatprep.mubr.msk.f32.mxu0 %vm1317_vm3, %v5753_v31 }
0x150f   : > { %8139 = vmatmul.mubr.msk.f32.gmra.mrb[126].mxu0 %vm1317_vm3, %v5754_v44 }
0x15b7   : > { %v8075_v55 = vpop.f32.mrb[112].mxu0 }
0x15b8   : > { %v5448_v61 = vpop.f32.mrb[113].mxu0  ;;  %v5885_v9 = vsub.f32 %v10863_v52, %v8075_v55 }
0x15b9   : > { %v5884_v6 = vsub.f32 %v10858_v26, %v5448_v61 }
0x15bb   : > { %v8078_v50 = vpop.f32.mrb[114].mxu0  ;;  %8149 = vmatprep.mubr.msk.f32.mxu0 %vm348_vm0, %v5884_v6 }
0x15bc   : > { %v5458_v49 = vpop.f32.mrb[115].mxu0  ;;  %8150 = vmatmul.mubr.msk.f32.vlgmr.msra.gmra.mrb[128].mxu0 %vm348_vm0, %v5885_v9  ;;  %v5887_v2 = vsub.f32 %v10879_v25, %v8078_v50 }
0x15bd   : > { %v5886_v7 = vsub.f32 %v10874_v22, %v5458_v49 }
0x15bf   : > { %v8081_v32 = vpop.f32.mrb[116].mxu0  ;;  %8152 = vmatprep.mubr.msk.f32.mxu0 %vm348_vm0, %v5886_v7 }
0x15c0   : > { %v5468_v37 = vpop.f32.mrb[117].mxu0  ;;  %8153 = vmatmul.mubr.msk.f32.gmra.mrb[130].mxu0 %vm348_vm0, %v5887_v2  ;;  %v5889_v17 = vsub.f32 %v10893_v59, %v8081_v32 }
0x15c1   : > { %v5888_v51 = vsub.f32 %v10889_v15, %v5468_v37 }
0x15c3   : > { %v8084_v48 = vpop.f32.mrb[118].mxu0  ;;  %8155 = vmatprep.mubr.msk.f32.mxu0 %vm348_vm0, %v5888_v51 }
0x15c4   : > { %v5478_v30 = vpop.f32.mrb[119].mxu0  ;;  %8156 = vmatmul.mubr.msk.f32.gmra.mrb[132].mxu0 %vm348_vm0, %v5889_v17  ;;  %v5891_v40 = vsub.f32 %v10903_v10, %v8084_v48 }
0x15c5   : > { %v5890_v57 = vsub.f32 %v10900_v20, %v5478_v30 }
0x15c7   : > { %8158 = vmatprep.mubr.msk.f32.mxu0 %vm348_vm0, %v5890_v57 }
0x15c8   : > { %8159 = vmatmul.mubr.msk.f32.gmra.mrb[134].mxu0 %vm348_vm0, %v5891_v40 }
0x15d6   : > { %v8131_v39 = vpop.f32.mrb[120].mxu0 }
0x15d7   : > { %v5845_v3 = vpop.f32.mrb[121].mxu0  ;;  %v5893_v42 = vsub.f32 %v10927_v24, %v8131_v39 }
0x15d8   : > { %v5892_v1 = vsub.f32 %v10922_v47, %v5845_v3 }
0x15da   : > { %v8134_v54 = vpop.f32.mrb[122].mxu0  ;;  %8161 = vmatprep.mubr.msk.f32.mxu0 %vm348_vm0, %v5892_v1 }
0x15db   : > { %v5855_v16 = vpop.f32.mrb[123].mxu0  ;;  %8162 = vmatmul.mubr.msk.f32.gmra.mrb[136].mxu0 %vm348_vm0, %v5893_v42  ;;  %v5895_v58 = vsub.f32 %v10943_v28, %v8134_v54 }
0x15dc   : > { %v5894_v56 = vsub.f32 %v10938_v29, %v5855_v16 }
0x15de   : > { %v8137_v0 = vpop.f32.mrb[124].mxu0  ;;  %8164 = vmatprep.mubr.msk.f32.mxu0 %vm348_vm0, %v5894_v56 }
0x15df   : > { %v5865_v41 = vpop.f32.mrb[125].mxu0  ;;  %8165 = vmatmul.mubr.msk.f32.gmra.mrb[138].mxu0 %vm348_vm0, %v5895_v58  ;;  %v5897_v62 = vsub.f32 %v10957_v34, %v8137_v0 }
0x15e0   : > { %v5896_v33 = vsub.f32 %v10953_v36, %v5865_v41 }
0x15e2   : > { %v8140_v46 = vpop.f32.mrb[126].mxu0  ;;  %8167 = vmatprep.mubr.msk.f32.mxu0 %vm348_vm0, %v5896_v33 }
0x15e3   : > { %v5875_v13 = vpop.f32.mrb[127].mxu0  ;;  %8168 = vmatmul.mubr.msk.f32.gmra.mrb[140].mxu0 %vm348_vm0, %v5897_v62  ;;  %v5899_v60 = vsub.f32 %v11678_v4, %v8140_v46 }
0x15e4   : > { %v5898_v53 = vsub.f32 %v10964_v11, %v5875_v13 }
0x15e6   : > { %8170 = vmatprep.mubr.msk.f32.mxu0 %vm348_vm0, %v5898_v53 }
0x15e7   : > { %8171 = vmatmul.mubr.msk.f32.gmra.mrb[142].mxu0 %vm348_vm0, %v5899_v60 }
0x168f   : > { %v8151_v19 = vpop.f32.mrb[128].mxu0 }
0x1690   : > { %v6030_v8 = vadd.f32 %v8151_v19, %v11327_v14  ;;  %v6024_v45 = vpop.f32.mrb[129].mxu0 }
0x1691   : > { %v6025_v21 = vadd.f32 %v11327_v14, %v6024_v45 }
0x1692   : > { %v6109_v38 = vmul.f32 %v11329_v12, %v6030_v8 }
0x1693   : > { %v6108_v63 = vmul.f32 %v11329_v12, %v6025_v21  ;;  %v8154_v5 = vpop.f32.mrb[130].mxu0 }
0x1694   : > { %v6130_v23 = vadd.f32 %v11332_v27, %v6109_v38  ;;  %v6040_v31 = vadd.f32 %v8154_v5, %v11327_v14  ;;  %v6034_v44 = vpop.f32.mrb[131].mxu0 }
0x1695   : > { %v6129_v35 = vadd.f32 %v11332_v27, %v6108_v63  ;;  %v6035_v43 = vadd.f32 %v11327_v14, %v6034_v44 }
0x1696   : > { %v6146_v18 = vmax.f32 %v6130_v23, 0.0  ;;  %v6111_v55 = vmul.f32 %v11329_v12, %v6040_v31 }
0x1697   : > { %v6145_v61 = vmax.f32 %v6129_v35, 0.0  ;;  %v6110_v6 = vmul.f32 %v11329_v12, %v6035_v43  ;;  %v8157_v9 = vpop.f32.mrb[132].mxu0 }
0x1698   : > { %v6162_v50 = vadd.f32 %v6146_v18, %v10863_v52  ;;  %v6132_v49 = vadd.f32 %v11332_v27, %v6111_v55  ;;  %v6050_v7 = vadd.f32 %v8157_v9, %v11327_v14  ;;  %v6044_v2 = vpop.f32.mrb[133].mxu0 }
0x1699   : > { %v6161_v32 = vadd.f32 %v6145_v61, %v10858_v26  ;;  %v6131_v37 = vadd.f32 %v11332_v27, %v6110_v6  ;;  %v6045_v51 = vadd.f32 %v11327_v14, %v6044_v2 }
0x169a   : > { %v6148_v17 = vmax.f32 %v6132_v49, 0.0  ;;  %v6113_v48 = vmul.f32 %v11329_v12, %v6050_v7  ;;  %6291 = vrot.lane.b32.xlu0 %v6162_v50, %s9173_s24 }
0x169b   : > { %v6147_v30 = vmax.f32 %v6131_v37, 0.0  ;;  %v6112_v57 = vmul.f32 %v11329_v12, %v6045_v51  ;;  %v8160_v52 = vpop.f32.mrb[134].mxu0  ;;  %6289 = vrot.lane.b32.xlu1 %v6161_v32, %s9173_s24 }
0x169c   : > { %v6164_v40 = vadd.f32 %v6148_v17, %v10879_v25  ;;  %v6134_v39 = vadd.f32 %v11332_v27, %v6113_v48  ;;  %v6060_v26 = vadd.f32 %v8160_v52, %v11327_v14  ;;  %v6054_v3 = vpop.f32.mrb[135].mxu0 }
0x169d   : > { %v6163_v1 = vadd.f32 %v6147_v30, %v10874_v22  ;;  %v6133_v42 = vadd.f32 %v11332_v27, %v6112_v57  ;;  %v6055_v54 = vadd.f32 %v11327_v14, %v6054_v3 }
0x169e   : > { %v6150_v16 = vmax.f32 %v6134_v39, 0.0  ;;  %v6115_v56 = vmul.f32 %v11329_v12, %v6060_v26  ;;  %6295 = vrot.lane.b32.xlu0 %v6164_v40, %s9173_s24 }
0x169f   : > { %v6149_v58 = vmax.f32 %v6133_v42, 0.0  ;;  %v6114_v0 = vmul.f32 %v11329_v12, %v6055_v54  ;;  %6293 = vrot.lane.b32.xlu1 %v6163_v1, %s9173_s24 }
0x16a0   : > { %v6166_v25 = vadd.f32 %v6150_v16, %v10893_v59  ;;  %v6136_v41 = vadd.f32 %v11332_v27, %v6115_v56  ;;  %v11373_v59 = vpop.permute.xlu0 %6177 }
0x16a1   : > { %v6165_v22 = vadd.f32 %v6149_v58, %v10889_v15  ;;  %v6135_v33 = vadd.f32 %v11332_v27, %v6114_v0  ;;  %v11375_v15 = vpop.permute.xlu1 %6179 }
0x16a2   : > { %v6152_v62 = vmax.f32 %v6136_v41, 0.0  ;;  %6299 = vrot.lane.b32.xlu0 %v6166_v25, %s9173_s24 }
0x16a3   : > { %v6151_v46 = vmax.f32 %v6135_v33, 0.0  ;;  %6297 = vrot.lane.b32.xlu1 %v6165_v22, %s9173_s24 }
0x16a4   : > { %v6168_v13 = vadd.f32 %v6152_v62, %v10903_v10  ;;  %v11383_v23 = vpop.permute.xlu0 %6183 }
0x16a5   : > { %v6167_v53 = vadd.f32 %v6151_v46, %v10900_v20  ;;  %v11387_v35 = vpop.permute.xlu1 %6181 }
0x16a6   : > { %6303 = vrot.lane.b32.xlu0 %v6168_v13, %s9173_s24 }
0x16a7   : > { %6301 = vrot.lane.b32.xlu1 %v6167_v53, %s9173_s24 }
0x16a8   : > { %v11399_v48 = vpop.permute.xlu0 %6187 }
0x16a9   : > { %v11403_v52 = vpop.permute.xlu1 %6185 }
0x16ac   : > { %v11417_v25 = vpop.permute.xlu0 %6191 }
0x16ad   : > { %v11421_v41 = vpop.permute.xlu1 %6189 }
0x16ae   : > { %v8163_v60 = vpop.f32.mrb[136].mxu0 }
0x16af   : > { %v6070_v19 = vadd.f32 %v8163_v60, %v11327_v14  ;;  %v6064_v8 = vpop.f32.mrb[137].mxu0 }
0x16b0   : > { %v6065_v45 = vadd.f32 %v11327_v14, %v6064_v8  ;;  %v11428_v62 = vpop.permute.xlu0 %6195 }
0x16b1   : > { %v6117_v21 = vmul.f32 %v11329_v12, %v6070_v19 }
0x16b2   : > { %v6116_v10 = vmul.f32 %v11329_v12, %v6065_v45  ;;  %v8166_v38 = vpop.f32.mrb[138].mxu0 }
0x16b3   : > { %v6138_v20 = vadd.f32 %v11332_v27, %v6117_v21  ;;  %v6080_v63 = vadd.f32 %v8166_v38, %v11327_v14  ;;  %v6074_v5 = vpop.f32.mrb[139].mxu0 }
0x16b4   : > { %v6137_v31 = vadd.f32 %v11332_v27, %v6116_v10  ;;  %v6075_v44 = vadd.f32 %v11327_v14, %v6074_v5 }
0x16b5   : > { %v6154_v43 = vmax.f32 %v6138_v20, 0.0  ;;  %v6119_v18 = vmul.f32 %v11329_v12, %v6080_v63 }
0x16b6   : > { %v6153_v55 = vmax.f32 %v6137_v31, 0.0  ;;  %v6118_v61 = vmul.f32 %v11329_v12, %v6075_v44  ;;  %v8169_v6 = vpop.f32.mrb[140].mxu0 }
0x16b7   : > { %v6170_v9 = vadd.f32 %v6154_v43, %v10927_v24  ;;  %v6140_v50 = vadd.f32 %v11332_v27, %v6119_v18  ;;  %v6090_v49 = vadd.f32 %v8169_v6, %v11327_v14  ;;  %v6084_v7 = vpop.f32.mrb[141].mxu0  ;;  %v11683_v6 = vld [vmem:[#allocation17_spill] sm:$0xff] }
0x16b8   : > { %v6169_v2 = vadd.f32 %v6153_v55, %v10922_v47  ;;  %v6139_v32 = vadd.f32 %v11332_v27, %v6118_v61  ;;  %v6085_v37 = vadd.f32 %v11327_v14, %v6084_v7 }
0x16b9   : > { %v6156_v51 = vmax.f32 %v6140_v50, 0.0  ;;  %v6121_v17 = vmul.f32 %v11329_v12, %v6090_v49  ;;  %6307 = vrot.lane.b32.xlu0 %v6170_v9, %s9173_s24  ;;  %v6338_v9 = vsel %vm348_vm0, %v11683_v6, %v11375_v15  ;;  %v11684_v50 = vld [vmem:[#allocation16_spill] sm:$0xff] }
0x16ba   : > { %v6155_v30 = vmax.f32 %v6139_v32, 0.0  ;;  %v6120_v24 = vmul.f32 %v11329_v12, %v6085_v37  ;;  %6305 = vrot.lane.b32.xlu1 %v6169_v2, %s9173_s24  ;;  %v8172_v57 = vpop.f32.mrb[142].mxu0  ;;  %v6337_v49 = vsel %vm348_vm0, %v11684_v50, %v11373_v59  ;;  %v11693_v50 = vld [vmem:[#allocation27_spill] sm:$0xff] }
0x16bb   : > { %v6172_v47 = vadd.f32 %v6156_v51, %v10943_v28  ;;  %v6142_v40 = vadd.f32 %v11332_v27, %v6121_v17  ;;  %v6100_v39 = vadd.f32 %v8172_v57, %v11327_v14  ;;  %v6094_v26 = vpop.f32.mrb[143].mxu0  ;;  %v11685_v17 = vld [vmem:[#allocation19_spill] sm:$0xff] }
0x16bc   : > { %v6171_v3 = vadd.f32 %v6155_v30, %v10938_v29  ;;  %v6141_v1 = vadd.f32 %v11332_v27, %v6120_v24  ;;  %v6095_v42 = vadd.f32 %v11327_v14, %v6094_v26  ;;  %v6340_v59 = vsel %vm348_vm0, %v11685_v17, %v11383_v23  ;;  %v11686_v30 = vld [vmem:[#allocation18_spill] sm:$0xff]  ;;  %v11687_v23 = vld [vmem:[#allocation21_spill] sm:$0xff] }
0x16bd   : > { %v6158_v54 = vmax.f32 %v6142_v40, 0.0  ;;  %v6123_v16 = vmul.f32 %v11329_v12, %v6100_v39  ;;  %6311 = vrot.lane.b32.xlu0 %v6172_v47, %s9173_s24  ;;  %v6339_v24 = vsel %vm348_vm0, %v11686_v30, %v11387_v35  ;;  %v11688_v35 = vld [vmem:[#allocation20_spill] sm:$0xff] }
0x16be   : > { %v6157_v56 = vmax.f32 %v6141_v1, 0.0  ;;  %v6122_v58 = vmul.f32 %v11329_v12, %v6095_v42  ;;  %6309 = vrot.lane.b32.xlu1 %v6171_v3, %s9173_s24  ;;  %v6342_v1 = vsel %vm348_vm0, %v11687_v23, %v11399_v48  ;;  %v6341_v42 = vsel %vm348_vm0, %v11688_v35, %v11403_v52  ;;  %v11689_v48 = vld [vmem:[#allocation23_spill] sm:$0xff]  ;;  %v11690_v52 = vld [vmem:[#allocation22_spill] sm:$0xff] }
0x16bf   : > { %v6174_v28 = vadd.f32 %v6158_v54, %v10957_v34  ;;  %v6144_v0 = vadd.f32 %v11332_v27, %v6123_v16 }
0x16c0   : > { %v6173_v29 = vadd.f32 %v6157_v56, %v10953_v36  ;;  %v6143_v14 = vadd.f32 %v11332_v27, %v6122_v58  ;;  %v11431_v36 = vpop.permute.xlu1 %6193  ;;  %v11433_v27 = vpop.permute.xlu0 %6199 }
0x16c1   : > { %v6160_v22 = vmax.f32 %v6144_v0, 0.0  ;;  %6315 = vrot.lane.b32.xlu0 %v6174_v28, %s9173_s24 }
0x16c2   : > { %v6159_v33 = vmax.f32 %v6143_v14, 0.0  ;;  %6313 = vrot.lane.b32.xlu1 %v6173_v29, %s9173_s24  ;;  %v6344_v29 = vsel %vm348_vm0, %v11689_v48, %v11417_v25  ;;  %v6343_v14 = vsel %vm348_vm0, %v11690_v52, %v11421_v41  ;;  %v11691_v25 = vld [vmem:[#allocation25_spill] sm:$0xff]  ;;  %v11692_v41 = vld [vmem:[#allocation24_spill] sm:$0xff] }
0x16c3   : > { %v6176_v12 = vadd.f32 %v6160_v22, %v11678_v4 }
0x16c4   : > { %v6175_v34 = vadd.f32 %v6159_v33, %v10964_v11  ;;  %v11435_v46 = vpop.permute.xlu1 %6197  ;;  %v11437_v13 = vpop.permute.xlu0 %6203 }
0x16c5   : > { %6319 = vrot.lane.b32.xlu0 %v6176_v12, %s9173_s24 }
0x16c6   : > { %6317 = vrot.lane.b32.xlu1 %v6175_v34, %s9173_s24 }
0x16c8   : > { %v11439_v53 = vpop.permute.xlu1 %6201  ;;  %v11441_v60 = vpop.permute.xlu0 %6207 }
0x16cc   : > { %v11443_v4 = vpop.permute.xlu1 %6205  ;;  %v6228_v11 = vpop.permute.xlu0 %6227 }
0x16cd   : > { %v6354_v7 = vsel %vm1317_vm3, %v6338_v9, %v6228_v11 }
0x16d0   : > { %v6226_v19 = vpop.permute.xlu1 %6225  ;;  %v6232_v8 = vpop.permute.xlu0 %6231 }
0x16d1   : > { %v6353_v32 = vsel %vm1317_vm3, %v6337_v49, %v6226_v19  ;;  %v6356_v57 = vsel %vm1317_vm3, %v6340_v59, %v6232_v8  ;;  %v6346_v8 = vsel %vm348_vm0, %v11691_v25, %v11428_v62  ;;  %v6348_v62 = vsel %vm348_vm0, %v11693_v50, %v11433_v27 }
0x16d4   : > { %v6230_v45 = vpop.permute.xlu1 %6229  ;;  %v6236_v21 = vpop.permute.xlu0 %6235 }
0x16d5   : > { %v6355_v40 = vsel %vm1317_vm3, %v6339_v24, %v6230_v45  ;;  %v6358_v54 = vsel %vm1317_vm3, %v6342_v1, %v6236_v21  ;;  %v6345_v45 = vsel %vm348_vm0, %v11692_v41, %v11431_v36  ;;  %v11694_v36 = vld [vmem:[#allocation26_spill] sm:$0xff] }
0x16d6   : > { %v6347_v49 = vsel %vm348_vm0, %v11694_v36, %v11435_v46 }
0x16d8   : > { %v6234_v10 = vpop.permute.xlu1 %6233  ;;  %v6240_v38 = vpop.permute.xlu0 %6239 }
0x16d9   : > { %v6357_v56 = vsel %vm1317_vm3, %v6341_v42, %v6234_v10  ;;  %v6360_v22 = vsel %vm1317_vm3, %v6344_v29, %v6240_v38 }
0x16dc   : > { %v6238_v20 = vpop.permute.xlu1 %6237  ;;  %v6244_v63 = vpop.permute.xlu0 %6243 }
0x16dd   : > { %v6359_v12 = vsel %vm1317_vm3, %v6343_v14, %v6238_v20  ;;  %v6362_v21 = vsel %vm1317_vm3, %v6346_v8, %v6244_v63 }
0x16e0   : > { %v6242_v5 = vpop.permute.xlu1 %6241  ;;  %v6248_v31 = vpop.permute.xlu0 %6247 }
0x16e1   : > { %v6361_v38 = vsel %vm1317_vm3, %v6345_v45, %v6242_v5  ;;  %v6364_v63 = vsel %vm1317_vm3, %v6348_v62, %v6248_v31  ;;  %v11696_v31 = vld [vmem:[#allocation28_spill] sm:$0xff] }
0x16e4   : > { %v11445_v44 = vpop.permute.xlu1 %6245  ;;  %v11447_v43 = vpop.permute.xlu0 %6251 }
0x16e8   : > { %v11449_v18 = vpop.permute.xlu1 %6249  ;;  %v11451_v55 = vpop.permute.xlu0 %6255 }
0x16ec   : > { %v11454_v61 = vpop.permute.xlu1 %6253 }
0x170c   : > { %v6292_v2 = vpop.permute.xlu0 %6291 }
0x170d   : > { %v6371_v37 = vsel %vm6369_vm4, %v6354_v7, %v6292_v2  ;;  %v6290_v51 = vpop.permute.xlu1 %6289  ;;  %v6363_v7 = vsel %vm1317_vm3, %v6347_v49, %v11445_v44 }
0x170e   : > { %6387 = vst [vmem:[%s11465_s13 + $0x8] sm:$0xff] %v6371_v37  ;;  %v6370_v15 = vsel %vm6369_vm4, %v6353_v32, %v6290_v51  ;;  %v11695_v37 = vld [vmem:[#allocation29_spill] sm:$0xff]  ;;  %v6349_v51 = vsel %vm348_vm0, %v11696_v31, %v11439_v53  ;;  %v11697_v53 = vld [vmem:[#allocation31_spill] sm:$0xff] }
0x170f   : > { %6386 = vst [vmem:[%s11465_s13] sm:$0xff] %v6370_v15  ;;  %v6350_v46 = vsel %vm348_vm0, %v11695_v37, %v11437_v13  ;;  %v6365_v17 = vsel %vm1317_vm3, %v6349_v51, %v11449_v18  ;;  %v6352_v24 = vsel %vm348_vm0, %v11697_v53, %v11441_v60 }
0x1710   : > { %v6296_v47 = vpop.permute.xlu0 %6295  ;;  %v6366_v15 = vsel %vm1317_vm3, %v6350_v46, %v11447_v43  ;;  %v11698_v43 = vld [vmem:[#allocation30_spill] sm:$0xff] }
0x1711   : > { %v6373_v39 = vsel %vm6369_vm4, %v6356_v57, %v6296_v47  ;;  %v6294_v26 = vpop.permute.xlu1 %6293  ;;  %v6351_v18 = vsel %vm348_vm0, %v11698_v43, %v11443_v4  ;;  %v6368_v57 = vsel %vm1317_vm3, %v6352_v24, %v11451_v55 }
0x1712   : > { %6389 = vst [vmem:[%s11465_s13 + $0x18] sm:$0xff] %v6373_v39  ;;  %v6372_v3 = vsel %vm6369_vm4, %v6355_v40, %v6294_v26  ;;  %v6367_v60 = vsel %vm1317_vm3, %v6351_v18, %v11454_v61 }
0x1713   : > { %6388 = vst [vmem:[%s11465_s13 + $0x10] sm:$0xff] %v6372_v3 }
0x1714   : > { %v6300_v16 = vpop.permute.xlu0 %6299 }
0x1715   : > { %v6375_v58 = vsel %vm6369_vm4, %v6358_v54, %v6300_v16  ;;  %v6298_v28 = vpop.permute.xlu1 %6297 }
0x1716   : > { %6391 = vst [vmem:[%s11465_s13 + $0x28] sm:$0xff] %v6375_v58  ;;  %v6374_v0 = vsel %vm6369_vm4, %v6357_v56, %v6298_v28 }
0x1717   : > { %6390 = vst [vmem:[%s11465_s13 + $0x20] sm:$0xff] %v6374_v0 }
0x1718   : > { %v6304_v33 = vpop.permute.xlu0 %6303 }
0x1719   : > { %v6377_v34 = vsel %vm6369_vm4, %v6360_v22, %v6304_v33  ;;  %v6302_v11 = vpop.permute.xlu1 %6301 }
0x171a   : > { %6393 = vst [vmem:[%s11465_s13 + $0x38] sm:$0xff] %v6377_v34  ;;  %v6376_v19 = vsel %vm6369_vm4, %v6359_v12, %v6302_v11 }
0x171b   : > { %6392 = vst [vmem:[%s11465_s13 + $0x30] sm:$0xff] %v6376_v19 }
0x172b   : > { %v6308_v10 = vpop.permute.xlu0 %6307 }
0x172c   : > { %v6379_v20 = vsel %vm6369_vm4, %v6362_v21, %v6308_v10  ;;  %v6306_v6 = vpop.permute.xlu1 %6305 }
0x172d   : > { %6920 = vst [vmem:[%s11465_s13 + $0x48] sm:$0xff] %v6379_v20  ;;  %v6378_v9 = vsel %vm6369_vm4, %v6361_v38, %v6306_v6 }
0x172e   : > { %6919 = vst [vmem:[%s11465_s13 + $0x40] sm:$0xff] %v6378_v9 }
0x172f   : > { %v6312_v5 = vpop.permute.xlu0 %6311 }
0x1730   : > { %v6381_v2 = vsel %vm6369_vm4, %v6364_v63, %v6312_v5  ;;  %v6310_v32 = vpop.permute.xlu1 %6309 }
0x1731   : > { %6922 = vst [vmem:[%s11465_s13 + $0x58] sm:$0xff] %v6381_v2  ;;  %v6380_v27 = vsel %vm6369_vm4, %v6363_v7, %v6310_v32 }
0x1732   : > { %6921 = vst [vmem:[%s11465_s13 + $0x50] sm:$0xff] %v6380_v27 }
0x1733   : > { %v6316_v44 = vpop.permute.xlu0 %6315 }
0x1734   : > { %v6383_v59 = vsel %vm6369_vm4, %v6366_v15, %v6316_v44  ;;  %v6314_v30 = vpop.permute.xlu1 %6313 }
0x1735   : > { %6924 = vst [vmem:[%s11465_s13 + $0x68] sm:$0xff] %v6383_v59  ;;  %v6382_v13 = vsel %vm6369_vm4, %v6365_v17, %v6314_v30 }
0x1736   : > { %6923 = vst [vmem:[%s11465_s13 + $0x60] sm:$0xff] %v6382_v13 }
0x1737   : > { %v6320_v47 = vpop.permute.xlu0 %6319 }
0x1738   : > { %v6385_v40 = vsel %vm6369_vm4, %v6368_v57, %v6320_v47  ;;  %v6318_v4 = vpop.permute.xlu1 %6317 }
0x1739   : > { %6926 = vst [vmem:[%s11465_s13 + $0x78] sm:$0xff] %v6385_v40  ;;  %v6384_v55 = vsel %vm6369_vm4, %v6367_v60, %v6318_v4 }
0x173a   : > { %6925 = vst [vmem:[%s11465_s13 + $0x70] sm:$0xff] %v6384_v55 }
0x173b   : > { %9103 = shalt.err (!%p9100_p13)
}
0x173c   : > { %s9104_s12 = scalar_lea.hbm %s11558_s9, 2048  ;;  %s9108_s23 = scalar_lea.hbm %s11615_s5, 4096 }
0x173d   : > { %p9105_p9 = scmp.ne.s32.totalorder %s11558_s9, %s9104_s12  ;;  %p9109_p11 = scmp.lt.u32.totalorder %s11558_s9, %s11615_s5 }
0x173e   : > { %p9110_p8 = scmp.lt.u32.totalorder %s9108_s23, %s9104_s12  ;;  %p9112_p3 = scmp.lt.u32.totalorder %s9104_s12, %s11558_s9 }
0x173f   : > { %p9106_p0 = pnand %p9105_p9, %p9380_p10 }
0x1740   : > { %p9111_p6 = por %p9110_p8, %p9109_p11 }
0x1741   : > { %p9107_p4 = pneg %p9106_p0 }
0x1742   : > { %p9113_p5 = por %p9112_p3, %p9111_p6 }
0x1744   : > { %p9114_p7 = pnand %p9113_p5, %p9107_p4 }
0x1746   : > { %9117 = shalt.err (!%p9114_p7)
}
0x1747   : > { %s9177_s8 = smov 128   ;;  %s9178_s22 = smov 8  }
0x1748   : > { %8599 = dma.vmem_to_hbm [thread:$0]  (%p9380_p10), %s11560_s16, 2048, %s11558_s9, %s6404_s15, %s9177_s8, %s9177_s8, %s9178_s22  }
0x1749 PF: > { %s6433_s6 = sand.u32 1, %s9152_s18   ;;  %p11699_p12 = scmp.ne.s32.totalorder %s11642_s25, 0 }
0x174a   : > { %p11700_p1 = scmp.ge.s32.totalorder %s9164_s21, 2  ;;  %s6434_s28 = scalar_lea.sflag [#allocation4], %s6433_s6 }
0x174c   : > { %p8619_p2 = pnand %p11700_p1, %p11699_p12 }
0x174e   : > { %9147 = dma.done.wait (!%p8619_p2), %s6434_s28, 2048  }
0x174f   : > { %9149 = vsyncadd (!%p8619_p2), %s6434_s28, 4294965248  ;;  %p20_p13 = scmp.ge.s32.totalorder %s9370_s14, 4   ;;  %s11701_s18 = smov %s9156_s19 }
0x1750   : > { %s11702_s19 = smov %s9160_s20  ;;  %s11703_s20 = smov %s9386_s7 }
0x1751   : > { %s11704_s21 = smov %s9370_s14  ;;  %22 = sbr.rel (!%p20_p13) target bundleno = 7 (0x7), region = 109 }
0x1758   :  { %6439 = vsyncpa [#allocation3], 1 }
0x1759   :  { %6441 = vsyncpa [#allocation3 + $0x1], 1 }
0x175a   :  { %6442 = vsyncpa [#allocation6], 1 }
0x175b   :  { %6443 = vsyncpa [#allocation9], 1 }
0x175c   :  { %6444 = vsyncpa [#allocation4], 1 }
0x175d   :  { %6446 = vsyncpa [#allocation4 + $0x1], 1 }

</bundles_post_ra>
